<compile_context>
chip_gen: v6e
topology: v6e:2x2x1
jax: 0.10.0
libtpu: 0.0.40
codegen_flags: <defaults>
</compile_context>

<pallas_src>
import functools

import jax
import jax.numpy as jnp
from jax import lax
from jax.experimental import pallas as pl
from jax.experimental.pallas import tpu as pltpu


def _round_up(x, m):
    return (x + m - 1) // m * m


def _sigmoid(x):
    # tanh form: a single EUP pass instead of exp + reciprocal.
    return 0.5 * (jnp.tanh(0.5 * x) + 1.0)


def _lstm_classifier_kernel(x_ref,     # (Tt*Tb, Ep)  bf16  chunk of embedded inputs
                            wih_ref,   # (Ep, 4Hp)    bf16  W_ih^T (per-gate padded)
                            whh_ref,   # (Hp, 4Hp)    bf16  W_hh^T (per-gate padded)
                            b_ref,     # (1, 4Hp)     f32   b_ih + b_hh
                            wlin_ref,  # (Hp, Cp)     bf16  W_linear^T
                            blin_ref,  # (1, Cp)      f32   b_linear
                            out_ref,   # (Tb, Cp)     f32   logits block
                            xg_scr,    # (Tt*Tb, 4Hp) f32   precomputed input gates
                            h_scr,     # (Tb, Hp)     bf16  hidden state across chunks
                            c_scr,     # (Tb, Hp)     f32   cell state across chunks
                            *, seq_len, unroll):
    Hp = whh_ref.shape[0]
    TB = h_scr.shape[0]
    TT = x_ref.shape[0] // TB
    t_chunk = pl.program_id(1)
    last_chunk = pl.num_programs(1) - 1

    # ---- Phase 1: whole-chunk input-path GEMM (one big MXU matmul + fused bias).
    xg_scr[...] = (jnp.dot(x_ref[...], wih_ref[...],
                           preferred_element_type=jnp.float32) + b_ref[...])

    # ---- Zero recurrent state at the first time chunk of each batch block.
    @pl.when(t_chunk == 0)
    def _():
        h_scr[...] = jnp.zeros_like(h_scr)
        c_scr[...] = jnp.zeros_like(c_scr)

    t0 = t_chunk * TT

    # ---- Phase 2: serial recurrence, h (bf16) / c (f32) register-resident.
    def make_step(mask):
        def step(t, carry):
            h, c = carry
            row = pl.multiple_of(t * TB, TB)
            gates = (xg_scr[pl.ds(row, TB), :]
                     + jnp.dot(h, whh_ref[...],
                               preferred_element_type=jnp.float32))   # (Tb, 4Hp) f32
            # PyTorch gate order: i, f, g, o. Hp is a lane multiple so each
            # slice is a full lane-aligned tile.
            i_g = _sigmoid(gates[:, 0 * Hp:1 * Hp])
            f_g = _sigmoid(gates[:, 1 * Hp:2 * Hp])
            g_g = jnp.tanh(gates[:, 2 * Hp:3 * Hp])
            o_g = _sigmoid(gates[:, 3 * Hp:4 * Hp])
            c_new = f_g * c + i_g * g_g
            h_new = (o_g * jnp.tanh(c_new)).astype(jnp.bfloat16)
            if mask:                       # only traced for the final chunk
                valid = (t0 + t) < seq_len
                h_new = jnp.where(valid, h_new, h)
                c_new = jnp.where(valid, c_new, c)
            return h_new, c_new
        return step

    def run_chunk(mask, write_out):
        h, c = lax.fori_loop(0, TT, make_step(mask),
                             (h_scr[...], c_scr[...]), unroll=unroll)
        h_scr[...] = h
        c_scr[...] = c
        if write_out:
            # Dropout is identity in eval mode (inference semantics).
            out_ref[...] = (jnp.dot(h, wlin_ref[...],
                                    preferred_element_type=jnp.float32)
                            + blin_ref[...])

    if (seq_len % TT) != 0:
        # Padded timesteps exist only in the final chunk: steady-state chunks
        # stay select-free; only the last chunk pays the per-step mask.
        @pl.when(t_chunk != last_chunk)
        def _():
            run_chunk(mask=False, write_out=False)

        @pl.when(t_chunk == last_chunk)
        def _():
            run_chunk(mask=True, write_out=True)
    else:
        run_chunk(mask=False, write_out=False)

        # ---- Phase 3: classifier head on the final hidden state.
        @pl.when(t_chunk == last_chunk)
        def _():
            out_ref[...] = (jnp.dot(h_scr[...], wlin_ref[...],
                                    preferred_element_type=jnp.float32)
                            + blin_ref[...])


def _vmem_bytes(TT, TB, Ep, Hp, Cp):
    """(weight_bytes, stream+scratch_bytes) assuming single-buffered weights."""
    bf16, f32 = 2, 4
    weights = (Ep * 4 * Hp + Hp * 4 * Hp + Hp * Cp) * bf16 + (4 * Hp + Cp) * f32
    streams = 2 * TT * TB * Ep * bf16 + 2 * TB * Cp * f32   # double-buffered x / out
    scratch = TT * TB * 4 * Hp * f32 + TB * Hp * (bf16 + f32)
    return weights, streams + scratch


def _vmem_capacity_bytes():
    try:
        return int(pltpu.get_tpu_info().vmem_capacity_bytes)
    except Exception:
        return 64 << 20   # conservative (v7x per-TC size); safe on all chips


def lstm_classifier_forward(input_ids, params, *, time_block=32):
    """input_ids: (B, L) int32 token ids. Returns (B, C) float32 logits."""
    emb = params["embedding"]            # (V, E)
    w_ih = params["w_ih"]                # (4H, E)  PyTorch layout
    w_hh = params["w_hh"]                # (4H, H)
    b_ih = params["b_ih"]                # (4H,)
    b_hh = params["b_hh"]                # (4H,)
    w_lin = params["w_lin"]              # (C, H)
    b_lin = params["b_lin"]              # (C,)

    B, L = input_ids.shape
    E = emb.shape[1]
    H = w_hh.shape[1]
    C = w_lin.shape[0]

    # ---- TPU-friendly padded dims (lane=128, sublane=8).
    Ep = _round_up(E, 128)
    Hp = _round_up(H, 128)
    Cp = _round_up(C, 128)
    if B <= 128:
        # Split small batches into two blocks so the "parallel" batch axis can
        # be sharded across both TensorCores on v7x (near-free: the recurrence
        # is batch-independent).
        n_blocks = 2 if B > 1 else 1
        TB = _round_up(-(-B // n_blocks), 8)
        Bp = n_blocks * TB
    else:
        TB = 128
        Bp = _round_up(B, 128)
    n_b = Bp // TB

    # ---- Time chunk: as large as the VMEM budget allows (sweep knob).
    vmem_cap = int(0.85 * _vmem_capacity_bytes())   # ~54 MiB v7x, ~109 MiB v5e/v6e
    TT = max(1, min(time_block, L))
    while TT > 8 and sum(_vmem_bytes(TT, TB, Ep, Hp, Cp)) > vmem_cap:
        TT = max(8, TT // 2)
    Lp = _round_up(L, TT)
    n_t = Lp // TT
    unroll = TT if TT <= 16 else 8       # partial unroll once chunks get big

    # ---- Per-gate zero padding H -> Hp (keeps PyTorch i,f,g,o order; padded
    #      hidden units stay exactly zero through the recurrence).
    def pad_gate_rows(w):                                  # (4H, K) -> (4Hp, K)
        K = w.shape[1]
        return jnp.pad(w.reshape(4, H, K),
                       ((0, 0), (0, Hp - H), (0, 0))).reshape(4 * Hp, K)

    w_ih_p = jnp.pad(pad_gate_rows(w_ih), ((0, 0), (0, Ep - E)))   # (4Hp, Ep)
    w_hh_p = pad_gate_rows(jnp.pad(w_hh, ((0, 0), (0, Hp - H))))   # (4Hp, Hp)
    b_p = jnp.pad((b_ih + b_hh).reshape(4, H),
                  ((0, 0), (0, Hp - H))).reshape(1, 4 * Hp).astype(jnp.float32)
    w_lin_p = jnp.pad(w_lin, ((0, Cp - C), (0, Hp - H)))           # (Cp, Hp)
    blin_p = jnp.pad(b_lin, (0, Cp - C)).reshape(1, Cp).astype(jnp.float32)

    wih_t = jnp.transpose(w_ih_p).astype(jnp.bfloat16)    # (Ep, 4Hp)
    whh_t = jnp.transpose(w_hh_p).astype(jnp.bfloat16)    # (Hp, 4Hp)
    wlin_t = jnp.transpose(w_lin_p).astype(jnp.bfloat16)  # (Hp, Cp)

    # ---- Embedding lookup directly into (n_b, Lp*TB, Ep) layout: permute the
    #      tiny id matrix instead of transposing the big embedded tensor.
    emb_p = jnp.pad(emb, ((0, 0), (0, Ep - E))).astype(jnp.bfloat16)
    ids = jnp.pad(input_ids.astype(jnp.int32), ((0, Bp - B), (0, Lp - L)))
    ids = ids.reshape(n_b, TB, Lp)
    ids = jnp.transpose(ids, (0, 2, 1)).reshape(n_b, Lp * TB)  # [b, t*TB + r]
    x = jnp.take(emb_p, ids, axis=0)                           # (n_b, Lp*TB, Ep)

    # ---- Accurate VMEM budget: single-buffered weights + double-buffered x /
    #      out streams + scratch, 1.25x headroom, plus one extra weight copy in
    #      case the Buffered(1) fallback kicks in. Capped at ~85% of chip VMEM.
    w_bytes, dyn_bytes = _vmem_bytes(TT, TB, Ep, Hp, Cp)
    vmem_limit = int(min(max(int(1.25 * (w_bytes + dyn_bytes)) + w_bytes,
                             4 << 20), vmem_cap))

    kernel = functools.partial(_lstm_classifier_kernel, seq_len=L, unroll=unroll)

    def call(weight_mode):
        def wspec(shape):
            if weight_mode is None:
                return pl.BlockSpec(shape, lambda b, t: (0, 0))
            return pl.BlockSpec(shape, lambda b, t: (0, 0),
                                pipeline_mode=weight_mode)

        return pl.pallas_call(
            kernel,
            out_shape=jax.ShapeDtypeStruct((Bp, Cp), jnp.float32),
            grid_spec=pltpu.PrefetchScalarGridSpec(
                num_scalar_prefetch=0,
                grid=(n_b, n_t),                     # (batch blocks, time chunks)
                in_specs=[
                    pl.BlockSpec((None, TT * TB, Ep), lambda b, t: (b, t, 0)),
                    wspec((Ep, 4 * Hp)),             # W_ih^T   (constant operand)
                    wspec((Hp, 4 * Hp)),             # W_hh^T   (constant operand)
                    wspec((1, 4 * Hp)),              # fused bias
                    wspec((Hp, Cp)),                 # W_lin^T
                    wspec((1, Cp)),                  # b_lin
                ],
                out_specs=pl.BlockSpec((TB, Cp), lambda b, t: (b, 0)),
                scratch_shapes=[
                    pltpu.VMEM((TT * TB, 4 * Hp), jnp.float32),   # precomputed gates
                    pltpu.VMEM((TB, Hp), jnp.bfloat16),           # h across chunks
                    pltpu.VMEM((TB, Hp), jnp.float32),            # c across chunks
                ],
            ),
            compiler_params=pltpu.CompilerParams(
                dimension_semantics=("parallel", "arbitrary"),
                vmem_limit_bytes=vmem_limit,
            ),
        )(x, wih_t, whh_t, b_p, wlin_t, blin_p)

    try:
        out = call(pl.Buffered(1))   # weights: single VMEM copy (no double-buffer)
    except Exception:                # fallback for runtimes rejecting Buffered(1)
        out = call(None)

    return out[:B, :C]


def init_params(key, vocab_size, dim_list):
    E, H, C = dim_list
    keys = jax.random.split(key, 7)
    scale = 0.1
    return {
        "embedding": scale * jax.random.normal(keys[0], (vocab_size, E), jnp.float32),
        "w_ih": scale * jax.random.normal(keys[1], (4 * H, E), jnp.float32),
        "w_hh": scale * jax.random.normal(keys[2], (4 * H, H), jnp.float32),
        "b_ih": scale * jax.random.normal(keys[3], (4 * H,), jnp.float32),
        "b_hh": scale * jax.random.normal(keys[4], (4 * H,), jnp.float32),
        "w_lin": scale * jax.random.normal(keys[5], (C, H), jnp.float32),
        "b_lin": scale * jax.random.normal(keys[6], (C,), jnp.float32),
    }


if __name__ == "__main__":
    key = jax.random.PRNGKey(0)
    vocab_size = 100
    dim_list = [32, 32, 2]   # [embed_dim, hidden_dim, num_classes]
    B, L = 2, 8

    pkey, ikey = jax.random.split(key)
    params = init_params(pkey, vocab_size, dim_list)
    input_ids = jax.random.randint(ikey, (B, L), 0, vocab_size, dtype=jnp.int32)

    logits = lstm_classifier_forward(input_ids, params)
    jax.block_until_ready(logits)
    assert logits.shape == (B, dim_list[2])
    assert bool(jnp.all(jnp.isfinite(logits)))
    print("KERNEL_OK")
</pallas_src>

<mosaic_0001>
module attributes {stable_mosaic.version = 11 : i64} {
  func.func @_lstm_classifier_kernel(%arg0: i32, %arg1: i32, %arg2: memref<1x64x128xbf16, #tpu.memory_space<vmem>>, %arg3: memref<128x512xbf16, #tpu.memory_space<vmem>>, %arg4: memref<128x512xbf16, #tpu.memory_space<vmem>>, %arg5: memref<1x512xf32, #tpu.memory_space<vmem>>, %arg6: memref<128x128xbf16, #tpu.memory_space<vmem>>, %arg7: memref<1x128xf32, #tpu.memory_space<vmem>>, %arg8: memref<8x128xf32, #tpu.memory_space<vmem>>, %arg9: memref<64x512xf32, #tpu.memory_space<vmem>>, %arg10: memref<8x128xbf16, #tpu.memory_space<vmem>>, %arg11: memref<8x128xf32, #tpu.memory_space<vmem>>) attributes {dimension_semantics = [#tpu.dimension_semantics<parallel>, #tpu.dimension_semantics<arbitrary>], iteration_bounds = array<i64: 2, 1>, scalar_prefetch = 0 : i64, scratch_operands = 3 : i64, tpu.core_type = #tpu.core_type<tc>, window_params = [{transform_indices = @transform_0, window_bounds = array<i64: 1, 64, 128>}, {pipeline_mode = #tpu.pipeline_mode<synchronous>, transform_indices = @transform_1, window_bounds = array<i64: 128, 512>}, {pipeline_mode = #tpu.pipeline_mode<synchronous>, transform_indices = @transform_2, window_bounds = array<i64: 128, 512>}, {pipeline_mode = #tpu.pipeline_mode<synchronous>, transform_indices = @transform_3, window_bounds = array<i64: 1, 512>}, {pipeline_mode = #tpu.pipeline_mode<synchronous>, transform_indices = @transform_4, window_bounds = array<i64: 128, 128>}, {pipeline_mode = #tpu.pipeline_mode<synchronous>, transform_indices = @transform_5, window_bounds = array<i64: 1, 128>}, {transform_indices = @transform_6, window_bounds = array<i64: 8, 128>}]} {
    %c0 = arith.constant 0 : index
    %c0_0 = arith.constant 0 : index
    %c0_1 = arith.constant 0 : index
    %0 = vector.load %arg2[%c0, %c0_0, %c0_1] : memref<1x64x128xbf16, #tpu.memory_space<vmem>>, vector<1x64x128xbf16>
    %1 = vector.shape_cast %0 : vector<1x64x128xbf16> to vector<64x128xbf16>
    %c0_2 = arith.constant 0 : index
    %c0_3 = arith.constant 0 : index
    %2 = vector.load %arg3[%c0_2, %c0_3] : memref<128x512xbf16, #tpu.memory_space<vmem>>, vector<128x512xbf16>
    %cst = arith.constant dense<0.000000e+00> : vector<64x512xf32>
    %3 = tpu.matmul %1, %2, %cst {dimension_numbers = #tpu.dot_dimension_numbers<[1], [0], [0], [1], [0, 0, 1, 1], [], []>} : vector<64x128xbf16>, vector<128x512xbf16>, vector<64x512xf32> -> vector<64x512xf32>
    %c0_4 = arith.constant 0 : index
    %c0_5 = arith.constant 0 : index
    %4 = vector.load %arg5[%c0_4, %c0_5] : memref<1x512xf32, #tpu.memory_space<vmem>>, vector<1x512xf32>
    %5 = vector.broadcast %4 : vector<1x512xf32> to vector<64x512xf32>
    %6 = arith.addf %3, %5 : vector<64x512xf32>
    %c0_6 = arith.constant 0 : index
    %c0_7 = arith.constant 0 : index
    %7 = vector.load %arg9[%c0_6, %c0_7] : memref<64x512xf32, #tpu.memory_space<vmem>>, vector<64x512xf32>
    tpu.vector_store %arg9[%c0_6, %c0_7], %6 {strides = array<i32>} : memref<64x512xf32, #tpu.memory_space<vmem>>, vector<64x512xf32>,
    %c0_i32 = arith.constant 0 : i32
    %8 = arith.cmpi eq, %arg1, %c0_i32 : i32
    %9 = arith.extui %8 : i1 to i32
    %c0_i32_8 = arith.constant 0 : i32
    %10 = arith.cmpi ne, %9, %c0_i32_8 : i32
    scf.if %10 {
      %cst_132 = arith.constant 0.000000e+00 : bf16
      %330 = vector.broadcast %cst_132 : bf16 to vector<8x128xbf16>
      %c0_133 = arith.constant 0 : index
      %c0_134 = arith.constant 0 : index
      %331 = vector.load %arg10[%c0_133, %c0_134] : memref<8x128xbf16, #tpu.memory_space<vmem>>, vector<8x128xbf16>
      tpu.vector_store %arg10[%c0_133, %c0_134], %330 {strides = array<i32>} : memref<8x128xbf16, #tpu.memory_space<vmem>>, vector<8x128xbf16>,
      %cst_135 = arith.constant 0.000000e+00 : f32
      %332 = vector.broadcast %cst_135 : f32 to vector<8x128xf32>
      %c0_136 = arith.constant 0 : index
      %c0_137 = arith.constant 0 : index
      %333 = vector.load %arg11[%c0_136, %c0_137] : memref<8x128xf32, #tpu.memory_space<vmem>>, vector<8x128xf32>
      tpu.vector_store %arg11[%c0_136, %c0_137], %332 {strides = array<i32>} : memref<8x128xf32, #tpu.memory_space<vmem>>, vector<8x128xf32>,
    } else {
    }
    %c0_9 = arith.constant 0 : index
    %c0_10 = arith.constant 0 : index
    %11 = vector.load %arg10[%c0_9, %c0_10] : memref<8x128xbf16, #tpu.memory_space<vmem>>, vector<8x128xbf16>
    %c0_11 = arith.constant 0 : index
    %c0_12 = arith.constant 0 : index
    %12 = vector.load %arg11[%c0_11, %c0_12] : memref<8x128xf32, #tpu.memory_space<vmem>>, vector<8x128xf32>
    %c0_i32_13 = arith.constant 0 : i32
    %c8_i32 = arith.constant 8 : i32
    %13 = arith.muli %c0_i32_13, %c8_i32 : i32
    %14 = tpu.assume_multiple %13, 8 : i32
    %15 = arith.index_cast %14 : i32 to index
    %c0_14 = arith.constant 0 : index
    %16 = vector.load %arg9[%15, %c0_14] : memref<64x512xf32, #tpu.memory_space<vmem>>, vector<8x512xf32>
    %c0_15 = arith.constant 0 : index
    %c0_16 = arith.constant 0 : index
    %17 = vector.load %arg4[%c0_15, %c0_16] : memref<128x512xbf16, #tpu.memory_space<vmem>>, vector<128x512xbf16>
    %cst_17 = arith.constant dense<0.000000e+00> : vector<8x512xf32>
    %18 = tpu.matmul %11, %17, %cst_17 {dimension_numbers = #tpu.dot_dimension_numbers<[1], [0], [0], [1], [0, 0, 1, 1], [], []>} : vector<8x128xbf16>, vector<128x512xbf16>, vector<8x512xf32> -> vector<8x512xf32>
    %19 = arith.addf %16, %18 : vector<8x512xf32>
    %20 = vector.extract_strided_slice %19 {offsets = [0, 0], sizes = [8, 128], strides = [1, 1]} : vector<8x512xf32> to vector<8x128xf32>
    %cst_18 = arith.constant 5.000000e-01 : f32
    %21 = vector.broadcast %cst_18 : f32 to vector<8x128xf32>
    %22 = arith.mulf %21, %20 : vector<8x128xf32>
    %23 = math.tanh %22 : vector<8x128xf32>
    %cst_19 = arith.constant 1.000000e+00 : f32
    %24 = vector.broadcast %cst_19 : f32 to vector<8x128xf32>
    %25 = arith.addf %23, %24 : vector<8x128xf32>
    %cst_20 = arith.constant 5.000000e-01 : f32
    %26 = vector.broadcast %cst_20 : f32 to vector<8x128xf32>
    %27 = arith.mulf %26, %25 : vector<8x128xf32>
    %28 = vector.extract_strided_slice %19 {offsets = [0, 128], sizes = [8, 128], strides = [1, 1]} : vector<8x512xf32> to vector<8x128xf32>
    %cst_21 = arith.constant 5.000000e-01 : f32
    %29 = vector.broadcast %cst_21 : f32 to vector<8x128xf32>
    %30 = arith.mulf %29, %28 : vector<8x128xf32>
    %31 = math.tanh %30 : vector<8x128xf32>
    %cst_22 = arith.constant 1.000000e+00 : f32
    %32 = vector.broadcast %cst_22 : f32 to vector<8x128xf32>
    %33 = arith.addf %31, %32 : vector<8x128xf32>
    %cst_23 = arith.constant 5.000000e-01 : f32
    %34 = vector.broadcast %cst_23 : f32 to vector<8x128xf32>
    %35 = arith.mulf %34, %33 : vector<8x128xf32>
    %36 = vector.extract_strided_slice %19 {offsets = [0, 256], sizes = [8, 128], strides = [1, 1]} : vector<8x512xf32> to vector<8x128xf32>
    %37 = math.tanh %36 : vector<8x128xf32>
    %38 = vector.extract_strided_slice %19 {offsets = [0, 384], sizes = [8, 128], strides = [1, 1]} : vector<8x512xf32> to vector<8x128xf32>
    %cst_24 = arith.constant 5.000000e-01 : f32
    %39 = vector.broadcast %cst_24 : f32 to vector<8x128xf32>
    %40 = arith.mulf %39, %38 : vector<8x128xf32>
    %41 = math.tanh %40 : vector<8x128xf32>
    %cst_25 = arith.constant 1.000000e+00 : f32
    %42 = vector.broadcast %cst_25 : f32 to vector<8x128xf32>
    %43 = arith.addf %41, %42 : vector<8x128xf32>
    %cst_26 = arith.constant 5.000000e-01 : f32
    %44 = vector.broadcast %cst_26 : f32 to vector<8x128xf32>
    %45 = arith.mulf %44, %43 : vector<8x128xf32>
    %46 = arith.mulf %35, %12 : vector<8x128xf32>
    %47 = arith.mulf %27, %37 : vector<8x128xf32>
    %48 = arith.addf %46, %47 : vector<8x128xf32>
    %49 = math.tanh %48 : vector<8x128xf32>
    %50 = arith.mulf %45, %49 : vector<8x128xf32>
    %51 = arith.truncf %50 : vector<8x128xf32> to vector<8x128xbf16>
    %c1_i32 = arith.constant 1 : i32
    %c8_i32_27 = arith.constant 8 : i32
    %52 = arith.muli %c1_i32, %c8_i32_27 : i32
    %53 = tpu.assume_multiple %52, 8 : i32
    %54 = arith.index_cast %53 : i32 to index
    %c0_28 = arith.constant 0 : index
    %55 = vector.load %arg9[%54, %c0_28] : memref<64x512xf32, #tpu.memory_space<vmem>>, vector<8x512xf32>
    %c0_29 = arith.constant 0 : index
    %c0_30 = arith.constant 0 : index
    %56 = vector.load %arg4[%c0_29, %c0_30] : memref<128x512xbf16, #tpu.memory_space<vmem>>, vector<128x512xbf16>
    %cst_31 = arith.constant dense<0.000000e+00> : vector<8x512xf32>
    %57 = tpu.matmul %51, %56, %cst_31 {dimension_numbers = #tpu.dot_dimension_numbers<[1], [0], [0], [1], [0, 0, 1, 1], [], []>} : vector<8x128xbf16>, vector<128x512xbf16>, vector<8x512xf32> -> vector<8x512xf32>
    %58 = arith.addf %55, %57 : vector<8x512xf32>
    %59 = vector.extract_strided_slice %58 {offsets = [0, 0], sizes = [8, 128], strides = [1, 1]} : vector<8x512xf32> to vector<8x128xf32>
    %cst_32 = arith.constant 5.000000e-01 : f32
    %60 = vector.broadcast %cst_32 : f32 to vector<8x128xf32>
    %61 = arith.mulf %60, %59 : vector<8x128xf32>
    %62 = math.tanh %61 : vector<8x128xf32>
    %cst_33 = arith.constant 1.000000e+00 : f32
    %63 = vector.broadcast %cst_33 : f32 to vector<8x128xf32>
    %64 = arith.addf %62, %63 : vector<8x128xf32>
    %cst_34 = arith.constant 5.000000e-01 : f32
    %65 = vector.broadcast %cst_34 : f32 to vector<8x128xf32>
    %66 = arith.mulf %65, %64 : vector<8x128xf32>
    %67 = vector.extract_strided_slice %58 {offsets = [0, 128], sizes = [8, 128], strides = [1, 1]} : vector<8x512xf32> to vector<8x128xf32>
    %cst_35 = arith.constant 5.000000e-01 : f32
    %68 = vector.broadcast %cst_35 : f32 to vector<8x128xf32>
    %69 = arith.mulf %68, %67 : vector<8x128xf32>
    %70 = math.tanh %69 : vector<8x128xf32>
    %cst_36 = arith.constant 1.000000e+00 : f32
    %71 = vector.broadcast %cst_36 : f32 to vector<8x128xf32>
    %72 = arith.addf %70, %71 : vector<8x128xf32>
    %cst_37 = arith.constant 5.000000e-01 : f32
    %73 = vector.broadcast %cst_37 : f32 to vector<8x128xf32>
    %74 = arith.mulf %73, %72 : vector<8x128xf32>
    %75 = vector.extract_strided_slice %58 {offsets = [0, 256], sizes = [8, 128], strides = [1, 1]} : vector<8x512xf32> to vector<8x128xf32>
    %76 = math.tanh %75 : vector<8x128xf32>
    %77 = vector.extract_strided_slice %58 {offsets = [0, 384], sizes = [8, 128], strides = [1, 1]} : vector<8x512xf32> to vector<8x128xf32>
    %cst_38 = arith.constant 5.000000e-01 : f32
    %78 = vector.broadcast %cst_38 : f32 to vector<8x128xf32>
    %79 = arith.mulf %78, %77 : vector<8x128xf32>
    %80 = math.tanh %79 : vector<8x128xf32>
    %cst_39 = arith.constant 1.000000e+00 : f32
    %81 = vector.broadcast %cst_39 : f32 to vector<8x128xf32>
    %82 = arith.addf %80, %81 : vector<8x128xf32>
    %cst_40 = arith.constant 5.000000e-01 : f32
    %83 = vector.broadcast %cst_40 : f32 to vector<8x128xf32>
    %84 = arith.mulf %83, %82 : vector<8x128xf32>
    %85 = arith.mulf %74, %48 : vector<8x128xf32>
    %86 = arith.mulf %66, %76 : vector<8x128xf32>
    %87 = arith.addf %85, %86 : vector<8x128xf32>
    %88 = math.tanh %87 : vector<8x128xf32>
    %89 = arith.mulf %84, %88 : vector<8x128xf32>
    %90 = arith.truncf %89 : vector<8x128xf32> to vector<8x128xbf16>
    %c2_i32 = arith.constant 2 : i32
    %c8_i32_41 = arith.constant 8 : i32
    %91 = arith.muli %c2_i32, %c8_i32_41 : i32
    %92 = tpu.assume_multiple %91, 8 : i32
    %93 = arith.index_cast %92 : i32 to index
    %c0_42 = arith.constant 0 : index
    %94 = vector.load %arg9[%93, %c0_42] : memref<64x512xf32, #tpu.memory_space<vmem>>, vector<8x512xf32>
    %c0_43 = arith.constant 0 : index
    %c0_44 = arith.constant 0 : index
    %95 = vector.load %arg4[%c0_43, %c0_44] : memref<128x512xbf16, #tpu.memory_space<vmem>>, vector<128x512xbf16>
    %cst_45 = arith.constant dense<0.000000e+00> : vector<8x512xf32>
    %96 = tpu.matmul %90, %95, %cst_45 {dimension_numbers = #tpu.dot_dimension_numbers<[1], [0], [0], [1], [0, 0, 1, 1], [], []>} : vector<8x128xbf16>, vector<128x512xbf16>, vector<8x512xf32> -> vector<8x512xf32>
    %97 = arith.addf %94, %96 : vector<8x512xf32>
    %98 = vector.extract_strided_slice %97 {offsets = [0, 0], sizes = [8, 128], strides = [1, 1]} : vector<8x512xf32> to vector<8x128xf32>
    %cst_46 = arith.constant 5.000000e-01 : f32
    %99 = vector.broadcast %cst_46 : f32 to vector<8x128xf32>
    %100 = arith.mulf %99, %98 : vector<8x128xf32>
    %101 = math.tanh %100 : vector<8x128xf32>
    %cst_47 = arith.constant 1.000000e+00 : f32
    %102 = vector.broadcast %cst_47 : f32 to vector<8x128xf32>
    %103 = arith.addf %101, %102 : vector<8x128xf32>
    %cst_48 = arith.constant 5.000000e-01 : f32
    %104 = vector.broadcast %cst_48 : f32 to vector<8x128xf32>
    %105 = arith.mulf %104, %103 : vector<8x128xf32>
    %106 = vector.extract_strided_slice %97 {offsets = [0, 128], sizes = [8, 128], strides = [1, 1]} : vector<8x512xf32> to vector<8x128xf32>
    %cst_49 = arith.constant 5.000000e-01 : f32
    %107 = vector.broadcast %cst_49 : f32 to vector<8x128xf32>
    %108 = arith.mulf %107, %106 : vector<8x128xf32>
    %109 = math.tanh %108 : vector<8x128xf32>
    %cst_50 = arith.constant 1.000000e+00 : f32
    %110 = vector.broadcast %cst_50 : f32 to vector<8x128xf32>
    %111 = arith.addf %109, %110 : vector<8x128xf32>
    %cst_51 = arith.constant 5.000000e-01 : f32
    %112 = vector.broadcast %cst_51 : f32 to vector<8x128xf32>
    %113 = arith.mulf %112, %111 : vector<8x128xf32>
    %114 = vector.extract_strided_slice %97 {offsets = [0, 256], sizes = [8, 128], strides = [1, 1]} : vector<8x512xf32> to vector<8x128xf32>
    %115 = math.tanh %114 : vector<8x128xf32>
    %116 = vector.extract_strided_slice %97 {offsets = [0, 384], sizes = [8, 128], strides = [1, 1]} : vector<8x512xf32> to vector<8x128xf32>
    %cst_52 = arith.constant 5.000000e-01 : f32
    %117 = vector.broadcast %cst_52 : f32 to vector<8x128xf32>
    %118 = arith.mulf %117, %116 : vector<8x128xf32>
    %119 = math.tanh %118 : vector<8x128xf32>
    %cst_53 = arith.constant 1.000000e+00 : f32
    %120 = vector.broadcast %cst_53 : f32 to vector<8x128xf32>
    %121 = arith.addf %119, %120 : vector<8x128xf32>
    %cst_54 = arith.constant 5.000000e-01 : f32
    %122 = vector.broadcast %cst_54 : f32 to vector<8x128xf32>
    %123 = arith.mulf %122, %121 : vector<8x128xf32>
    %124 = arith.mulf %113, %87 : vector<8x128xf32>
    %125 = arith.mulf %105, %115 : vector<8x128xf32>
    %126 = arith.addf %124, %125 : vector<8x128xf32>
    %127 = math.tanh %126 : vector<8x128xf32>
    %128 = arith.mulf %123, %127 : vector<8x128xf32>
    %129 = arith.truncf %128 : vector<8x128xf32> to vector<8x128xbf16>
    %c3_i32 = arith.constant 3 : i32
    %c8_i32_55 = arith.constant 8 : i32
    %130 = arith.muli %c3_i32, %c8_i32_55 : i32
    %131 = tpu.assume_multiple %130, 8 : i32
    %132 = arith.index_cast %131 : i32 to index
    %c0_56 = arith.constant 0 : index
    %133 = vector.load %arg9[%132, %c0_56] : memref<64x512xf32, #tpu.memory_space<vmem>>, vector<8x512xf32>
    %c0_57 = arith.constant 0 : index
    %c0_58 = arith.constant 0 : index
    %134 = vector.load %arg4[%c0_57, %c0_58] : memref<128x512xbf16, #tpu.memory_space<vmem>>, vector<128x512xbf16>
    %cst_59 = arith.constant dense<0.000000e+00> : vector<8x512xf32>
    %135 = tpu.matmul %129, %134, %cst_59 {dimension_numbers = #tpu.dot_dimension_numbers<[1], [0], [0], [1], [0, 0, 1, 1], [], []>} : vector<8x128xbf16>, vector<128x512xbf16>, vector<8x512xf32> -> vector<8x512xf32>
    %136 = arith.addf %133, %135 : vector<8x512xf32>
    %137 = vector.extract_strided_slice %136 {offsets = [0, 0], sizes = [8, 128], strides = [1, 1]} : vector<8x512xf32> to vector<8x128xf32>
    %cst_60 = arith.constant 5.000000e-01 : f32
    %138 = vector.broadcast %cst_60 : f32 to vector<8x128xf32>
    %139 = arith.mulf %138, %137 : vector<8x128xf32>
    %140 = math.tanh %139 : vector<8x128xf32>
    %cst_61 = arith.constant 1.000000e+00 : f32
    %141 = vector.broadcast %cst_61 : f32 to vector<8x128xf32>
    %142 = arith.addf %140, %141 : vector<8x128xf32>
    %cst_62 = arith.constant 5.000000e-01 : f32
    %143 = vector.broadcast %cst_62 : f32 to vector<8x128xf32>
    %144 = arith.mulf %143, %142 : vector<8x128xf32>
    %145 = vector.extract_strided_slice %136 {offsets = [0, 128], sizes = [8, 128], strides = [1, 1]} : vector<8x512xf32> to vector<8x128xf32>
    %cst_63 = arith.constant 5.000000e-01 : f32
    %146 = vector.broadcast %cst_63 : f32 to vector<8x128xf32>
    %147 = arith.mulf %146, %145 : vector<8x128xf32>
    %148 = math.tanh %147 : vector<8x128xf32>
    %cst_64 = arith.constant 1.000000e+00 : f32
    %149 = vector.broadcast %cst_64 : f32 to vector<8x128xf32>
    %150 = arith.addf %148, %149 : vector<8x128xf32>
    %cst_65 = arith.constant 5.000000e-01 : f32
    %151 = vector.broadcast %cst_65 : f32 to vector<8x128xf32>
    %152 = arith.mulf %151, %150 : vector<8x128xf32>
    %153 = vector.extract_strided_slice %136 {offsets = [0, 256], sizes = [8, 128], strides = [1, 1]} : vector<8x512xf32> to vector<8x128xf32>
    %154 = math.tanh %153 : vector<8x128xf32>
    %155 = vector.extract_strided_slice %136 {offsets = [0, 384], sizes = [8, 128], strides = [1, 1]} : vector<8x512xf32> to vector<8x128xf32>
    %cst_66 = arith.constant 5.000000e-01 : f32
    %156 = vector.broadcast %cst_66 : f32 to vector<8x128xf32>
    %157 = arith.mulf %156, %155 : vector<8x128xf32>
    %158 = math.tanh %157 : vector<8x128xf32>
    %cst_67 = arith.constant 1.000000e+00 : f32
    %159 = vector.broadcast %cst_67 : f32 to vector<8x128xf32>
    %160 = arith.addf %158, %159 : vector<8x128xf32>
    %cst_68 = arith.constant 5.000000e-01 : f32
    %161 = vector.broadcast %cst_68 : f32 to vector<8x128xf32>
    %162 = arith.mulf %161, %160 : vector<8x128xf32>
    %163 = arith.mulf %152, %126 : vector<8x128xf32>
    %164 = arith.mulf %144, %154 : vector<8x128xf32>
    %165 = arith.addf %163, %164 : vector<8x128xf32>
    %166 = math.tanh %165 : vector<8x128xf32>
    %167 = arith.mulf %162, %166 : vector<8x128xf32>
    %168 = arith.truncf %167 : vector<8x128xf32> to vector<8x128xbf16>
    %c4_i32 = arith.constant 4 : i32
    %c8_i32_69 = arith.constant 8 : i32
    %169 = arith.muli %c4_i32, %c8_i32_69 : i32
    %170 = tpu.assume_multiple %169, 8 : i32
    %171 = arith.index_cast %170 : i32 to index
    %c0_70 = arith.constant 0 : index
    %172 = vector.load %arg9[%171, %c0_70] : memref<64x512xf32, #tpu.memory_space<vmem>>, vector<8x512xf32>
    %c0_71 = arith.constant 0 : index
    %c0_72 = arith.constant 0 : index
    %173 = vector.load %arg4[%c0_71, %c0_72] : memref<128x512xbf16, #tpu.memory_space<vmem>>, vector<128x512xbf16>
    %cst_73 = arith.constant dense<0.000000e+00> : vector<8x512xf32>
    %174 = tpu.matmul %168, %173, %cst_73 {dimension_numbers = #tpu.dot_dimension_numbers<[1], [0], [0], [1], [0, 0, 1, 1], [], []>} : vector<8x128xbf16>, vector<128x512xbf16>, vector<8x512xf32> -> vector<8x512xf32>
    %175 = arith.addf %172, %174 : vector<8x512xf32>
    %176 = vector.extract_strided_slice %175 {offsets = [0, 0], sizes = [8, 128], strides = [1, 1]} : vector<8x512xf32> to vector<8x128xf32>
    %cst_74 = arith.constant 5.000000e-01 : f32
    %177 = vector.broadcast %cst_74 : f32 to vector<8x128xf32>
    %178 = arith.mulf %177, %176 : vector<8x128xf32>
    %179 = math.tanh %178 : vector<8x128xf32>
    %cst_75 = arith.constant 1.000000e+00 : f32
    %180 = vector.broadcast %cst_75 : f32 to vector<8x128xf32>
    %181 = arith.addf %179, %180 : vector<8x128xf32>
    %cst_76 = arith.constant 5.000000e-01 : f32
    %182 = vector.broadcast %cst_76 : f32 to vector<8x128xf32>
    %183 = arith.mulf %182, %181 : vector<8x128xf32>
    %184 = vector.extract_strided_slice %175 {offsets = [0, 128], sizes = [8, 128], strides = [1, 1]} : vector<8x512xf32> to vector<8x128xf32>
    %cst_77 = arith.constant 5.000000e-01 : f32
    %185 = vector.broadcast %cst_77 : f32 to vector<8x128xf32>
    %186 = arith.mulf %185, %184 : vector<8x128xf32>
    %187 = math.tanh %186 : vector<8x128xf32>
    %cst_78 = arith.constant 1.000000e+00 : f32
    %188 = vector.broadcast %cst_78 : f32 to vector<8x128xf32>
    %189 = arith.addf %187, %188 : vector<8x128xf32>
    %cst_79 = arith.constant 5.000000e-01 : f32
    %190 = vector.broadcast %cst_79 : f32 to vector<8x128xf32>
    %191 = arith.mulf %190, %189 : vector<8x128xf32>
    %192 = vector.extract_strided_slice %175 {offsets = [0, 256], sizes = [8, 128], strides = [1, 1]} : vector<8x512xf32> to vector<8x128xf32>
    %193 = math.tanh %192 : vector<8x128xf32>
    %194 = vector.extract_strided_slice %175 {offsets = [0, 384], sizes = [8, 128], strides = [1, 1]} : vector<8x512xf32> to vector<8x128xf32>
    %cst_80 = arith.constant 5.000000e-01 : f32
    %195 = vector.broadcast %cst_80 : f32 to vector<8x128xf32>
    %196 = arith.mulf %195, %194 : vector<8x128xf32>
    %197 = math.tanh %196 : vector<8x128xf32>
    %cst_81 = arith.constant 1.000000e+00 : f32
    %198 = vector.broadcast %cst_81 : f32 to vector<8x128xf32>
    %199 = arith.addf %197, %198 : vector<8x128xf32>
    %cst_82 = arith.constant 5.000000e-01 : f32
    %200 = vector.broadcast %cst_82 : f32 to vector<8x128xf32>
    %201 = arith.mulf %200, %199 : vector<8x128xf32>
    %202 = arith.mulf %191, %165 : vector<8x128xf32>
    %203 = arith.mulf %183, %193 : vector<8x128xf32>
    %204 = arith.addf %202, %203 : vector<8x128xf32>
    %205 = math.tanh %204 : vector<8x128xf32>
    %206 = arith.mulf %201, %205 : vector<8x128xf32>
    %207 = arith.truncf %206 : vector<8x128xf32> to vector<8x128xbf16>
    %c5_i32 = arith.constant 5 : i32
    %c8_i32_83 = arith.constant 8 : i32
    %208 = arith.muli %c5_i32, %c8_i32_83 : i32
    %209 = tpu.assume_multiple %208, 8 : i32
    %210 = arith.index_cast %209 : i32 to index
    %c0_84 = arith.constant 0 : index
    %211 = vector.load %arg9[%210, %c0_84] : memref<64x512xf32, #tpu.memory_space<vmem>>, vector<8x512xf32>
    %c0_85 = arith.constant 0 : index
    %c0_86 = arith.constant 0 : index
    %212 = vector.load %arg4[%c0_85, %c0_86] : memref<128x512xbf16, #tpu.memory_space<vmem>>, vector<128x512xbf16>
    %cst_87 = arith.constant dense<0.000000e+00> : vector<8x512xf32>
    %213 = tpu.matmul %207, %212, %cst_87 {dimension_numbers = #tpu.dot_dimension_numbers<[1], [0], [0], [1], [0, 0, 1, 1], [], []>} : vector<8x128xbf16>, vector<128x512xbf16>, vector<8x512xf32> -> vector<8x512xf32>
    %214 = arith.addf %211, %213 : vector<8x512xf32>
    %215 = vector.extract_strided_slice %214 {offsets = [0, 0], sizes = [8, 128], strides = [1, 1]} : vector<8x512xf32> to vector<8x128xf32>
    %cst_88 = arith.constant 5.000000e-01 : f32
    %216 = vector.broadcast %cst_88 : f32 to vector<8x128xf32>
    %217 = arith.mulf %216, %215 : vector<8x128xf32>
    %218 = math.tanh %217 : vector<8x128xf32>
    %cst_89 = arith.constant 1.000000e+00 : f32
    %219 = vector.broadcast %cst_89 : f32 to vector<8x128xf32>
    %220 = arith.addf %218, %219 : vector<8x128xf32>
    %cst_90 = arith.constant 5.000000e-01 : f32
    %221 = vector.broadcast %cst_90 : f32 to vector<8x128xf32>
    %222 = arith.mulf %221, %220 : vector<8x128xf32>
    %223 = vector.extract_strided_slice %214 {offsets = [0, 128], sizes = [8, 128], strides = [1, 1]} : vector<8x512xf32> to vector<8x128xf32>
    %cst_91 = arith.constant 5.000000e-01 : f32
    %224 = vector.broadcast %cst_91 : f32 to vector<8x128xf32>
    %225 = arith.mulf %224, %223 : vector<8x128xf32>
    %226 = math.tanh %225 : vector<8x128xf32>
    %cst_92 = arith.constant 1.000000e+00 : f32
    %227 = vector.broadcast %cst_92 : f32 to vector<8x128xf32>
    %228 = arith.addf %226, %227 : vector<8x128xf32>
    %cst_93 = arith.constant 5.000000e-01 : f32
    %229 = vector.broadcast %cst_93 : f32 to vector<8x128xf32>
    %230 = arith.mulf %229, %228 : vector<8x128xf32>
    %231 = vector.extract_strided_slice %214 {offsets = [0, 256], sizes = [8, 128], strides = [1, 1]} : vector<8x512xf32> to vector<8x128xf32>
    %232 = math.tanh %231 : vector<8x128xf32>
    %233 = vector.extract_strided_slice %214 {offsets = [0, 384], sizes = [8, 128], strides = [1, 1]} : vector<8x512xf32> to vector<8x128xf32>
    %cst_94 = arith.constant 5.000000e-01 : f32
    %234 = vector.broadcast %cst_94 : f32 to vector<8x128xf32>
    %235 = arith.mulf %234, %233 : vector<8x128xf32>
    %236 = math.tanh %235 : vector<8x128xf32>
    %cst_95 = arith.constant 1.000000e+00 : f32
    %237 = vector.broadcast %cst_95 : f32 to vector<8x128xf32>
    %238 = arith.addf %236, %237 : vector<8x128xf32>
    %cst_96 = arith.constant 5.000000e-01 : f32
    %239 = vector.broadcast %cst_96 : f32 to vector<8x128xf32>
    %240 = arith.mulf %239, %238 : vector<8x128xf32>
    %241 = arith.mulf %230, %204 : vector<8x128xf32>
    %242 = arith.mulf %222, %232 : vector<8x128xf32>
    %243 = arith.addf %241, %242 : vector<8x128xf32>
    %244 = math.tanh %243 : vector<8x128xf32>
    %245 = arith.mulf %240, %244 : vector<8x128xf32>
    %246 = arith.truncf %245 : vector<8x128xf32> to vector<8x128xbf16>
    %c6_i32 = arith.constant 6 : i32
    %c8_i32_97 = arith.constant 8 : i32
    %247 = arith.muli %c6_i32, %c8_i32_97 : i32
    %248 = tpu.assume_multiple %247, 8 : i32
    %249 = arith.index_cast %248 : i32 to index
    %c0_98 = arith.constant 0 : index
    %250 = vector.load %arg9[%249, %c0_98] : memref<64x512xf32, #tpu.memory_space<vmem>>, vector<8x512xf32>
    %c0_99 = arith.constant 0 : index
    %c0_100 = arith.constant 0 : index
    %251 = vector.load %arg4[%c0_99, %c0_100] : memref<128x512xbf16, #tpu.memory_space<vmem>>, vector<128x512xbf16>
    %cst_101 = arith.constant dense<0.000000e+00> : vector<8x512xf32>
    %252 = tpu.matmul %246, %251, %cst_101 {dimension_numbers = #tpu.dot_dimension_numbers<[1], [0], [0], [1], [0, 0, 1, 1], [], []>} : vector<8x128xbf16>, vector<128x512xbf16>, vector<8x512xf32> -> vector<8x512xf32>
    %253 = arith.addf %250, %252 : vector<8x512xf32>
    %254 = vector.extract_strided_slice %253 {offsets = [0, 0], sizes = [8, 128], strides = [1, 1]} : vector<8x512xf32> to vector<8x128xf32>
    %cst_102 = arith.constant 5.000000e-01 : f32
    %255 = vector.broadcast %cst_102 : f32 to vector<8x128xf32>
    %256 = arith.mulf %255, %254 : vector<8x128xf32>
    %257 = math.tanh %256 : vector<8x128xf32>
    %cst_103 = arith.constant 1.000000e+00 : f32
    %258 = vector.broadcast %cst_103 : f32 to vector<8x128xf32>
    %259 = arith.addf %257, %258 : vector<8x128xf32>
    %cst_104 = arith.constant 5.000000e-01 : f32
    %260 = vector.broadcast %cst_104 : f32 to vector<8x128xf32>
    %261 = arith.mulf %260, %259 : vector<8x128xf32>
    %262 = vector.extract_strided_slice %253 {offsets = [0, 128], sizes = [8, 128], strides = [1, 1]} : vector<8x512xf32> to vector<8x128xf32>
    %cst_105 = arith.constant 5.000000e-01 : f32
    %263 = vector.broadcast %cst_105 : f32 to vector<8x128xf32>
    %264 = arith.mulf %263, %262 : vector<8x128xf32>
    %265 = math.tanh %264 : vector<8x128xf32>
    %cst_106 = arith.constant 1.000000e+00 : f32
    %266 = vector.broadcast %cst_106 : f32 to vector<8x128xf32>
    %267 = arith.addf %265, %266 : vector<8x128xf32>
    %cst_107 = arith.constant 5.000000e-01 : f32
    %268 = vector.broadcast %cst_107 : f32 to vector<8x128xf32>
    %269 = arith.mulf %268, %267 : vector<8x128xf32>
    %270 = vector.extract_strided_slice %253 {offsets = [0, 256], sizes = [8, 128], strides = [1, 1]} : vector<8x512xf32> to vector<8x128xf32>
    %271 = math.tanh %270 : vector<8x128xf32>
    %272 = vector.extract_strided_slice %253 {offsets = [0, 384], sizes = [8, 128], strides = [1, 1]} : vector<8x512xf32> to vector<8x128xf32>
    %cst_108 = arith.constant 5.000000e-01 : f32
    %273 = vector.broadcast %cst_108 : f32 to vector<8x128xf32>
    %274 = arith.mulf %273, %272 : vector<8x128xf32>
    %275 = math.tanh %274 : vector<8x128xf32>
    %cst_109 = arith.constant 1.000000e+00 : f32
    %276 = vector.broadcast %cst_109 : f32 to vector<8x128xf32>
    %277 = arith.addf %275, %276 : vector<8x128xf32>
    %cst_110 = arith.constant 5.000000e-01 : f32
    %278 = vector.broadcast %cst_110 : f32 to vector<8x128xf32>
    %279 = arith.mulf %278, %277 : vector<8x128xf32>
    %280 = arith.mulf %269, %243 : vector<8x128xf32>
    %281 = arith.mulf %261, %271 : vector<8x128xf32>
    %282 = arith.addf %280, %281 : vector<8x128xf32>
    %283 = math.tanh %282 : vector<8x128xf32>
    %284 = arith.mulf %279, %283 : vector<8x128xf32>
    %285 = arith.truncf %284 : vector<8x128xf32> to vector<8x128xbf16>
    %c7_i32 = arith.constant 7 : i32
    %c8_i32_111 = arith.constant 8 : i32
    %286 = arith.muli %c7_i32, %c8_i32_111 : i32
    %287 = tpu.assume_multiple %286, 8 : i32
    %288 = arith.index_cast %287 : i32 to index
    %c0_112 = arith.constant 0 : index
    %289 = vector.load %arg9[%288, %c0_112] : memref<64x512xf32, #tpu.memory_space<vmem>>, vector<8x512xf32>
    %c0_113 = arith.constant 0 : index
    %c0_114 = arith.constant 0 : index
    %290 = vector.load %arg4[%c0_113, %c0_114] : memref<128x512xbf16, #tpu.memory_space<vmem>>, vector<128x512xbf16>
    %cst_115 = arith.constant dense<0.000000e+00> : vector<8x512xf32>
    %291 = tpu.matmul %285, %290, %cst_115 {dimension_numbers = #tpu.dot_dimension_numbers<[1], [0], [0], [1], [0, 0, 1, 1], [], []>} : vector<8x128xbf16>, vector<128x512xbf16>, vector<8x512xf32> -> vector<8x512xf32>
    %292 = arith.addf %289, %291 : vector<8x512xf32>
    %293 = vector.extract_strided_slice %292 {offsets = [0, 0], sizes = [8, 128], strides = [1, 1]} : vector<8x512xf32> to vector<8x128xf32>
    %cst_116 = arith.constant 5.000000e-01 : f32
    %294 = vector.broadcast %cst_116 : f32 to vector<8x128xf32>
    %295 = arith.mulf %294, %293 : vector<8x128xf32>
    %296 = math.tanh %295 : vector<8x128xf32>
    %cst_117 = arith.constant 1.000000e+00 : f32
    %297 = vector.broadcast %cst_117 : f32 to vector<8x128xf32>
    %298 = arith.addf %296, %297 : vector<8x128xf32>
    %cst_118 = arith.constant 5.000000e-01 : f32
    %299 = vector.broadcast %cst_118 : f32 to vector<8x128xf32>
    %300 = arith.mulf %299, %298 : vector<8x128xf32>
    %301 = vector.extract_strided_slice %292 {offsets = [0, 128], sizes = [8, 128], strides = [1, 1]} : vector<8x512xf32> to vector<8x128xf32>
    %cst_119 = arith.constant 5.000000e-01 : f32
    %302 = vector.broadcast %cst_119 : f32 to vector<8x128xf32>
    %303 = arith.mulf %302, %301 : vector<8x128xf32>
    %304 = math.tanh %303 : vector<8x128xf32>
    %cst_120 = arith.constant 1.000000e+00 : f32
    %305 = vector.broadcast %cst_120 : f32 to vector<8x128xf32>
    %306 = arith.addf %304, %305 : vector<8x128xf32>
    %cst_121 = arith.constant 5.000000e-01 : f32
    %307 = vector.broadcast %cst_121 : f32 to vector<8x128xf32>
    %308 = arith.mulf %307, %306 : vector<8x128xf32>
    %309 = vector.extract_strided_slice %292 {offsets = [0, 256], sizes = [8, 128], strides = [1, 1]} : vector<8x512xf32> to vector<8x128xf32>
    %310 = math.tanh %309 : vector<8x128xf32>
    %311 = vector.extract_strided_slice %292 {offsets = [0, 384], sizes = [8, 128], strides = [1, 1]} : vector<8x512xf32> to vector<8x128xf32>
    %cst_122 = arith.constant 5.000000e-01 : f32
    %312 = vector.broadcast %cst_122 : f32 to vector<8x128xf32>
    %313 = arith.mulf %312, %311 : vector<8x128xf32>
    %314 = math.tanh %313 : vector<8x128xf32>
    %cst_123 = arith.constant 1.000000e+00 : f32
    %315 = vector.broadcast %cst_123 : f32 to vector<8x128xf32>
    %316 = arith.addf %314, %315 : vector<8x128xf32>
    %cst_124 = arith.constant 5.000000e-01 : f32
    %317 = vector.broadcast %cst_124 : f32 to vector<8x128xf32>
    %318 = arith.mulf %317, %316 : vector<8x128xf32>
    %319 = arith.mulf %308, %282 : vector<8x128xf32>
    %320 = arith.mulf %300, %310 : vector<8x128xf32>
    %321 = arith.addf %319, %320 : vector<8x128xf32>
    %322 = math.tanh %321 : vector<8x128xf32>
    %323 = arith.mulf %318, %322 : vector<8x128xf32>
    %324 = arith.truncf %323 : vector<8x128xf32> to vector<8x128xbf16>
    %c8_i32_125 = arith.constant 8 : i32
    %c0_126 = arith.constant 0 : index
    %c0_127 = arith.constant 0 : index
    %325 = vector.load %arg10[%c0_126, %c0_127] : memref<8x128xbf16, #tpu.memory_space<vmem>>, vector<8x128xbf16>
    tpu.vector_store %arg10[%c0_126, %c0_127], %324 {strides = array<i32>} : memref<8x128xbf16, #tpu.memory_space<vmem>>, vector<8x128xbf16>,
    %c0_128 = arith.constant 0 : index
    %c0_129 = arith.constant 0 : index
    %326 = vector.load %arg11[%c0_128, %c0_129] : memref<8x128xf32, #tpu.memory_space<vmem>>, vector<8x128xf32>
    tpu.vector_store %arg11[%c0_128, %c0_129], %321 {strides = array<i32>} : memref<8x128xf32, #tpu.memory_space<vmem>>, vector<8x128xf32>,
    %c0_i32_130 = arith.constant 0 : i32
    %327 = arith.cmpi eq, %arg1, %c0_i32_130 : i32
    %328 = arith.extui %327 : i1 to i32
    %c0_i32_131 = arith.constant 0 : i32
    %329 = arith.cmpi ne, %328, %c0_i32_131 : i32
    scf.if %329 {
      %c0_132 = arith.constant 0 : index
      %c0_133 = arith.constant 0 : index
      %330 = vector.load %arg10[%c0_132, %c0_133] : memref<8x128xbf16, #tpu.memory_space<vmem>>, vector<8x128xbf16>
      %c0_134 = arith.constant 0 : index
      %c0_135 = arith.constant 0 : index
      %331 = vector.load %arg6[%c0_134, %c0_135] : memref<128x128xbf16, #tpu.memory_space<vmem>>, vector<128x128xbf16>
      %cst_136 = arith.constant dense<0.000000e+00> : vector<8x128xf32>
      %332 = tpu.matmul %330, %331, %cst_136 {dimension_numbers = #tpu.dot_dimension_numbers<[1], [0], [0], [1], [0, 0, 1, 1], [], []>} : vector<8x128xbf16>, vector<128x128xbf16>, vector<8x128xf32> -> vector<8x128xf32>
      %c0_137 = arith.constant 0 : index
      %c0_138 = arith.constant 0 : index
      %333 = vector.load %arg7[%c0_137, %c0_138] : memref<1x128xf32, #tpu.memory_space<vmem>>, vector<1x128xf32>
      %334 = vector.broadcast %333 : vector<1x128xf32> to vector<8x128xf32>
      %335 = arith.addf %332, %334 : vector<8x128xf32>
      %c0_139 = arith.constant 0 : index
      %c0_140 = arith.constant 0 : index
      %336 = vector.load %arg8[%c0_139, %c0_140] : memref<8x128xf32, #tpu.memory_space<vmem>>, vector<8x128xf32>
      tpu.vector_store %arg8[%c0_139, %c0_140], %335 {strides = array<i32>} : memref<8x128xf32, #tpu.memory_space<vmem>>, vector<8x128xf32>,
    } else {
    }
    return
  }
  func.func @transform_0(%arg0: i32, %arg1: i32) -> (i32, i32, i32) {
    %c0_i32 = arith.constant 0 : i32
    %c0_i32_0 = arith.constant 0 : i32
    return %arg0, %arg1, %c0_i32 : i32, i32, i32
  }
  func.func @transform_1(%arg0: i32, %arg1: i32) -> (i32, i32) {
    %c0_i32 = arith.constant 0 : i32
    %c0_i32_0 = arith.constant 0 : i32
    %c0_i32_1 = arith.constant 0 : i32
    return %c0_i32, %c0_i32_0 : i32, i32
  }
  func.func @transform_2(%arg0: i32, %arg1: i32) -> (i32, i32) {
    %c0_i32 = arith.constant 0 : i32
    %c0_i32_0 = arith.constant 0 : i32
    %c0_i32_1 = arith.constant 0 : i32
    return %c0_i32, %c0_i32_0 : i32, i32
  }
  func.func @transform_3(%arg0: i32, %arg1: i32) -> (i32, i32) {
    %c0_i32 = arith.constant 0 : i32
    %c0_i32_0 = arith.constant 0 : i32
    %c0_i32_1 = arith.constant 0 : i32
    return %c0_i32, %c0_i32_0 : i32, i32
  }
  func.func @transform_4(%arg0: i32, %arg1: i32) -> (i32, i32) {
    %c0_i32 = arith.constant 0 : i32
    %c0_i32_0 = arith.constant 0 : i32
    %c0_i32_1 = arith.constant 0 : i32
    return %c0_i32, %c0_i32_0 : i32, i32
  }
  func.func @transform_5(%arg0: i32, %arg1: i32) -> (i32, i32) {
    %c0_i32 = arith.constant 0 : i32
    %c0_i32_0 = arith.constant 0 : i32
    %c0_i32_1 = arith.constant 0 : i32
    return %c0_i32, %c0_i32_0 : i32, i32
  }
  func.func @transform_6(%arg0: i32, %arg1: i32) -> (i32, i32) {
    %c0_i32 = arith.constant 0 : i32
    %c0_i32_0 = arith.constant 0 : i32
    return %arg0, %c0_i32 : i32, i32
  }
}

module attributes {stable_mosaic.version = 11 : i64} {
  func.func @_lstm_classifier_kernel(%arg0: i32, %arg1: i32, %arg2: memref<1x64x128xbf16, #tpu.memory_space<vmem>>, %arg3: memref<128x512xbf16, #tpu.memory_space<vmem>>, %arg4: memref<128x512xbf16, #tpu.memory_space<vmem>>, %arg5: memref<1x512xf32, #tpu.memory_space<vmem>>, %arg6: memref<128x128xbf16, #tpu.memory_space<vmem>>, %arg7: memref<1x128xf32, #tpu.memory_space<vmem>>, %arg8: memref<8x128xf32, #tpu.memory_space<vmem>>, %arg9: memref<64x512xf32, #tpu.memory_space<vmem>>, %arg10: memref<8x128xbf16, #tpu.memory_space<vmem>>, %arg11: memref<8x128xf32, #tpu.memory_space<vmem>>) attributes {dimension_semantics = [#tpu.dimension_semantics<parallel>, #tpu.dimension_semantics<arbitrary>], iteration_bounds = array<i64: 2, 1>, scalar_prefetch = 0 : i64, scratch_operands = 3 : i64, tpu.core_type = #tpu.core_type<tc>, window_params = [{transform_indices = @transform_0, window_bounds = array<i64: 1, 64, 128>}, {pipeline_mode = #tpu.pipeline_mode<synchronous>, transform_indices = @transform_1, window_bounds = array<i64: 128, 512>}, {pipeline_mode = #tpu.pipeline_mode<synchronous>, transform_indices = @transform_2, window_bounds = array<i64: 128, 512>}, {pipeline_mode = #tpu.pipeline_mode<synchronous>, transform_indices = @transform_3, window_bounds = array<i64: 1, 512>}, {pipeline_mode = #tpu.pipeline_mode<synchronous>, transform_indices = @transform_4, window_bounds = array<i64: 128, 128>}, {pipeline_mode = #tpu.pipeline_mode<synchronous>, transform_indices = @transform_5, window_bounds = array<i64: 1, 128>}, {transform_indices = @transform_6, window_bounds = array<i64: 8, 128>}]} {
    %c0 = arith.constant 0 : index
    %c0_0 = arith.constant 0 : index
    %c0_1 = arith.constant 0 : index
    %0 = vector.load %arg2[%c0, %c0_0, %c0_1] : memref<1x64x128xbf16, #tpu.memory_space<vmem>>, vector<1x64x128xbf16>
    %1 = vector.shape_cast %0 : vector<1x64x128xbf16> to vector<64x128xbf16>
    %c0_2 = arith.constant 0 : index
    %c0_3 = arith.constant 0 : index
    %2 = vector.load %arg3[%c0_2, %c0_3] : memref<128x512xbf16, #tpu.memory_space<vmem>>, vector<128x512xbf16>
    %cst = arith.constant dense<0.000000e+00> : vector<64x512xf32>
    %3 = tpu.matmul %1, %2, %cst {dimension_numbers = #tpu.dot_dimension_numbers<[1], [0], [0], [1], [0, 0, 1, 1], [], []>} : vector<64x128xbf16>, vector<128x512xbf16>, vector<64x512xf32> -> vector<64x512xf32>
    %c0_4 = arith.constant 0 : index
    %c0_5 = arith.constant 0 : index
    %4 = vector.load %arg5[%c0_4, %c0_5] : memref<1x512xf32, #tpu.memory_space<vmem>>, vector<1x512xf32>
    %5 = vector.broadcast %4 : vector<1x512xf32> to vector<64x512xf32>
    %6 = arith.addf %3, %5 : vector<64x512xf32>
    %c0_6 = arith.constant 0 : index
    %c0_7 = arith.constant 0 : index
    %7 = vector.load %arg9[%c0_6, %c0_7] : memref<64x512xf32, #tpu.memory_space<vmem>>, vector<64x512xf32>
    tpu.vector_store %arg9[%c0_6, %c0_7], %6 {strides = array<i32>} : memref<64x512xf32, #tpu.memory_space<vmem>>, vector<64x512xf32>,
    %c0_i32 = arith.constant 0 : i32
    %8 = arith.cmpi eq, %arg1, %c0_i32 : i32
    %9 = arith.extui %8 : i1 to i32
    %c0_i32_8 = arith.constant 0 : i32
    %10 = arith.cmpi ne, %9, %c0_i32_8 : i32
    scf.if %10 {
      %cst_132 = arith.constant 0.000000e+00 : bf16
      %330 = vector.broadcast %cst_132 : bf16 to vector<8x128xbf16>
      %c0_133 = arith.constant 0 : index
      %c0_134 = arith.constant 0 : index
      %331 = vector.load %arg10[%c0_133, %c0_134] : memref<8x128xbf16, #tpu.memory_space<vmem>>, vector<8x128xbf16>
      tpu.vector_store %arg10[%c0_133, %c0_134], %330 {strides = array<i32>} : memref<8x128xbf16, #tpu.memory_space<vmem>>, vector<8x128xbf16>,
      %cst_135 = arith.constant 0.000000e+00 : f32
      %332 = vector.broadcast %cst_135 : f32 to vector<8x128xf32>
      %c0_136 = arith.constant 0 : index
      %c0_137 = arith.constant 0 : index
      %333 = vector.load %arg11[%c0_136, %c0_137] : memref<8x128xf32, #tpu.memory_space<vmem>>, vector<8x128xf32>
      tpu.vector_store %arg11[%c0_136, %c0_137], %332 {strides = array<i32>} : memref<8x128xf32, #tpu.memory_space<vmem>>, vector<8x128xf32>,
    } else {
    }
    %c0_9 = arith.constant 0 : index
    %c0_10 = arith.constant 0 : index
    %11 = vector.load %arg10[%c0_9, %c0_10] : memref<8x128xbf16, #tpu.memory_space<vmem>>, vector<8x128xbf16>
    %c0_11 = arith.constant 0 : index
    %c0_12 = arith.constant 0 : index
    %12 = vector.load %arg11[%c0_11, %c0_12] : memref<8x128xf32, #tpu.memory_space<vmem>>, vector<8x128xf32>
    %c0_i32_13 = arith.constant 0 : i32
    %c8_i32 = arith.constant 8 : i32
    %13 = arith.muli %c0_i32_13, %c8_i32 : i32
    %14 = tpu.assume_multiple %13, 8 : i32
    %15 = arith.index_cast %14 : i32 to index
    %c0_14 = arith.constant 0 : index
    %16 = vector.load %arg9[%15, %c0_14] : memref<64x512xf32, #tpu.memory_space<vmem>>, vector<8x512xf32>
    %c0_15 = arith.constant 0 : index
    %c0_16 = arith.constant 0 : index
    %17 = vector.load %arg4[%c0_15, %c0_16] : memref<128x512xbf16, #tpu.memory_space<vmem>>, vector<128x512xbf16>
    %cst_17 = arith.constant dense<0.000000e+00> : vector<8x512xf32>
    %18 = tpu.matmul %11, %17, %cst_17 {dimension_numbers = #tpu.dot_dimension_numbers<[1], [0], [0], [1], [0, 0, 1, 1], [], []>} : vector<8x128xbf16>, vector<128x512xbf16>, vector<8x512xf32> -> vector<8x512xf32>
    %19 = arith.addf %16, %18 : vector<8x512xf32>
    %20 = vector.extract_strided_slice %19 {offsets = [0, 0], sizes = [8, 128], strides = [1, 1]} : vector<8x512xf32> to vector<8x128xf32>
    %cst_18 = arith.constant 5.000000e-01 : f32
    %21 = vector.broadcast %cst_18 : f32 to vector<8x128xf32>
    %22 = arith.mulf %21, %20 : vector<8x128xf32>
    %23 = math.tanh %22 : vector<8x128xf32>
    %cst_19 = arith.constant 1.000000e+00 : f32
    %24 = vector.broadcast %cst_19 : f32 to vector<8x128xf32>
    %25 = arith.addf %23, %24 : vector<8x128xf32>
    %cst_20 = arith.constant 5.000000e-01 : f32
    %26 = vector.broadcast %cst_20 : f32 to vector<8x128xf32>
    %27 = arith.mulf %26, %25 : vector<8x128xf32>
    %28 = vector.extract_strided_slice %19 {offsets = [0, 128], sizes = [8, 128], strides = [1, 1]} : vector<8x512xf32> to vector<8x128xf32>
    %cst_21 = arith.constant 5.000000e-01 : f32
    %29 = vector.broadcast %cst_21 : f32 to vector<8x128xf32>
    %30 = arith.mulf %29, %28 : vector<8x128xf32>
    %31 = math.tanh %30 : vector<8x128xf32>
    %cst_22 = arith.constant 1.000000e+00 : f32
    %32 = vector.broadcast %cst_22 : f32 to vector<8x128xf32>
    %33 = arith.addf %31, %32 : vector<8x128xf32>
    %cst_23 = arith.constant 5.000000e-01 : f32
    %34 = vector.broadcast %cst_23 : f32 to vector<8x128xf32>
    %35 = arith.mulf %34, %33 : vector<8x128xf32>
    %36 = vector.extract_strided_slice %19 {offsets = [0, 256], sizes = [8, 128], strides = [1, 1]} : vector<8x512xf32> to vector<8x128xf32>
    %37 = math.tanh %36 : vector<8x128xf32>
    %38 = vector.extract_strided_slice %19 {offsets = [0, 384], sizes = [8, 128], strides = [1, 1]} : vector<8x512xf32> to vector<8x128xf32>
    %cst_24 = arith.constant 5.000000e-01 : f32
    %39 = vector.broadcast %cst_24 : f32 to vector<8x128xf32>
    %40 = arith.mulf %39, %38 : vector<8x128xf32>
    %41 = math.tanh %40 : vector<8x128xf32>
    %cst_25 = arith.constant 1.000000e+00 : f32
    %42 = vector.broadcast %cst_25 : f32 to vector<8x128xf32>
    %43 = arith.addf %41, %42 : vector<8x128xf32>
    %cst_26 = arith.constant 5.000000e-01 : f32
    %44 = vector.broadcast %cst_26 : f32 to vector<8x128xf32>
    %45 = arith.mulf %44, %43 : vector<8x128xf32>
    %46 = arith.mulf %35, %12 : vector<8x128xf32>
    %47 = arith.mulf %27, %37 : vector<8x128xf32>
    %48 = arith.addf %46, %47 : vector<8x128xf32>
    %49 = math.tanh %48 : vector<8x128xf32>
    %50 = arith.mulf %45, %49 : vector<8x128xf32>
    %51 = arith.truncf %50 : vector<8x128xf32> to vector<8x128xbf16>
    %c1_i32 = arith.constant 1 : i32
    %c8_i32_27 = arith.constant 8 : i32
    %52 = arith.muli %c1_i32, %c8_i32_27 : i32
    %53 = tpu.assume_multiple %52, 8 : i32
    %54 = arith.index_cast %53 : i32 to index
    %c0_28 = arith.constant 0 : index
    %55 = vector.load %arg9[%54, %c0_28] : memref<64x512xf32, #tpu.memory_space<vmem>>, vector<8x512xf32>
    %c0_29 = arith.constant 0 : index
    %c0_30 = arith.constant 0 : index
    %56 = vector.load %arg4[%c0_29, %c0_30] : memref<128x512xbf16, #tpu.memory_space<vmem>>, vector<128x512xbf16>
    %cst_31 = arith.constant dense<0.000000e+00> : vector<8x512xf32>
    %57 = tpu.matmul %51, %56, %cst_31 {dimension_numbers = #tpu.dot_dimension_numbers<[1], [0], [0], [1], [0, 0, 1, 1], [], []>} : vector<8x128xbf16>, vector<128x512xbf16>, vector<8x512xf32> -> vector<8x512xf32>
    %58 = arith.addf %55, %57 : vector<8x512xf32>
    %59 = vector.extract_strided_slice %58 {offsets = [0, 0], sizes = [8, 128], strides = [1, 1]} : vector<8x512xf32> to vector<8x128xf32>
    %cst_32 = arith.constant 5.000000e-01 : f32
    %60 = vector.broadcast %cst_32 : f32 to vector<8x128xf32>
    %61 = arith.mulf %60, %59 : vector<8x128xf32>
    %62 = math.tanh %61 : vector<8x128xf32>
    %cst_33 = arith.constant 1.000000e+00 : f32
    %63 = vector.broadcast %cst_33 : f32 to vector<8x128xf32>
    %64 = arith.addf %62, %63 : vector<8x128xf32>
    %cst_34 = arith.constant 5.000000e-01 : f32
    %65 = vector.broadcast %cst_34 : f32 to vector<8x128xf32>
    %66 = arith.mulf %65, %64 : vector<8x128xf32>
    %67 = vector.extract_strided_slice %58 {offsets = [0, 128], sizes = [8, 128], strides = [1, 1]} : vector<8x512xf32> to vector<8x128xf32>
    %cst_35 = arith.constant 5.000000e-01 : f32
    %68 = vector.broadcast %cst_35 : f32 to vector<8x128xf32>
    %69 = arith.mulf %68, %67 : vector<8x128xf32>
    %70 = math.tanh %69 : vector<8x128xf32>
    %cst_36 = arith.constant 1.000000e+00 : f32
    %71 = vector.broadcast %cst_36 : f32 to vector<8x128xf32>
    %72 = arith.addf %70, %71 : vector<8x128xf32>
    %cst_37 = arith.constant 5.000000e-01 : f32
    %73 = vector.broadcast %cst_37 : f32 to vector<8x128xf32>
    %74 = arith.mulf %73, %72 : vector<8x128xf32>
    %75 = vector.extract_strided_slice %58 {offsets = [0, 256], sizes = [8, 128], strides = [1, 1]} : vector<8x512xf32> to vector<8x128xf32>
    %76 = math.tanh %75 : vector<8x128xf32>
    %77 = vector.extract_strided_slice %58 {offsets = [0, 384], sizes = [8, 128], strides = [1, 1]} : vector<8x512xf32> to vector<8x128xf32>
    %cst_38 = arith.constant 5.000000e-01 : f32
    %78 = vector.broadcast %cst_38 : f32 to vector<8x128xf32>
    %79 = arith.mulf %78, %77 : vector<8x128xf32>
    %80 = math.tanh %79 : vector<8x128xf32>
    %cst_39 = arith.constant 1.000000e+00 : f32
    %81 = vector.broadcast %cst_39 : f32 to vector<8x128xf32>
    %82 = arith.addf %80, %81 : vector<8x128xf32>
    %cst_40 = arith.constant 5.000000e-01 : f32
    %83 = vector.broadcast %cst_40 : f32 to vector<8x128xf32>
    %84 = arith.mulf %83, %82 : vector<8x128xf32>
    %85 = arith.mulf %74, %48 : vector<8x128xf32>
    %86 = arith.mulf %66, %76 : vector<8x128xf32>
    %87 = arith.addf %85, %86 : vector<8x128xf32>
    %88 = math.tanh %87 : vector<8x128xf32>
    %89 = arith.mulf %84, %88 : vector<8x128xf32>
    %90 = arith.truncf %89 : vector<8x128xf32> to vector<8x128xbf16>
    %c2_i32 = arith.constant 2 : i32
    %c8_i32_41 = arith.constant 8 : i32
    %91 = arith.muli %c2_i32, %c8_i32_41 : i32
    %92 = tpu.assume_multiple %91, 8 : i32
    %93 = arith.index_cast %92 : i32 to index
    %c0_42 = arith.constant 0 : index
    %94 = vector.load %arg9[%93, %c0_42] : memref<64x512xf32, #tpu.memory_space<vmem>>, vector<8x512xf32>
    %c0_43 = arith.constant 0 : index
    %c0_44 = arith.constant 0 : index
    %95 = vector.load %arg4[%c0_43, %c0_44] : memref<128x512xbf16, #tpu.memory_space<vmem>>, vector<128x512xbf16>
    %cst_45 = arith.constant dense<0.000000e+00> : vector<8x512xf32>
    %96 = tpu.matmul %90, %95, %cst_45 {dimension_numbers = #tpu.dot_dimension_numbers<[1], [0], [0], [1], [0, 0, 1, 1], [], []>} : vector<8x128xbf16>, vector<128x512xbf16>, vector<8x512xf32> -> vector<8x512xf32>
    %97 = arith.addf %94, %96 : vector<8x512xf32>
    %98 = vector.extract_strided_slice %97 {offsets = [0, 0], sizes = [8, 128], strides = [1, 1]} : vector<8x512xf32> to vector<8x128xf32>
    %cst_46 = arith.constant 5.000000e-01 : f32
    %99 = vector.broadcast %cst_46 : f32 to vector<8x128xf32>
    %100 = arith.mulf %99, %98 : vector<8x128xf32>
    %101 = math.tanh %100 : vector<8x128xf32>
    %cst_47 = arith.constant 1.000000e+00 : f32
    %102 = vector.broadcast %cst_47 : f32 to vector<8x128xf32>
    %103 = arith.addf %101, %102 : vector<8x128xf32>
    %cst_48 = arith.constant 5.000000e-01 : f32
    %104 = vector.broadcast %cst_48 : f32 to vector<8x128xf32>
    %105 = arith.mulf %104, %103 : vector<8x128xf32>
    %106 = vector.extract_strided_slice %97 {offsets = [0, 128], sizes = [8, 128], strides = [1, 1]} : vector<8x512xf32> to vector<8x128xf32>
    %cst_49 = arith.constant 5.000000e-01 : f32
    %107 = vector.broadcast %cst_49 : f32 to vector<8x128xf32>
    %108 = arith.mulf %107, %106 : vector<8x128xf32>
    %109 = math.tanh %108 : vector<8x128xf32>
    %cst_50 = arith.constant 1.000000e+00 : f32
    %110 = vector.broadcast %cst_50 : f32 to vector<8x128xf32>
    %111 = arith.addf %109, %110 : vector<8x128xf32>
    %cst_51 = arith.constant 5.000000e-01 : f32
    %112 = vector.broadcast %cst_51 : f32 to vector<8x128xf32>
    %113 = arith.mulf %112, %111 : vector<8x128xf32>
    %114 = vector.extract_strided_slice %97 {offsets = [0, 256], sizes = [8, 128], strides = [1, 1]} : vector<8x512xf32> to vector<8x128xf32>
    %115 = math.tanh %114 : vector<8x128xf32>
    %116 = vector.extract_strided_slice %97 {offsets = [0, 384], sizes = [8, 128], strides = [1, 1]} : vector<8x512xf32> to vector<8x128xf32>
    %cst_52 = arith.constant 5.000000e-01 : f32
    %117 = vector.broadcast %cst_52 : f32 to vector<8x128xf32>
    %118 = arith.mulf %117, %116 : vector<8x128xf32>
    %119 = math.tanh %118 : vector<8x128xf32>
    %cst_53 = arith.constant 1.000000e+00 : f32
    %120 = vector.broadcast %cst_53 : f32 to vector<8x128xf32>
    %121 = arith.addf %119, %120 : vector<8x128xf32>
    %cst_54 = arith.constant 5.000000e-01 : f32
    %122 = vector.broadcast %cst_54 : f32 to vector<8x128xf32>
    %123 = arith.mulf %122, %121 : vector<8x128xf32>
    %124 = arith.mulf %113, %87 : vector<8x128xf32>
    %125 = arith.mulf %105, %115 : vector<8x128xf32>
    %126 = arith.addf %124, %125 : vector<8x128xf32>
    %127 = math.tanh %126 : vector<8x128xf32>
    %128 = arith.mulf %123, %127 : vector<8x128xf32>
    %129 = arith.truncf %128 : vector<8x128xf32> to vector<8x128xbf16>
    %c3_i32 = arith.constant 3 : i32
    %c8_i32_55 = arith.constant 8 : i32
    %130 = arith.muli %c3_i32, %c8_i32_55 : i32
    %131 = tpu.assume_multiple %130, 8 : i32
    %132 = arith.index_cast %131 : i32 to index
    %c0_56 = arith.constant 0 : index
    %133 = vector.load %arg9[%132, %c0_56] : memref<64x512xf32, #tpu.memory_space<vmem>>, vector<8x512xf32>
    %c0_57 = arith.constant 0 : index
    %c0_58 = arith.constant 0 : index
    %134 = vector.load %arg4[%c0_57, %c0_58] : memref<128x512xbf16, #tpu.memory_space<vmem>>, vector<128x512xbf16>
    %cst_59 = arith.constant dense<0.000000e+00> : vector<8x512xf32>
    %135 = tpu.matmul %129, %134, %cst_59 {dimension_numbers = #tpu.dot_dimension_numbers<[1], [0], [0], [1], [0, 0, 1, 1], [], []>} : vector<8x128xbf16>, vector<128x512xbf16>, vector<8x512xf32> -> vector<8x512xf32>
    %136 = arith.addf %133, %135 : vector<8x512xf32>
    %137 = vector.extract_strided_slice %136 {offsets = [0, 0], sizes = [8, 128], strides = [1, 1]} : vector<8x512xf32> to vector<8x128xf32>
    %cst_60 = arith.constant 5.000000e-01 : f32
    %138 = vector.broadcast %cst_60 : f32 to vector<8x128xf32>
    %139 = arith.mulf %138, %137 : vector<8x128xf32>
    %140 = math.tanh %139 : vector<8x128xf32>
    %cst_61 = arith.constant 1.000000e+00 : f32
    %141 = vector.broadcast %cst_61 : f32 to vector<8x128xf32>
    %142 = arith.addf %140, %141 : vector<8x128xf32>
    %cst_62 = arith.constant 5.000000e-01 : f32
    %143 = vector.broadcast %cst_62 : f32 to vector<8x128xf32>
    %144 = arith.mulf %143, %142 : vector<8x128xf32>
    %145 = vector.extract_strided_slice %136 {offsets = [0, 128], sizes = [8, 128], strides = [1, 1]} : vector<8x512xf32> to vector<8x128xf32>
    %cst_63 = arith.constant 5.000000e-01 : f32
    %146 = vector.broadcast %cst_63 : f32 to vector<8x128xf32>
    %147 = arith.mulf %146, %145 : vector<8x128xf32>
    %148 = math.tanh %147 : vector<8x128xf32>
    %cst_64 = arith.constant 1.000000e+00 : f32
    %149 = vector.broadcast %cst_64 : f32 to vector<8x128xf32>
    %150 = arith.addf %148, %149 : vector<8x128xf32>
    %cst_65 = arith.constant 5.000000e-01 : f32
    %151 = vector.broadcast %cst_65 : f32 to vector<8x128xf32>
    %152 = arith.mulf %151, %150 : vector<8x128xf32>
    %153 = vector.extract_strided_slice %136 {offsets = [0, 256], sizes = [8, 128], strides = [1, 1]} : vector<8x512xf32> to vector<8x128xf32>
    %154 = math.tanh %153 : vector<8x128xf32>
    %155 = vector.extract_strided_slice %136 {offsets = [0, 384], sizes = [8, 128], strides = [1, 1]} : vector<8x512xf32> to vector<8x128xf32>
    %cst_66 = arith.constant 5.000000e-01 : f32
    %156 = vector.broadcast %cst_66 : f32 to vector<8x128xf32>
    %157 = arith.mulf %156, %155 : vector<8x128xf32>
    %158 = math.tanh %157 : vector<8x128xf32>
    %cst_67 = arith.constant 1.000000e+00 : f32
    %159 = vector.broadcast %cst_67 : f32 to vector<8x128xf32>
    %160 = arith.addf %158, %159 : vector<8x128xf32>
    %cst_68 = arith.constant 5.000000e-01 : f32
    %161 = vector.broadcast %cst_68 : f32 to vector<8x128xf32>
    %162 = arith.mulf %161, %160 : vector<8x128xf32>
    %163 = arith.mulf %152, %126 : vector<8x128xf32>
    %164 = arith.mulf %144, %154 : vector<8x128xf32>
    %165 = arith.addf %163, %164 : vector<8x128xf32>
    %166 = math.tanh %165 : vector<8x128xf32>
    %167 = arith.mulf %162, %166 : vector<8x128xf32>
    %168 = arith.truncf %167 : vector<8x128xf32> to vector<8x128xbf16>
    %c4_i32 = arith.constant 4 : i32
    %c8_i32_69 = arith.constant 8 : i32
    %169 = arith.muli %c4_i32, %c8_i32_69 : i32
    %170 = tpu.assume_multiple %169, 8 : i32
    %171 = arith.index_cast %170 : i32 to index
    %c0_70 = arith.constant 0 : index
    %172 = vector.load %arg9[%171, %c0_70] : memref<64x512xf32, #tpu.memory_space<vmem>>, vector<8x512xf32>
    %c0_71 = arith.constant 0 : index
    %c0_72 = arith.constant 0 : index
    %173 = vector.load %arg4[%c0_71, %c0_72] : memref<128x512xbf16, #tpu.memory_space<vmem>>, vector<128x512xbf16>
    %cst_73 = arith.constant dense<0.000000e+00> : vector<8x512xf32>
    %174 = tpu.matmul %168, %173, %cst_73 {dimension_numbers = #tpu.dot_dimension_numbers<[1], [0], [0], [1], [0, 0, 1, 1], [], []>} : vector<8x128xbf16>, vector<128x512xbf16>, vector<8x512xf32> -> vector<8x512xf32>
    %175 = arith.addf %172, %174 : vector<8x512xf32>
    %176 = vector.extract_strided_slice %175 {offsets = [0, 0], sizes = [8, 128], strides = [1, 1]} : vector<8x512xf32> to vector<8x128xf32>
    %cst_74 = arith.constant 5.000000e-01 : f32
    %177 = vector.broadcast %cst_74 : f32 to vector<8x128xf32>
    %178 = arith.mulf %177, %176 : vector<8x128xf32>
    %179 = math.tanh %178 : vector<8x128xf32>
    %cst_75 = arith.constant 1.000000e+00 : f32
    %180 = vector.broadcast %cst_75 : f32 to vector<8x128xf32>
    %181 = arith.addf %179, %180 : vector<8x128xf32>
    %cst_76 = arith.constant 5.000000e-01 : f32
    %182 = vector.broadcast %cst_76 : f32 to vector<8x128xf32>
    %183 = arith.mulf %182, %181 : vector<8x128xf32>
    %184 = vector.extract_strided_slice %175 {offsets = [0, 128], sizes = [8, 128], strides = [1, 1]} : vector<8x512xf32> to vector<8x128xf32>
    %cst_77 = arith.constant 5.000000e-01 : f32
    %185 = vector.broadcast %cst_77 : f32 to vector<8x128xf32>
    %186 = arith.mulf %185, %184 : vector<8x128xf32>
    %187 = math.tanh %186 : vector<8x128xf32>
    %cst_78 = arith.constant 1.000000e+00 : f32
    %188 = vector.broadcast %cst_78 : f32 to vector<8x128xf32>
    %189 = arith.addf %187, %188 : vector<8x128xf32>
    %cst_79 = arith.constant 5.000000e-01 : f32
    %190 = vector.broadcast %cst_79 : f32 to vector<8x128xf32>
    %191 = arith.mulf %190, %189 : vector<8x128xf32>
    %192 = vector.extract_strided_slice %175 {offsets = [0, 256], sizes = [8, 128], strides = [1, 1]} : vector<8x512xf32> to vector<8x128xf32>
    %193 = math.tanh %192 : vector<8x128xf32>
    %194 = vector.extract_strided_slice %175 {offsets = [0, 384], sizes = [8, 128], strides = [1, 1]} : vector<8x512xf32> to vector<8x128xf32>
    %cst_80 = arith.constant 5.000000e-01 : f32
    %195 = vector.broadcast %cst_80 : f32 to vector<8x128xf32>
    %196 = arith.mulf %195, %194 : vector<8x128xf32>
    %197 = math.tanh %196 : vector<8x128xf32>
    %cst_81 = arith.constant 1.000000e+00 : f32
    %198 = vector.broadcast %cst_81 : f32 to vector<8x128xf32>
    %199 = arith.addf %197, %198 : vector<8x128xf32>
    %cst_82 = arith.constant 5.000000e-01 : f32
    %200 = vector.broadcast %cst_82 : f32 to vector<8x128xf32>
    %201 = arith.mulf %200, %199 : vector<8x128xf32>
    %202 = arith.mulf %191, %165 : vector<8x128xf32>
    %203 = arith.mulf %183, %193 : vector<8x128xf32>
    %204 = arith.addf %202, %203 : vector<8x128xf32>
    %205 = math.tanh %204 : vector<8x128xf32>
    %206 = arith.mulf %201, %205 : vector<8x128xf32>
    %207 = arith.truncf %206 : vector<8x128xf32> to vector<8x128xbf16>
    %c5_i32 = arith.constant 5 : i32
    %c8_i32_83 = arith.constant 8 : i32
    %208 = arith.muli %c5_i32, %c8_i32_83 : i32
    %209 = tpu.assume_multiple %208, 8 : i32
    %210 = arith.index_cast %209 : i32 to index
    %c0_84 = arith.constant 0 : index
    %211 = vector.load %arg9[%210, %c0_84] : memref<64x512xf32, #tpu.memory_space<vmem>>, vector<8x512xf32>
    %c0_85 = arith.constant 0 : index
    %c0_86 = arith.constant 0 : index
    %212 = vector.load %arg4[%c0_85, %c0_86] : memref<128x512xbf16, #tpu.memory_space<vmem>>, vector<128x512xbf16>
    %cst_87 = arith.constant dense<0.000000e+00> : vector<8x512xf32>
    %213 = tpu.matmul %207, %212, %cst_87 {dimension_numbers = #tpu.dot_dimension_numbers<[1], [0], [0], [1], [0, 0, 1, 1], [], []>} : vector<8x128xbf16>, vector<128x512xbf16>, vector<8x512xf32> -> vector<8x512xf32>
    %214 = arith.addf %211, %213 : vector<8x512xf32>
    %215 = vector.extract_strided_slice %214 {offsets = [0, 0], sizes = [8, 128], strides = [1, 1]} : vector<8x512xf32> to vector<8x128xf32>
    %cst_88 = arith.constant 5.000000e-01 : f32
    %216 = vector.broadcast %cst_88 : f32 to vector<8x128xf32>
    %217 = arith.mulf %216, %215 : vector<8x128xf32>
    %218 = math.tanh %217 : vector<8x128xf32>
    %cst_89 = arith.constant 1.000000e+00 : f32
    %219 = vector.broadcast %cst_89 : f32 to vector<8x128xf32>
    %220 = arith.addf %218, %219 : vector<8x128xf32>
    %cst_90 = arith.constant 5.000000e-01 : f32
    %221 = vector.broadcast %cst_90 : f32 to vector<8x128xf32>
    %222 = arith.mulf %221, %220 : vector<8x128xf32>
    %223 = vector.extract_strided_slice %214 {offsets = [0, 128], sizes = [8, 128], strides = [1, 1]} : vector<8x512xf32> to vector<8x128xf32>
    %cst_91 = arith.constant 5.000000e-01 : f32
    %224 = vector.broadcast %cst_91 : f32 to vector<8x128xf32>
    %225 = arith.mulf %224, %223 : vector<8x128xf32>
    %226 = math.tanh %225 : vector<8x128xf32>
    %cst_92 = arith.constant 1.000000e+00 : f32
    %227 = vector.broadcast %cst_92 : f32 to vector<8x128xf32>
    %228 = arith.addf %226, %227 : vector<8x128xf32>
    %cst_93 = arith.constant 5.000000e-01 : f32
    %229 = vector.broadcast %cst_93 : f32 to vector<8x128xf32>
    %230 = arith.mulf %229, %228 : vector<8x128xf32>
    %231 = vector.extract_strided_slice %214 {offsets = [0, 256], sizes = [8, 128], strides = [1, 1]} : vector<8x512xf32> to vector<8x128xf32>
    %232 = math.tanh %231 : vector<8x128xf32>
    %233 = vector.extract_strided_slice %214 {offsets = [0, 384], sizes = [8, 128], strides = [1, 1]} : vector<8x512xf32> to vector<8x128xf32>
    %cst_94 = arith.constant 5.000000e-01 : f32
    %234 = vector.broadcast %cst_94 : f32 to vector<8x128xf32>
    %235 = arith.mulf %234, %233 : vector<8x128xf32>
    %236 = math.tanh %235 : vector<8x128xf32>
    %cst_95 = arith.constant 1.000000e+00 : f32
    %237 = vector.broadcast %cst_95 : f32 to vector<8x128xf32>
    %238 = arith.addf %236, %237 : vector<8x128xf32>
    %cst_96 = arith.constant 5.000000e-01 : f32
    %239 = vector.broadcast %cst_96 : f32 to vector<8x128xf32>
    %240 = arith.mulf %239, %238 : vector<8x128xf32>
    %241 = arith.mulf %230, %204 : vector<8x128xf32>
    %242 = arith.mulf %222, %232 : vector<8x128xf32>
    %243 = arith.addf %241, %242 : vector<8x128xf32>
    %244 = math.tanh %243 : vector<8x128xf32>
    %245 = arith.mulf %240, %244 : vector<8x128xf32>
    %246 = arith.truncf %245 : vector<8x128xf32> to vector<8x128xbf16>
    %c6_i32 = arith.constant 6 : i32
    %c8_i32_97 = arith.constant 8 : i32
    %247 = arith.muli %c6_i32, %c8_i32_97 : i32
    %248 = tpu.assume_multiple %247, 8 : i32
    %249 = arith.index_cast %248 : i32 to index
    %c0_98 = arith.constant 0 : index
    %250 = vector.load %arg9[%249, %c0_98] : memref<64x512xf32, #tpu.memory_space<vmem>>, vector<8x512xf32>
    %c0_99 = arith.constant 0 : index
    %c0_100 = arith.constant 0 : index
    %251 = vector.load %arg4[%c0_99, %c0_100] : memref<128x512xbf16, #tpu.memory_space<vmem>>, vector<128x512xbf16>
    %cst_101 = arith.constant dense<0.000000e+00> : vector<8x512xf32>
    %252 = tpu.matmul %246, %251, %cst_101 {dimension_numbers = #tpu.dot_dimension_numbers<[1], [0], [0], [1], [0, 0, 1, 1], [], []>} : vector<8x128xbf16>, vector<128x512xbf16>, vector<8x512xf32> -> vector<8x512xf32>
    %253 = arith.addf %250, %252 : vector<8x512xf32>
    %254 = vector.extract_strided_slice %253 {offsets = [0, 0], sizes = [8, 128], strides = [1, 1]} : vector<8x512xf32> to vector<8x128xf32>
    %cst_102 = arith.constant 5.000000e-01 : f32
    %255 = vector.broadcast %cst_102 : f32 to vector<8x128xf32>
    %256 = arith.mulf %255, %254 : vector<8x128xf32>
    %257 = math.tanh %256 : vector<8x128xf32>
    %cst_103 = arith.constant 1.000000e+00 : f32
    %258 = vector.broadcast %cst_103 : f32 to vector<8x128xf32>
    %259 = arith.addf %257, %258 : vector<8x128xf32>
    %cst_104 = arith.constant 5.000000e-01 : f32
    %260 = vector.broadcast %cst_104 : f32 to vector<8x128xf32>
    %261 = arith.mulf %260, %259 : vector<8x128xf32>
    %262 = vector.extract_strided_slice %253 {offsets = [0, 128], sizes = [8, 128], strides = [1, 1]} : vector<8x512xf32> to vector<8x128xf32>
    %cst_105 = arith.constant 5.000000e-01 : f32
    %263 = vector.broadcast %cst_105 : f32 to vector<8x128xf32>
    %264 = arith.mulf %263, %262 : vector<8x128xf32>
    %265 = math.tanh %264 : vector<8x128xf32>
    %cst_106 = arith.constant 1.000000e+00 : f32
    %266 = vector.broadcast %cst_106 : f32 to vector<8x128xf32>
    %267 = arith.addf %265, %266 : vector<8x128xf32>
    %cst_107 = arith.constant 5.000000e-01 : f32
    %268 = vector.broadcast %cst_107 : f32 to vector<8x128xf32>
    %269 = arith.mulf %268, %267 : vector<8x128xf32>
    %270 = vector.extract_strided_slice %253 {offsets = [0, 256], sizes = [8, 128], strides = [1, 1]} : vector<8x512xf32> to vector<8x128xf32>
    %271 = math.tanh %270 : vector<8x128xf32>
    %272 = vector.extract_strided_slice %253 {offsets = [0, 384], sizes = [8, 128], strides = [1, 1]} : vector<8x512xf32> to vector<8x128xf32>
    %cst_108 = arith.constant 5.000000e-01 : f32
    %273 = vector.broadcast %cst_108 : f32 to vector<8x128xf32>
    %274 = arith.mulf %273, %272 : vector<8x128xf32>
    %275 = math.tanh %274 : vector<8x128xf32>
    %cst_109 = arith.constant 1.000000e+00 : f32
    %276 = vector.broadcast %cst_109 : f32 to vector<8x128xf32>
    %277 = arith.addf %275, %276 : vector<8x128xf32>
    %cst_110 = arith.constant 5.000000e-01 : f32
    %278 = vector.broadcast %cst_110 : f32 to vector<8x128xf32>
    %279 = arith.mulf %278, %277 : vector<8x128xf32>
    %280 = arith.mulf %269, %243 : vector<8x128xf32>
    %281 = arith.mulf %261, %271 : vector<8x128xf32>
    %282 = arith.addf %280, %281 : vector<8x128xf32>
    %283 = math.tanh %282 : vector<8x128xf32>
    %284 = arith.mulf %279, %283 : vector<8x128xf32>
    %285 = arith.truncf %284 : vector<8x128xf32> to vector<8x128xbf16>
    %c7_i32 = arith.constant 7 : i32
    %c8_i32_111 = arith.constant 8 : i32
    %286 = arith.muli %c7_i32, %c8_i32_111 : i32
    %287 = tpu.assume_multiple %286, 8 : i32
    %288 = arith.index_cast %287 : i32 to index
    %c0_112 = arith.constant 0 : index
    %289 = vector.load %arg9[%288, %c0_112] : memref<64x512xf32, #tpu.memory_space<vmem>>, vector<8x512xf32>
    %c0_113 = arith.constant 0 : index
    %c0_114 = arith.constant 0 : index
    %290 = vector.load %arg4[%c0_113, %c0_114] : memref<128x512xbf16, #tpu.memory_space<vmem>>, vector<128x512xbf16>
    %cst_115 = arith.constant dense<0.000000e+00> : vector<8x512xf32>
    %291 = tpu.matmul %285, %290, %cst_115 {dimension_numbers = #tpu.dot_dimension_numbers<[1], [0], [0], [1], [0, 0, 1, 1], [], []>} : vector<8x128xbf16>, vector<128x512xbf16>, vector<8x512xf32> -> vector<8x512xf32>
    %292 = arith.addf %289, %291 : vector<8x512xf32>
    %293 = vector.extract_strided_slice %292 {offsets = [0, 0], sizes = [8, 128], strides = [1, 1]} : vector<8x512xf32> to vector<8x128xf32>
    %cst_116 = arith.constant 5.000000e-01 : f32
    %294 = vector.broadcast %cst_116 : f32 to vector<8x128xf32>
    %295 = arith.mulf %294, %293 : vector<8x128xf32>
    %296 = math.tanh %295 : vector<8x128xf32>
    %cst_117 = arith.constant 1.000000e+00 : f32
    %297 = vector.broadcast %cst_117 : f32 to vector<8x128xf32>
    %298 = arith.addf %296, %297 : vector<8x128xf32>
    %cst_118 = arith.constant 5.000000e-01 : f32
    %299 = vector.broadcast %cst_118 : f32 to vector<8x128xf32>
    %300 = arith.mulf %299, %298 : vector<8x128xf32>
    %301 = vector.extract_strided_slice %292 {offsets = [0, 128], sizes = [8, 128], strides = [1, 1]} : vector<8x512xf32> to vector<8x128xf32>
    %cst_119 = arith.constant 5.000000e-01 : f32
    %302 = vector.broadcast %cst_119 : f32 to vector<8x128xf32>
    %303 = arith.mulf %302, %301 : vector<8x128xf32>
    %304 = math.tanh %303 : vector<8x128xf32>
    %cst_120 = arith.constant 1.000000e+00 : f32
    %305 = vector.broadcast %cst_120 : f32 to vector<8x128xf32>
    %306 = arith.addf %304, %305 : vector<8x128xf32>
    %cst_121 = arith.constant 5.000000e-01 : f32
    %307 = vector.broadcast %cst_121 : f32 to vector<8x128xf32>
    %308 = arith.mulf %307, %306 : vector<8x128xf32>
    %309 = vector.extract_strided_slice %292 {offsets = [0, 256], sizes = [8, 128], strides = [1, 1]} : vector<8x512xf32> to vector<8x128xf32>
    %310 = math.tanh %309 : vector<8x128xf32>
    %311 = vector.extract_strided_slice %292 {offsets = [0, 384], sizes = [8, 128], strides = [1, 1]} : vector<8x512xf32> to vector<8x128xf32>
    %cst_122 = arith.constant 5.000000e-01 : f32
    %312 = vector.broadcast %cst_122 : f32 to vector<8x128xf32>
    %313 = arith.mulf %312, %311 : vector<8x128xf32>
    %314 = math.tanh %313 : vector<8x128xf32>
    %cst_123 = arith.constant 1.000000e+00 : f32
    %315 = vector.broadcast %cst_123 : f32 to vector<8x128xf32>
    %316 = arith.addf %314, %315 : vector<8x128xf32>
    %cst_124 = arith.constant 5.000000e-01 : f32
    %317 = vector.broadcast %cst_124 : f32 to vector<8x128xf32>
    %318 = arith.mulf %317, %316 : vector<8x128xf32>
    %319 = arith.mulf %308, %282 : vector<8x128xf32>
    %320 = arith.mulf %300, %310 : vector<8x128xf32>
    %321 = arith.addf %319, %320 : vector<8x128xf32>
    %322 = math.tanh %321 : vector<8x128xf32>
    %323 = arith.mulf %318, %322 : vector<8x128xf32>
    %324 = arith.truncf %323 : vector<8x128xf32> to vector<8x128xbf16>
    %c8_i32_125 = arith.constant 8 : i32
    %c0_126 = arith.constant 0 : index
    %c0_127 = arith.constant 0 : index
    %325 = vector.load %arg10[%c0_126, %c0_127] : memref<8x128xbf16, #tpu.memory_space<vmem>>, vector<8x128xbf16>
    tpu.vector_store %arg10[%c0_126, %c0_127], %324 {strides = array<i32>} : memref<8x128xbf16, #tpu.memory_space<vmem>>, vector<8x128xbf16>,
    %c0_128 = arith.constant 0 : index
    %c0_129 = arith.constant 0 : index
    %326 = vector.load %arg11[%c0_128, %c0_129] : memref<8x128xf32, #tpu.memory_space<vmem>>, vector<8x128xf32>
    tpu.vector_store %arg11[%c0_128, %c0_129], %321 {strides = array<i32>} : memref<8x128xf32, #tpu.memory_space<vmem>>, vector<8x128xf32>,
    %c0_i32_130 = arith.constant 0 : i32
    %327 = arith.cmpi eq, %arg1, %c0_i32_130 : i32
    %328 = arith.extui %327 : i1 to i32
    %c0_i32_131 = arith.constant 0 : i32
    %329 = arith.cmpi ne, %328, %c0_i32_131 : i32
    scf.if %329 {
      %c0_132 = arith.constant 0 : index
      %c0_133 = arith.constant 0 : index
      %330 = vector.load %arg10[%c0_132, %c0_133] : memref<8x128xbf16, #tpu.memory_space<vmem>>, vector<8x128xbf16>
      %c0_134 = arith.constant 0 : index
      %c0_135 = arith.constant 0 : index
      %331 = vector.load %arg6[%c0_134, %c0_135] : memref<128x128xbf16, #tpu.memory_space<vmem>>, vector<128x128xbf16>
      %cst_136 = arith.constant dense<0.000000e+00> : vector<8x128xf32>
      %332 = tpu.matmul %330, %331, %cst_136 {dimension_numbers = #tpu.dot_dimension_numbers<[1], [0], [0], [1], [0, 0, 1, 1], [], []>} : vector<8x128xbf16>, vector<128x128xbf16>, vector<8x128xf32> -> vector<8x128xf32>
      %c0_137 = arith.constant 0 : index
      %c0_138 = arith.constant 0 : index
      %333 = vector.load %arg7[%c0_137, %c0_138] : memref<1x128xf32, #tpu.memory_space<vmem>>, vector<1x128xf32>
      %334 = vector.broadcast %333 : vector<1x128xf32> to vector<8x128xf32>
      %335 = arith.addf %332, %334 : vector<8x128xf32>
      %c0_139 = arith.constant 0 : index
      %c0_140 = arith.constant 0 : index
      %336 = vector.load %arg8[%c0_139, %c0_140] : memref<8x128xf32, #tpu.memory_space<vmem>>, vector<8x128xf32>
      tpu.vector_store %arg8[%c0_139, %c0_140], %335 {strides = array<i32>} : memref<8x128xf32, #tpu.memory_space<vmem>>, vector<8x128xf32>,
    } else {
    }
    return
  }
  func.func @transform_0(%arg0: i32, %arg1: i32) -> (i32, i32, i32) {
    %c0_i32 = arith.constant 0 : i32
    %c0_i32_0 = arith.constant 0 : i32
    return %arg0, %arg1, %c0_i32 : i32, i32, i32
  }
  func.func @transform_1(%arg0: i32, %arg1: i32) -> (i32, i32) {
    %c0_i32 = arith.constant 0 : i32
    %c0_i32_0 = arith.constant 0 : i32
    %c0_i32_1 = arith.constant 0 : i32
    return %c0_i32, %c0_i32_0 : i32, i32
  }
  func.func @transform_2(%arg0: i32, %arg1: i32) -> (i32, i32) {
    %c0_i32 = arith.constant 0 : i32
    %c0_i32_0 = arith.constant 0 : i32
    %c0_i32_1 = arith.constant 0 : i32
    return %c0_i32, %c0_i32_0 : i32, i32
  }
  func.func @transform_3(%arg0: i32, %arg1: i32) -> (i32, i32) {
    %c0_i32 = arith.constant 0 : i32
    %c0_i32_0 = arith.constant 0 : i32
    %c0_i32_1 = arith.constant 0 : i32
    return %c0_i32, %c0_i32_0 : i32, i32
  }
  func.func @transform_4(%arg0: i32, %arg1: i32) -> (i32, i32) {
    %c0_i32 = arith.constant 0 : i32
    %c0_i32_0 = arith.constant 0 : i32
    %c0_i32_1 = arith.constant 0 : i32
    return %c0_i32, %c0_i32_0 : i32, i32
  }
  func.func @transform_5(%arg0: i32, %arg1: i32) -> (i32, i32) {
    %c0_i32 = arith.constant 0 : i32
    %c0_i32_0 = arith.constant 0 : i32
    %c0_i32_1 = arith.constant 0 : i32
    return %c0_i32, %c0_i32_0 : i32, i32
  }
  func.func @transform_6(%arg0: i32, %arg1: i32) -> (i32, i32) {
    %c0_i32 = arith.constant 0 : i32
    %c0_i32_0 = arith.constant 0 : i32
    return %arg0, %c0_i32 : i32, i32
  }
}

</mosaic_0001>

<bundles_post_ra>
// kernel: tpu_custom_call.1
= control target key start
LH: loop header
LB: loop body
LE: loop exit
PB: predicated region body
PF: predicated region fallthrough
CT: control target
= control target key end

     0   :  { %s3531_s0 = inlined_call_operand.hbm [shape: bf16[2,64,128], index: 0, kind: input, shape index: {}]   ;;  %s3532_s1 = inlined_call_operand.hbm [shape: bf16[128,512], index: 1, kind: input, shape index: {}]   ;;  %s3533_s2 = inlined_call_operand.hbm [shape: bf16[128,512], index: 2, kind: input, shape index: {}]   ;;  %s3534_s3 = inlined_call_operand.vmem [shape: f32[1,512], index: 3, kind: input, shape index: {}]   ;;  %s3535_s4 = inlined_call_operand.hbm [shape: bf16[128,128], index: 4, kind: input, shape index: {}]   ;;  %s3536_s5 = inlined_call_operand.vmem [shape: f32[1,128], index: 5, kind: input, shape index: {}]   ;;  %s3537_s6 = inlined_call_operand.hbm [shape: f32[16,128], index: 6, kind: output, shape index: {}]  }
   0x1   :  { %3546 = sst [smem:[#allocation37_spill]] %s3532_s1 }
   0x2   :  { %3547 = sst [smem:[#allocation38_spill]] %s3533_s2 }
   0x3   :  { %11 = vsyncpa [#allocation6], 0 }
   0x4   :  { %13 = vsyncpa [#allocation6 + $0x1], 0 }
   0x5   :  { %14 = vsyncpa [#allocation9], 0 }
   0x6   :  { %15 = vsyncpa [#allocation12], 0 }
   0x7   :  { %16 = vsyncpa [#allocation7], 0 }
   0x8   :  { %18 = vsyncpa [#allocation7 + $0x1], 0  ;;  %s2791_s21 = smov 0   ;;  %s2793_s22 = smov 0  }
   0x9   :  { %s2795_s23 = smov 0   ;;  %s2797_s24 = smov 0  }
   0xa   :  { %s2799_s25 = smov 0   ;;  %s2801_s26 = smov 0  }
   0xb LB: > { %s2101_s27 = sadd.s32 4294967295, %s2742_s26   ;;  %s2102_s28 = sadd.s32 4294967294, %s2742_s26   ;;  %s2742_s26 = sphi %s2801_s26, %s24_s26   ;;  %s2738_s25 = sphi %s2799_s25, %s3608_s25   ;;  %s2734_s24 = sphi %s2797_s24, %s3607_s24   ;;  %s2730_s23 = sphi %s2795_s23, %s3606_s23   ;;  %s2726_s22 = sphi %s2793_s22, %s3605_s22   ;;  %s2722_s21 = sphi %s2791_s21, %s3604_s21  }
   0xc   : > { %p58_p0 = scmp.ne.s32.totalorder %s2726_s22, %s2722_s21  ;;  %p2825_p1 = scmp.eq.s32.totalorder %s2101_s27, 0 }
   0xd   : > { %p2829_p2 = scmp.eq.s32.totalorder %s2101_s27, 1  ;;  %p193_p3 = scmp.eq.s32.totalorder %s2102_s28, 1 }
   0xe   : > { %s3548_s29 = scalar_select %p2825_p1, 1, 0 }
   0xf   : > { %p2835_p4 = por %p2825_p1, %p58_p0  ;;  %p2103_p5 = scmp.ge.s32.totalorder %s2742_s26, 1 }
  0x10   : > { %p2840_p6 = por %p193_p3, %p58_p0  ;;  %p200_p7 = scmp.lt.s32.totalorder %s2742_s26, 3 }
  0x11   : > { %s3550_s7 = scalar_select %p2835_p4, 1, 0 }
  0x12   : > { %s3551_s8 = scalar_select %p2840_p6, 1, 0 }
  0x13   : > { %p2845_p8 = pnand %p2103_p5, %p200_p7  ;;  %s2744_s10 = smov [#allocation8]  }
  0x14   : > { %s212_s11 = sshll.u32 %s2744_s10, 4  ;;  %s2745_s13 = smov [#allocation10]   ;;  %s213_s11 = int_to_ptr.vmem [resolvable:$true] %s212_s11 }
  0x15   : > { %s3552_s9 = scalar_select %p2845_p8, 1, 0 }
  0x16   : > { %p2244_p9 = pneg %p2845_p8  ;;  %s225_s14 = sshll.u32 %s2745_s13, 4  ;;  %s226_s14 = int_to_ptr.vmem [resolvable:$true] %s225_s14 }
  0x17   : > { %s2746_s15 = smov [#allocation11]   ;;  %s2559_s17 = scalar_lea.vmem %s213_s11, 4096 }
  0x18   : > { %p2854_p11 = pnand %p2244_p9, %p2825_p1  ;;  %s241_s16 = sshll.u32 %s2746_s15, 4  ;;  %s242_s16 = int_to_ptr.vmem [resolvable:$true] %s241_s16 }
  0x19   : > { %p2560_p13 = scmp.ne.s32.totalorder %s213_s11, %s2559_s17  ;;  %p2567_p5 = scmp.lt.s32.totalorder %s213_s11, %s213_s11 }
  0x1a   : > { %p2550_p12 = pneg %p2854_p11  ;;  %p2568_p7 = scmp.lt.s32.totalorder %s2559_s17, %s2559_s17 }
  0x1c   : > { %p2562_p0 = pnand %p2560_p13, %p2550_p12  ;;  %p2569_p9 = por %p2568_p7, %p2567_p5 }
  0x1e   : > { %p2563_p3 = pneg %p2562_p0 }
  0x20   : > { %p2570_p10 = pnand %p2569_p9, %p2563_p3 }
  0x22   : > { %2573 = shalt.err (!%p2570_p10)
}
  0x23   : > { %s2747_s18 = smov 256   ;;  %s2748_s19 = smov 16  }
  0x24   : > { %s3554_s1 = sld [smem:[#allocation37_spill]]  ;;  %s2585_s28 = scalar_lea.vmem %s226_s14, 4096 }
  0x25   : > { %p2586_p6 = scmp.ne.s32.totalorder %s226_s14, %s2585_s28  ;;  %p2593_p1 = scmp.lt.s32.totalorder %s226_s14, %s226_s14 }
  0x26   : > { %p2594_p4 = scmp.lt.s32.totalorder %s2585_s28, %s2585_s28 }
  0x27   : > { %p2588_p13 = pnand %p2586_p6, %p2550_p12 }
  0x28   : > { %p2595_p5 = por %p2594_p4, %p2593_p1 }
  0x29   : > { %p2589_p0 = pneg %p2588_p13 }
  0x2a   : > { %2247 = dma.hbm_to_vmem [thread:$0]  (!%p2854_p11), %s3554_s1, 4096, %s213_s11, [#allocation9], %s2747_s18, %s2747_s18, %s2748_s19  }
  0x2b   : > { %p2596_p3 = pnand %p2595_p5, %p2589_p0 }
  0x2d   : > { %2599 = shalt.err (!%p2596_p3)
}
  0x2e   : > { %s3555_s2 = sld [smem:[#allocation38_spill]]  ;;  %s2611_s11 = scalar_lea.vmem %s242_s16, 1024 }
  0x2f   : > { %p2612_p10 = scmp.ne.s32.totalorder %s242_s16, %s2611_s11  ;;  %p2619_p9 = scmp.lt.s32.totalorder %s242_s16, %s242_s16 }
  0x30   : > { %p2620_p13 = scmp.lt.s32.totalorder %s2611_s11, %s2611_s11 }
  0x31   : > { %p2614_p7 = pnand %p2612_p10, %p2550_p12 }
  0x32   : > { %p2621_p8 = por %p2620_p13, %p2619_p9 }
  0x33   : > { %p2615_p6 = pneg %p2614_p7 }
  0x34   : > { %2250 = dma.hbm_to_vmem [thread:$0]  (!%p2854_p11), %s3555_s2, 4096, %s226_s14, [#allocation9], %s2747_s18, %s2747_s18, %s2748_s19  }
  0x35   : > { %p2622_p1 = pnand %p2621_p8, %p2615_p6 }
  0x37   : > { %2625 = shalt.err (!%p2622_p1)
}
  0x38   : > { %s3542_s15 = smov 64   ;;  %s3543_s14 = smov 4  }
  0x39   : > { %2253 = dma.hbm_to_vmem [thread:$0]  (!%p2854_p11), %s3535_s4, 1024, %s242_s16, [#allocation12], %s3542_s15, %s3542_s15, %s3543_s14  }
  0x3a   : > { %s45_s19 = sadd.s32 1, %s2730_s23  ;;  %s36_s20 = sadd.s32 1, %s2738_s25 }
  0x3b   : > { %p52_p4 = scmp.ne.s32.totalorder %s2730_s23, %s2726_s22  ;;  %p38_p8 = scmp.ge.s32.totalorder %s36_s20, 2 }
  0x3c   : > { %p53_p12 = scmp.eq.s32.totalorder %s2742_s26, 0  ;;  %p2265_p5 = scmp.lt.s32.totalorder %s2742_s26, 2 }
  0x3d   : > { %p2894_p0 = por %p2829_p2, %p52_p4  ;;  %s3610_s20 = smov (%p38_p8, %s36_s20), 0 }
  0x3e   : > { %p54_p3 = por %p53_p12, %p52_p4  ;;  %s258_s12 = sand.u32 1, %s2730_s23  }
  0x3f   : > { %s40_s28 = ssub.s32 %s2738_s25, %s3610_s20  ;;  %s2108_s16 = sshll.u32 %s258_s12, 5 }
  0x40   : > { %p43_p10 = scmp.eq.s32.totalorder %s40_s28, 0  ;;  %s2198_s10 = sshll.u32 %s2738_s25, 9 }
  0x41   : > { %s270_s30 = scalar_lea.hbm %s3531_s0, %s2198_s10  ;;  %s262_s18 = scalar_lea.vmem [#allocation5], %s2108_s16 }
  0x42   : > { %s2906_s13 = scalar_select %p43_p10, %s2730_s23, %s45_s19  }
  0x43   : > { %s271_s15 = sshll.u32 %s262_s18, 4  ;;  %p2913_p2 = pnand %p2265_p5, %p54_p3  ;;  %s272_s15 = int_to_ptr.vmem [resolvable:$true] %s271_s15 }
  0x44   : > { %s259_s1 = scalar_lea.sflag [#allocation6], %s258_s12  ;;  %s2639_s28 = scalar_lea.vmem %s272_s15, 512 }
  0x45   : > { %p2628_p11 = pneg %p2913_p2  ;;  %p2640_p7 = scmp.ne.s32.totalorder %s272_s15, %s2639_s28 }
  0x46   : > { %s2751_s19 = smov [#allocation5]  }
  0x47   : > { %p2642_p6 = pnand %p2640_p7, %p2628_p11  ;;  %s2644_s2 = sshll.u32 %s2751_s19, 4  ;;  %s2645_s2 = int_to_ptr.vmem [resolvable:$false] %s2644_s2 }
  0x48   : > { %s2646_s10 = scalar_lea.vmem %s2645_s2, 1024  ;;  %p2647_p13 = scmp.lt.s32.totalorder %s272_s15, %s2645_s2 }
  0x49   : > { %p2643_p9 = pneg %p2642_p6  ;;  %p2648_p1 = scmp.lt.s32.totalorder %s2646_s10, %s2639_s28 }
  0x4b   : > { %p2649_p4 = por %p2648_p1, %p2647_p13 }
  0x4d   : > { %p2650_p8 = pnand %p2649_p4, %p2643_p9 }
  0x4f   : > { %2653 = shalt.err (!%p2650_p8)
}
  0x50   : > { %s3558_s16 = smov 4   ;;  %s3559_s11 = smov 64  }
  0x51   : > { %2257 = dma.hbm_to_vmem [thread:$0]  (!%p2913_p2), %s270_s30, 512, %s272_s15, %s259_s1, %s3559_s11, %s3559_s11, %s3558_s16  }
  0x52   : > { %p3560_p12 = scmp.ne.s32.totalorder %s3552_s9, 0 }
  0x54   : > { %283 = sbr.rel (%p3560_p12) target bundleno = 2293 (0x8f5), region = 44 }
  0x59   : > { %s2927_s12 = sand.u32 1, %s2726_s22   ;;  %p3561_p5 = scmp.ne.s32.totalorder %s3550_s7, 0 }
  0x5a   : > { %s2112_s2 = sshll.u32 %s2927_s12, 5  ;;  %s286_s17 = scalar_lea.sflag [#allocation6], %s2927_s12 }
  0x5b   : > { %s2931_s18 = scalar_lea.vmem [#allocation5], %s2112_s2 }
  0x5c   : > { %2705 = dma.done.wait (%p3561_p5), %s286_s17, 512  }
  0x5d   : > { %2707 = vsyncadd (%p3561_p5), %s286_s17, 4294966784  ;;  %p3562_p3 = scmp.ne.s32.totalorder %s3548_s29, 0 }
  0x5f   : > { %2709 = dma.done.wait (%p3562_p3), [#allocation9], 8192  }
  0x60   : > { %2711 = vsyncadd (%p3562_p3), [#allocation9], 4294959104 }
  0x61   : > { %2713 = dma.done.wait (%p3562_p3), [#allocation12], 1024  }
  0x62   : > { %2715 = vsyncadd (%p3562_p3), [#allocation12], 4294966272  ;;  %v3544_v0 = vmov 0   ;;  %v2328_v1 = vld [vmem:[#allocation8 + $0xe4] ss:$16 sps:$4 sm:$0xff]   ;;  %v2389_v44 = vld [vmem:[%s2931_s18 + $0x8] sm:$0xff]  }
  0x63   : > { %610 = vmatprep.mubr.bf16.mxu0 %v3544_v0  ;;  %760 = vst [vmem:[#allocation3] sm:$0xf] %v3544_v0  ;;  %683 = vmatprep.mubr.bf16.mxu1 %v3544_v0  ;;  %v2330_v2 = vld [vmem:[#allocation8 + $0xec] ss:$16 sps:$4 sm:$0xff]   ;;  %v2332_v3 = vld [vmem:[#allocation8 + $0xe0] ss:$16 sps:$4 sm:$0xff]  }
  0x64   : > { %578 = vmatprep.subr.bf16.mxu0 %v2328_v1  ;;  %v2333_v4 = vld [vmem:[#allocation8 + $0xe8] ss:$16 sps:$4 sm:$0xff]   ;;  %651 = vmatprep.subr.bf16.mxu1 %v2330_v2  ;;  %v2334_v5 = vld [vmem:[#allocation8 + $0xc4] ss:$16 sps:$4 sm:$0xff]   ;;  %v2336_v6 = vld [vmem:[#allocation8 + $0xcc] ss:$16 sps:$4 sm:$0xff]  }
  0x65   : > { %579 = vmatpush1.bf16.msra.mxu0 %v2332_v3  ;;  %652 = vmatpush1.bf16.msra.mxu1 %v2333_v4  ;;  %v2338_v7 = vld [vmem:[#allocation8 + $0xc0] ss:$16 sps:$4 sm:$0xff]   ;;  %v2339_v8 = vld [vmem:[#allocation8 + $0xc8] ss:$16 sps:$4 sm:$0xff]   ;;  %v2340_v9 = vld [vmem:[#allocation8 + $0xa4] ss:$16 sps:$4 sm:$0xff]  }
  0x66   : > { %580 = vmatprep.subr.bf16.mxu0 %v2334_v5  ;;  %653 = vmatprep.subr.bf16.mxu1 %v2336_v6  ;;  %v2342_v10 = vld [vmem:[#allocation8 + $0xac] ss:$16 sps:$4 sm:$0xff]   ;;  %v2344_v11 = vld [vmem:[#allocation8 + $0xa0] ss:$16 sps:$4 sm:$0xff]   ;;  %v2345_v12 = vld [vmem:[#allocation8 + $0xa8] ss:$16 sps:$4 sm:$0xff]  }
  0x67   : > { %v2346_v13 = vld [vmem:[#allocation8 + $0x84] ss:$16 sps:$4 sm:$0xff]   ;;  %v2348_v14 = vld [vmem:[#allocation8 + $0x8c] ss:$16 sps:$4 sm:$0xff]   ;;  %v2350_v15 = vld [vmem:[#allocation8 + $0x80] ss:$16 sps:$4 sm:$0xff]  }
  0x68   : > { %v2351_v16 = vld [vmem:[#allocation8 + $0x88] ss:$16 sps:$4 sm:$0xff]   ;;  %v2352_v17 = vld [vmem:[#allocation8 + $0x64] ss:$16 sps:$4 sm:$0xff]   ;;  %v2354_v18 = vld [vmem:[#allocation8 + $0x6c] ss:$16 sps:$4 sm:$0xff]  }
  0x69   : > { %581 = vmatpush1.bf16.msra.mxu0 %v2338_v7  ;;  %654 = vmatpush1.bf16.msra.mxu1 %v2339_v8  ;;  %v2356_v19 = vld [vmem:[#allocation8 + $0x60] ss:$16 sps:$4 sm:$0xff]   ;;  %v2357_v20 = vld [vmem:[#allocation8 + $0x68] ss:$16 sps:$4 sm:$0xff]   ;;  %v2358_v21 = vld [vmem:[#allocation8 + $0x44] ss:$16 sps:$4 sm:$0xff]   ;;  %v374_v7 = vlaneseq }
  0x6a   : > { %582 = vmatprep.subr.bf16.mxu0 %v2340_v9  ;;  %655 = vmatprep.subr.bf16.mxu1 %v2342_v10  ;;  %v2360_v22 = vld [vmem:[#allocation8 + $0x4c] ss:$16 sps:$4 sm:$0xff]   ;;  %v2362_v23 = vld [vmem:[#allocation8 + $0x40] ss:$16 sps:$4 sm:$0xff]   ;;  %v2363_v24 = vld [vmem:[#allocation8 + $0x48] ss:$16 sps:$4 sm:$0xff]  }
  0x6b   : > { %v2364_v25 = vld [vmem:[#allocation8 + $0x24] ss:$16 sps:$4 sm:$0xff]   ;;  %v2366_v26 = vld [vmem:[#allocation8 + $0x2c] ss:$16 sps:$4 sm:$0xff]   ;;  %v2368_v27 = vld [vmem:[#allocation8 + $0x20] ss:$16 sps:$4 sm:$0xff]  }
  0x6c   : > { %v2369_v28 = vld [vmem:[#allocation8 + $0x28] ss:$16 sps:$4 sm:$0xff]   ;;  %v2370_v29 = vld [vmem:[#allocation8 + $0x4] ss:$16 sps:$4 sm:$0xff]   ;;  %v2372_v30 = vld [vmem:[#allocation8 + $0xc] ss:$16 sps:$4 sm:$0xff]  }
  0x6d   : > { %583 = vmatpush1.bf16.msra.mxu0 %v2344_v11  ;;  %656 = vmatpush1.bf16.msra.mxu1 %v2345_v12  ;;  %v2374_v31 = vld [vmem:[#allocation8] ss:$16 sps:$4 sm:$0xff]   ;;  %v2375_v32 = vld [vmem:[#allocation8 + $0x8] ss:$16 sps:$4 sm:$0xff]   ;;  %v2948_v33 = vld [vmem:[#allocation10 + $0xe4] ss:$16 sps:$4 sm:$0xff]  }
  0x6e   : > { %584 = vmatprep.subr.bf16.mxu0 %v2346_v13  ;;  %657 = vmatprep.subr.bf16.mxu1 %v2348_v14  ;;  %v2950_v34 = vld [vmem:[#allocation10 + $0xec] ss:$16 sps:$4 sm:$0xff]   ;;  %v2376_v35 = vld [vmem:[%s2931_s18] sm:$0xff]   ;;  %v2955_v37 = vld [vmem:[#allocation10 + $0xe8] ss:$16 sps:$4 sm:$0xff]   ;;  %v375_v8 = vshrl.u32 %v374_v7, 7 }
  0x6f   : > { %v2953_v36 = vld [vmem:[#allocation10 + $0xe0] ss:$16 sps:$4 sm:$0xff]   ;;  %v2959_v38 = vld [vmem:[#allocation10 + $0xc4] ss:$16 sps:$4 sm:$0xff]   ;;  %v2961_v39 = vld [vmem:[#allocation10 + $0xcc] ss:$16 sps:$4 sm:$0xff]  }
  0x70   : > { %v2963_v40 = vld [vmem:[#allocation10 + $0xc0] ss:$16 sps:$4 sm:$0xff]   ;;  %v2967_v41 = vld [vmem:[#allocation10 + $0xc8] ss:$16 sps:$4 sm:$0xff]   ;;  %v2971_v42 = vld [vmem:[#allocation10 + $0xa4] ss:$16 sps:$4 sm:$0xff]  }
  0x71   : > { %585 = vmatpush1.bf16.msra.mxu0 %v2350_v15  ;;  %658 = vmatpush1.bf16.msra.mxu1 %v2351_v16  ;;  %v2973_v43 = vld [vmem:[#allocation10 + $0xac] ss:$16 sps:$4 sm:$0xff]   ;;  %v2978_v45 = vld [vmem:[#allocation10 + $0xa0] ss:$16 sps:$4 sm:$0xff]   ;;  %v2980_v46 = vld [vmem:[#allocation10 + $0xa8] ss:$16 sps:$4 sm:$0xff]  }
  0x72   : > { %586 = vmatprep.subr.bf16.mxu0 %v2352_v17  ;;  %659 = vmatprep.subr.bf16.mxu1 %v2354_v18  ;;  %v2984_v47 = vld [vmem:[#allocation10 + $0x84] ss:$16 sps:$4 sm:$0xff]   ;;  %v2988_v48 = vld [vmem:[#allocation10 + $0x8c] ss:$16 sps:$4 sm:$0xff]   ;;  %v2990_v49 = vld [vmem:[#allocation10 + $0x80] ss:$16 sps:$4 sm:$0xff]  }
  0x73   : > { %v2992_v50 = vld [vmem:[#allocation10 + $0x88] ss:$16 sps:$4 sm:$0xff]   ;;  %v2996_v51 = vld [vmem:[#allocation10 + $0x64] ss:$16 sps:$4 sm:$0xff]   ;;  %v3000_v52 = vld [vmem:[#allocation10 + $0x6c] ss:$16 sps:$4 sm:$0xff]  }
  0x74   : > { %v2402_v53 = vld [vmem:[%s2931_s18 + $0x10] sm:$0xff]   ;;  %v3007_v55 = vld [vmem:[#allocation10 + $0x68] ss:$16 sps:$4 sm:$0xff]   ;;  %v3011_v57 = vld [vmem:[#allocation10 + $0x4c] ss:$16 sps:$4 sm:$0xff]   ;;  %v384_v9 = vsub.s32 2, %v375_v8 }
  0x75   : > { %587 = vmatpush1.bf16.msra.mxu0 %v2356_v19  ;;  %660 = vmatpush1.bf16.msra.mxu1 %v2357_v20  ;;  %v3005_v54 = vld [vmem:[#allocation10 + $0x60] ss:$16 sps:$4 sm:$0xff]   ;;  %v3009_v56 = vld [vmem:[#allocation10 + $0x44] ss:$16 sps:$4 sm:$0xff]   ;;  %v3021_v59 = vld [vmem:[#allocation10 + $0x48] ss:$16 sps:$4 sm:$0xff]  }
  0x76   : > { %588 = vmatprep.subr.bf16.mxu0 %v2358_v21  ;;  %661 = vmatprep.subr.bf16.mxu1 %v2360_v22  ;;  %v3017_v58 = vld [vmem:[#allocation10 + $0x40] ss:$16 sps:$4 sm:$0xff]   ;;  %v3025_v60 = vld [vmem:[#allocation10 + $0x24] ss:$16 sps:$4 sm:$0xff]   ;;  %v3027_v61 = vld [vmem:[#allocation10 + $0x2c] ss:$16 sps:$4 sm:$0xff]  }
  0x77   : > { %v2415_v62 = vld [vmem:[%s2931_s18 + $0x18] sm:$0xff]   ;;  %v3034_v63 = vld [vmem:[#allocation10 + $0x20] ss:$16 sps:$4 sm:$0xff]   ;;  %v3040_v2 = vld [vmem:[#allocation10 + $0x4] ss:$16 sps:$4 sm:$0xff]   ;;  %v376_v10 = vsub.s32 0, %v375_v8 }
  0x78   : > { %v3036_v1 = vld [vmem:[#allocation10 + $0x28] ss:$16 sps:$4 sm:$0xff]   ;;  %v3042_v3 = vld [vmem:[#allocation10 + $0xc] ss:$16 sps:$4 sm:$0xff]   ;;  %v3046_v4 = vld [vmem:[#allocation10] ss:$16 sps:$4 sm:$0xff]  }
  0x79   : > { %589 = vmatpush1.bf16.msra.mxu0 %v2362_v23  ;;  %662 = vmatpush1.bf16.msra.mxu1 %v2363_v24  ;;  %v3048_v5 = vld [vmem:[#allocation10 + $0x8] ss:$16 sps:$4 sm:$0xff]   ;;  %v762_v6 = vld [vmem:[#allocation3] sm:$0xf]  ;;  %v388_v11 = vsub.s32 3, %v375_v8  ;;  %v380_v16 = vsub.s32 1, %v375_v8 }
  0x7a   : > { %590 = vmatprep.subr.bf16.mxu0 %v2364_v25  ;;  %663 = vmatprep.subr.bf16.mxu1 %v2366_v26  ;;  %v372_v12 = vld [vmem:[%s3534_s3] sm:$0xf]  ;;  %vm2754_vm0 = vmmov 0   ;;  %s2116_s7 = sshll.u32 %s2927_s12, 3  ;;  %s2195_s14 = sshll.u32 %s2734_s24, 7 }
  0x7b   : > { %v3099_v15 = vrot.slane %v372_v12, %v384_v9  ;;  %v377_v19 = vrot.slane %v372_v12, %v376_v10  ;;  %v3105_v20 = vrot.slane %v372_v12, %v388_v11  ;;  %v381_v23 = vrot.slane %v372_v12, %v380_v16  ;;  %s329_s30 = scalar_lea.vmem [#allocation13], %s2116_s7  ;;  %s3483_s16 = scalar_lea.hbm %s3537_s6, %s2195_s14 }
  0x7c   : > { %s1984_s28 = sshll.u32 %s329_s30, 4  ;;  %s1971_s11 = scalar_lea.sflag [#allocation7], %s2927_s12  ;;  %s3485_s28 = int_to_ptr.vmem [resolvable:$true] %s1984_s28 }
  0x7d   : > { %591 = vmatpush1.bf16.msra.mxu0 %v2368_v27  ;;  %664 = vmatpush1.bf16.msra.mxu1 %v2369_v28  ;;  %s2654_s2 = scalar_lea.vmem %s3485_s28, 128  ;;  %s2755_s24 = smov [#allocation13]  }
  0x7e   : > { %592 = vmatprep.subr.bf16.mxu0 %v2370_v29  ;;  %665 = vmatprep.subr.bf16.mxu1 %v2372_v30  ;;  %p2655_p10 = scmp.ne.s32.totalorder %s3485_s28, %s2654_s2  ;;  %s2658_s17 = sshll.u32 %s2755_s24, 4  ;;  %s2659_s17 = int_to_ptr.vmem [resolvable:$false] %s2658_s17 }
  0x7f   : > { %s2660_s18 = scalar_lea.vmem %s2659_s17, 256  ;;  %p2661_p7 = scmp.lt.s32.totalorder %s3485_s28, %s2659_s17 }
  0x80   : > { %p2656_p2 = pnand %p2655_p10, %p2894_p0  ;;  %p2662_p6 = scmp.lt.s32.totalorder %s2660_s18, %s2654_s2 }
  0x81   : > { %593 = vmatpush1.bf16.msra.mxu0 %v2374_v31  ;;  %666 = vmatpush1.bf16.msra.mxu1 %v2375_v32 }
  0x82   : > { %963 = vmatprep.subr.bf16.mxu0 %v2948_v33  ;;  %1004 = vmatprep.subr.bf16.mxu1 %v2950_v34  ;;  %p2657_p11 = pneg %p2656_p2  ;;  %p2663_p9 = por %p2662_p6, %p2661_p7 }
  0x84   : > { %611 = vmatmul.mubr.bf16.vlgmr.msra.gmra.mxu0 %v2376_v35  ;;  %684 = vmatmul.mubr.bf16.vlgmr.msra.gmra.mxu1 %v2376_v35  ;;  %p2664_p13 = pnand %p2663_p9, %p2657_p11 }
  0x85   : > { %964 = vmatpush1.bf16.msra.mxu0 %v2953_v36  ;;  %1005 = vmatpush1.bf16.msra.mxu1 %v2955_v37 }
  0x86   : > { %965 = vmatprep.subr.bf16.mxu0 %v2959_v38  ;;  %1006 = vmatprep.subr.bf16.mxu1 %v2961_v39 }
  0x87   : > { %620 = vmatprep.mubr.bf16.mxu0 %v3544_v0  ;;  %693 = vmatprep.mubr.bf16.mxu1 %v3544_v0 }
  0x89   : > { %966 = vmatpush1.bf16.msra.mxu0 %v2963_v40  ;;  %1007 = vmatpush1.bf16.msra.mxu1 %v2967_v41 }
  0x8a   : > { %967 = vmatprep.subr.bf16.mxu0 %v2971_v42  ;;  %1008 = vmatprep.subr.bf16.mxu1 %v2973_v43 }
  0x8c   : > { %621 = vmatmul.mubr.bf16.gmra.mxu0 %v2389_v44  ;;  %694 = vmatmul.mubr.bf16.gmra.mxu1 %v2389_v44 }
  0x8d   : > { %968 = vmatpush1.bf16.msra.mxu0 %v2978_v45  ;;  %1009 = vmatpush1.bf16.msra.mxu1 %v2980_v46 }
  0x8e   : > { %969 = vmatprep.subr.bf16.mxu0 %v2984_v47  ;;  %1010 = vmatprep.subr.bf16.mxu1 %v2988_v48 }
  0x8f   : > { %630 = vmatprep.mubr.bf16.mxu0 %v3544_v0  ;;  %703 = vmatprep.mubr.bf16.mxu1 %v3544_v0 }
  0x91   : > { %970 = vmatpush1.bf16.msra.mxu0 %v2990_v49  ;;  %1011 = vmatpush1.bf16.msra.mxu1 %v2992_v50 }
  0x92   : > { %971 = vmatprep.subr.bf16.mxu0 %v2996_v51  ;;  %1012 = vmatprep.subr.bf16.mxu1 %v3000_v52 }
  0x94   : > { %631 = vmatmul.mubr.bf16.gmra.mxu0 %v2402_v53  ;;  %704 = vmatmul.mubr.bf16.gmra.mxu1 %v2402_v53 }
  0x95   : > { %972 = vmatpush1.bf16.msra.mxu0 %v3005_v54  ;;  %1013 = vmatpush1.bf16.msra.mxu1 %v3007_v55 }
  0x96   : > { %973 = vmatprep.subr.bf16.mxu0 %v3009_v56  ;;  %1014 = vmatprep.subr.bf16.mxu1 %v3011_v57 }
  0x97   : > { %640 = vmatprep.mubr.bf16.mxu0 %v3544_v0  ;;  %713 = vmatprep.mubr.bf16.mxu1 %v3544_v0 }
  0x99   : > { %974 = vmatpush1.bf16.msra.mxu0 %v3017_v58  ;;  %1015 = vmatpush1.bf16.msra.mxu1 %v3021_v59 }
  0x9a   : > { %975 = vmatprep.subr.bf16.mxu0 %v3025_v60  ;;  %1016 = vmatprep.subr.bf16.mxu1 %v3027_v61 }
  0x9c   : > { %641 = vmatmul.mubr.bf16.gmra.mxu0 %v2415_v62  ;;  %714 = vmatmul.mubr.bf16.gmra.mxu1 %v2415_v62 }
  0x9d   : > { %976 = vmatpush1.bf16.msra.mxu0 %v3034_v63  ;;  %1017 = vmatpush1.bf16.msra.mxu1 %v3036_v1 }
  0x9e   : > { %977 = vmatprep.subr.bf16.mxu0 %v3040_v2  ;;  %1018 = vmatprep.subr.bf16.mxu1 %v3042_v3 }
  0x9f   : > { %995 = vmatprep.mubr.bf16.mxu0 %v3544_v0  ;;  %1036 = vmatprep.mubr.bf16.mxu1 %v3544_v0 }
  0xa1   : > { %978 = vmatpush1.bf16.msra.mxu0 %v3046_v4  ;;  %1019 = vmatpush1.bf16.msra.mxu1 %v3048_v5 }
  0xa2   : > { %1075 = vmatprep.subr.bf16.mxu0 %v2948_v33  ;;  %1116 = vmatprep.subr.bf16.mxu1 %v2950_v34 }
  0xa4   : > { %996 = vmatmul.mubr.bf16.vlgmr.msra.gmra.mxu0 %v762_v6  ;;  %1037 = vmatmul.mubr.bf16.vlgmr.msra.gmra.mxu1 %v762_v6 }
  0xa5   : > { %1076 = vmatpush1.bf16.msra.mxu0 %v2953_v36  ;;  %1117 = vmatpush1.bf16.msra.mxu1 %v2955_v37 }
  0xa6   : > { %1077 = vmatprep.subr.bf16.mxu0 %v2959_v38  ;;  %1118 = vmatprep.subr.bf16.mxu1 %v2961_v39 }
  0xa7   : > { %1107 = vmatprep.mubr.bf16.mxu0 %v3544_v0  ;;  %1148 = vmatprep.mubr.bf16.mxu1 %v3544_v0 }
  0xa9   : > { %1078 = vmatpush1.bf16.msra.mxu0 %v2963_v40  ;;  %1119 = vmatpush1.bf16.msra.mxu1 %v2967_v41 }
  0xaa   : > { %1079 = vmatprep.subr.bf16.mxu0 %v2971_v42  ;;  %1120 = vmatprep.subr.bf16.mxu1 %v2973_v43 }
  0xad   : > { %1080 = vmatpush1.bf16.msra.mxu0 %v2978_v45  ;;  %1121 = vmatpush1.bf16.msra.mxu1 %v2980_v46 }
  0xae   : > { %1081 = vmatprep.subr.bf16.mxu0 %v2984_v47  ;;  %1122 = vmatprep.subr.bf16.mxu1 %v2988_v48 }
  0xb1   : > { %1082 = vmatpush1.bf16.msra.mxu0 %v2990_v49  ;;  %1123 = vmatpush1.bf16.msra.mxu1 %v2992_v50 }
  0xb2   : > { %1083 = vmatprep.subr.bf16.mxu0 %v2996_v51  ;;  %1124 = vmatprep.subr.bf16.mxu1 %v3000_v52 }
  0xb5   : > { %1084 = vmatpush1.bf16.msra.mxu0 %v3005_v54  ;;  %1125 = vmatpush1.bf16.msra.mxu1 %v3007_v55 }
  0xb6   : > { %1085 = vmatprep.subr.bf16.mxu0 %v3009_v56  ;;  %1126 = vmatprep.subr.bf16.mxu1 %v3011_v57 }
  0xb9   : > { %1086 = vmatpush1.bf16.msra.mxu0 %v3017_v58  ;;  %1127 = vmatpush1.bf16.msra.mxu1 %v3021_v59 }
  0xba   : > { %1087 = vmatprep.subr.bf16.mxu0 %v3025_v60  ;;  %1128 = vmatprep.subr.bf16.mxu1 %v3027_v61 }
  0xbd   : > { %1088 = vmatpush1.bf16.msra.mxu0 %v3034_v63  ;;  %1129 = vmatpush1.bf16.msra.mxu1 %v3036_v1 }
  0xbe   : > { %1089 = vmatprep.subr.bf16.mxu0 %v3040_v2  ;;  %1130 = vmatprep.subr.bf16.mxu1 %v3042_v3 }
  0xc1   : > { %1090 = vmatpush1.bf16.msra.mxu0 %v3046_v4  ;;  %1131 = vmatpush1.bf16.msra.mxu1 %v3048_v5 }
  0xc2   : > { %1187 = vmatprep.subr.bf16.mxu0 %v2948_v33  ;;  %1228 = vmatprep.subr.bf16.mxu1 %v2950_v34 }
 0x144   : > { %v3095_v13 = vpop.f32.mrf.mxu0  ;;  %v3097_v14 = vpop.f32.mrf.mxu1 }
 0x146   : > { %v3101_v17 = vpop.f32.mrf.mxu0  ;;  %v3103_v18 = vpop.f32.mrf.mxu1 }
 0x148   : > { %v616_v21 = vpop.f32.mrf.mxu0  ;;  %v689_v22 = vpop.f32.mrf.mxu1 }
 0x149   : > { %v3107_v24 = vadd.f32 %v616_v21, %v377_v19  ;;  %v3110_v25 = vadd.f32 %v689_v22, %v3099_v15 }
 0x14a   : > { %v618_v26 = vpop.f32.mrf.mxu0  ;;  %v691_v27 = vpop.f32.mrf.mxu1 }
 0x14b   : > { %v3112_v28 = vadd.f32 %v618_v26, %v381_v23  ;;  %v3115_v29 = vadd.f32 %v691_v27, %v3105_v20 }
 0x14c   : > { %v622_v30 = vpop.f32.mrf.mxu0  ;;  %v695_v31 = vpop.f32.mrf.mxu1 }
 0x14d   : > { %v3117_v32 = vadd.f32 %v622_v30, %v377_v19  ;;  %v3120_v35 = vadd.f32 %v695_v31, %v3099_v15 }
 0x14e   : > { %v624_v44 = vpop.f32.mrf.mxu0  ;;  %v697_v53 = vpop.f32.mrf.mxu1 }
 0x14f   : > { %v3122_v62 = vadd.f32 %v624_v44, %v381_v23  ;;  %v3125_v6 = vadd.f32 %v697_v53, %v3105_v20 }
 0x150   : > { %v626_v7 = vpop.f32.mrf.mxu0  ;;  %v699_v8 = vpop.f32.mrf.mxu1 }
 0x151   : > { %v3127_v9 = vadd.f32 %v626_v7, %v377_v19  ;;  %v3130_v10 = vadd.f32 %v699_v8, %v3099_v15 }
 0x152   : > { %v628_v11 = vpop.f32.mrf.mxu0  ;;  %v701_v12 = vpop.f32.mrf.mxu1 }
 0x153   : > { %3563 = vst [vmem:[#allocation18_spill] sm:$0xff] %v3127_v9  ;;  %3564 = vst [vmem:[#allocation19_spill] sm:$0xff] %v3130_v10  ;;  %v3132_v16 = vadd.f32 %v628_v11, %v381_v23  ;;  %v3135_v21 = vadd.f32 %v701_v12, %v3105_v20  ;;  %v686_v9 = vadd.f32 %v3097_v14, %v3099_v15 }
 0x154   : > { %v632_v22 = vpop.f32.mrf.mxu0  ;;  %v705_v26 = vpop.f32.mrf.mxu1 }
 0x155   : > { %3565 = vst [vmem:[#allocation20_spill] sm:$0xff] %v3132_v16  ;;  %3566 = vst [vmem:[#allocation21_spill] sm:$0xff] %v3135_v21  ;;  %v3137_v27 = vadd.f32 %v632_v22, %v377_v19  ;;  %v3140_v30 = vadd.f32 %v705_v26, %v3099_v15 }
 0x156   : > { %v634_v31 = vpop.f32.mrf.mxu0  ;;  %v707_v44 = vpop.f32.mrf.mxu1 }
 0x157   : > { %3567 = vst [vmem:[#allocation22_spill] sm:$0xff] %v3137_v27  ;;  %3568 = vst [vmem:[#allocation23_spill] sm:$0xff] %v3140_v30  ;;  %v3142_v53 = vadd.f32 %v634_v31, %v381_v23  ;;  %v3145_v7 = vadd.f32 %v707_v44, %v3105_v20 }
 0x158   : > { %v636_v8 = vpop.f32.mrf.mxu0  ;;  %v709_v11 = vpop.f32.mrf.mxu1 }
 0x159   : > { %3569 = vst [vmem:[#allocation24_spill] sm:$0xff] %v3142_v53  ;;  %3570 = vst [vmem:[#allocation25_spill] sm:$0xff] %v3145_v7  ;;  %v3147_v0 = vadd.f32 %v636_v8, %v377_v19  ;;  %v3150_v12 = vadd.f32 %v709_v11, %v3099_v15 }
 0x15a   : > { %v638_v21 = vpop.f32.mrf.mxu0  ;;  %v711_v22 = vpop.f32.mrf.mxu1 }
 0x15b   : > { %3571 = vst [vmem:[#allocation26_spill] sm:$0xff] %v3147_v0  ;;  %3572 = vst [vmem:[#allocation27_spill] sm:$0xff] %v3150_v12  ;;  %v3152_v27 = vadd.f32 %v638_v21, %v381_v23  ;;  %v3155_v26 = vadd.f32 %v711_v22, %v3105_v20 }
 0x15c   : > { %v642_v30 = vpop.f32.mrf.mxu0  ;;  %v715_v31 = vpop.f32.mrf.mxu1 }
 0x15d   : > { %3573 = vst [vmem:[#allocation28_spill] sm:$0xff] %v3152_v27  ;;  %3574 = vst [vmem:[#allocation29_spill] sm:$0xff] %v3155_v26  ;;  %v3157_v53 = vadd.f32 %v642_v30, %v377_v19  ;;  %v3160_v44 = vadd.f32 %v715_v31, %v3099_v15 }
 0x15e   : > { %v644_v7 = vpop.f32.mrf.mxu0  ;;  %v717_v8 = vpop.f32.mrf.mxu1 }
 0x15f   : > { %3575 = vst [vmem:[#allocation30_spill] sm:$0xff] %v3157_v53  ;;  %3576 = vst [vmem:[#allocation31_spill] sm:$0xff] %v3160_v44  ;;  %v3162_v0 = vadd.f32 %v644_v7, %v381_v23  ;;  %v3165_v11 = vadd.f32 %v717_v8, %v3105_v20  ;;  %v613_v53 = vadd.f32 %v3095_v13, %v377_v19 }
 0x160   : > { %v646_v12 = vpop.f32.mrf.mxu0  ;;  %v719_v21 = vpop.f32.mrf.mxu1  ;;  %v615_v8 = vadd.f32 %v3101_v17, %v381_v23 }
 0x161   : > { %3577 = vst [vmem:[#allocation32_spill] sm:$0xff] %v3162_v0  ;;  %3578 = vst [vmem:[#allocation33_spill] sm:$0xff] %v3165_v11  ;;  %v3167_v27 = vadd.f32 %v646_v12, %v377_v19  ;;  %v3170_v22 = vadd.f32 %v719_v21, %v3099_v15 }
 0x162   : > { %v648_v26 = vpop.f32.mrf.mxu0  ;;  %v721_v30 = vpop.f32.mrf.mxu1 }
 0x163   : > { %3579 = vst [vmem:[#allocation34_spill] sm:$0xff] %v3167_v27  ;;  %3580 = vst [vmem:[#allocation35_spill] sm:$0xff] %v3170_v22  ;;  %v3173_v31 = vadd.f32 %v648_v26, %v381_v23  ;;  %v3176_v44 = vadd.f32 %v721_v30, %v3105_v20 }
 0x164   : > { %v997_v7 = vpop.f32.mrf.mxu0  ;;  %v1038_v0 = vpop.f32.mrf.mxu1 }
 0x165   : > { %3581 = vst [vmem:[#allocation36_spill] sm:$0xff] %v3176_v44  ;;  %v1045_v11 = vadd.f32 %v997_v7, %v613_v53  ;;  %v1047_v30 = vadd.f32 %v1038_v0, %v686_v9  ;;  %v688_v44 = vadd.f32 %v3103_v18, %v3105_v20 }
 0x166   : > { %v999_v10 = vpop.f32.mrf.mxu0  ;;  %v1040_v12 = vpop.f32.mrf.mxu1 }
 0x167   : > { %v1049_v27 = vmul.f32 0.5, %v1045_v11  ;;  %v1046_v16 = vadd.f32 %v999_v10, %v615_v8  ;;  %v1048_v17 = vadd.f32 %v1040_v12, %v688_v44 }
 0x168   : > { %v1001_v21 = vpop.f32.mrf.mxu0  ;;  %v1042_v22 = vpop.f32.mrf.mxu1 }
 0x169   : > { %2436 = vtanh.f32 %v1049_v27  ;;  %v1053_v13 = vmul.f32 0.5, %v1046_v16  ;;  %v1058_v23 = vmul.f32 0.5, %v1048_v17  ;;  %v3582_v21 = vmov 0  }
 0x16a   : > { %v1002_v19 = vpop.f32.mrf.mxu0  ;;  %v1043_v26 = vpop.f32.mrf.mxu1 }
 0x16b   : > { %2438 = vtanh.f32 %v1053_v13 }
 0x16c   : > { %2440 = vtanh.f32 %v1047_v30 }
 0x16d   : > { %2442 = vtanh.f32 %v1058_v23 }
 0x176   : > { %v2437_v53 = vpop.eup %2436 }
 0x177   : > { %v1051_v11 = vadd.f32 1.0, %v2437_v53 }
 0x178   : > { %v2439_v10 = vpop.eup %2438 }
 0x179   : > { %v1052_v7 = vmul.f32 0.5, %v1051_v11  ;;  %v1055_v22 = vadd.f32 1.0, %v2439_v10  ;;  %v2441_v14 = vpop.eup %2440 }
 0x17a   : > { %v2443_v0 = vpop.eup %2442 }
 0x17b   : > { %v1056_v8 = vmul.f32 0.5, %v1055_v22  ;;  %v1063_v16 = vmul.f32 %v2441_v14, %v1052_v7  ;;  %v1060_v9 = vadd.f32 1.0, %v2443_v0 }
 0x17d   : > { %v1062_v15 = vmul.f32 0.0, %v1056_v8  ;;  %v1061_v18 = vmul.f32 0.5, %v1060_v9 }
 0x17f   : > { %v3183_v27 = vadd.f32 %v1063_v16, %v1062_v15 }
 0x181   : > { %2444 = vtanh.f32 %v3183_v27 }
 0x18e   : > { %v2445_v20 = vpop.eup %2444 }
 0x18f   : > { %v1066_v44 = vmul.f32 %v2445_v20, %v1061_v18 }
 0x191   : > { %v1067_v12 = vpack.c.bf16 %v1066_v44, %v1066_v44 }
 0x193   : > { %1108 = vmatmul.mubr.bf16.vlgmr.msra.gmra.mxu0 %v1067_v12  ;;  %1149 = vmatmul.mubr.bf16.vlgmr.msra.gmra.mxu1 %v1067_v12 }
 0x194   : > { %1188 = vmatpush1.bf16.msra.mxu0 %v2953_v36  ;;  %1229 = vmatpush1.bf16.msra.mxu1 %v2955_v37 }
 0x195   : > { %1189 = vmatprep.subr.bf16.mxu0 %v2959_v38  ;;  %1230 = vmatprep.subr.bf16.mxu1 %v2961_v39 }
 0x196   : > { %1219 = vmatprep.mubr.bf16.mxu0 %v3582_v21  ;;  %1260 = vmatprep.mubr.bf16.mxu1 %v3582_v21 }
 0x198   : > { %1190 = vmatpush1.bf16.msra.mxu0 %v2963_v40  ;;  %1231 = vmatpush1.bf16.msra.mxu1 %v2967_v41 }
 0x199   : > { %1191 = vmatprep.subr.bf16.mxu0 %v2971_v42  ;;  %1232 = vmatprep.subr.bf16.mxu1 %v2973_v43 }
 0x19c   : > { %1192 = vmatpush1.bf16.msra.mxu0 %v2978_v45  ;;  %1233 = vmatpush1.bf16.msra.mxu1 %v2980_v46 }
 0x19d   : > { %1193 = vmatprep.subr.bf16.mxu0 %v2984_v47  ;;  %1234 = vmatprep.subr.bf16.mxu1 %v2988_v48 }
 0x1a0   : > { %1194 = vmatpush1.bf16.msra.mxu0 %v2990_v49  ;;  %1235 = vmatpush1.bf16.msra.mxu1 %v2992_v50 }
 0x1a1   : > { %1195 = vmatprep.subr.bf16.mxu0 %v2996_v51  ;;  %1236 = vmatprep.subr.bf16.mxu1 %v3000_v52 }
 0x1a4   : > { %1196 = vmatpush1.bf16.msra.mxu0 %v3005_v54  ;;  %1237 = vmatpush1.bf16.msra.mxu1 %v3007_v55 }
 0x1a5   : > { %1197 = vmatprep.subr.bf16.mxu0 %v3009_v56  ;;  %1238 = vmatprep.subr.bf16.mxu1 %v3011_v57 }
 0x1a8   : > { %1198 = vmatpush1.bf16.msra.mxu0 %v3017_v58  ;;  %1239 = vmatpush1.bf16.msra.mxu1 %v3021_v59 }
 0x1a9   : > { %1199 = vmatprep.subr.bf16.mxu0 %v3025_v60  ;;  %1240 = vmatprep.subr.bf16.mxu1 %v3027_v61 }
 0x1ac   : > { %1200 = vmatpush1.bf16.msra.mxu0 %v3034_v63  ;;  %1241 = vmatpush1.bf16.msra.mxu1 %v3036_v1 }
 0x1ad   : > { %1201 = vmatprep.subr.bf16.mxu0 %v3040_v2  ;;  %1242 = vmatprep.subr.bf16.mxu1 %v3042_v3 }
 0x1b0   : > { %1202 = vmatpush1.bf16.msra.mxu0 %v3046_v4  ;;  %1243 = vmatpush1.bf16.msra.mxu1 %v3048_v5 }
 0x1b1   : > { %1299 = vmatprep.subr.bf16.mxu0 %v2948_v33  ;;  %1340 = vmatprep.subr.bf16.mxu1 %v2950_v34 }
 0x253   : > { %v1109_v13 = vpop.f32.mrf.mxu0  ;;  %v1150_v19 = vpop.f32.mrf.mxu1 }
 0x254   : > { %v1157_v26 = vadd.f32 %v1109_v13, %v3107_v24  ;;  %v1159_v7 = vadd.f32 %v1150_v19, %v3110_v25 }
 0x255   : > { %v1111_v30 = vpop.f32.mrf.mxu0  ;;  %v1152_v17 = vpop.f32.mrf.mxu1 }
 0x256   : > { %v1161_v23 = vmul.f32 0.5, %v1157_v26  ;;  %v1158_v53 = vadd.f32 %v1111_v30, %v3112_v28  ;;  %v1160_v15 = vadd.f32 %v1152_v17, %v3115_v29 }
 0x257   : > { %v1113_v11 = vpop.f32.mrf.mxu0  ;;  %v1154_v10 = vpop.f32.mrf.mxu1 }
 0x258   : > { %2446 = vtanh.f32 %v1161_v23  ;;  %v1165_v22 = vmul.f32 0.5, %v1158_v53  ;;  %v1170_v16 = vmul.f32 0.5, %v1160_v15 }
 0x259   : > { %v1114_v8 = vpop.f32.mrf.mxu0  ;;  %v1155_v14 = vpop.f32.mrf.mxu1 }
 0x25a   : > { %2448 = vtanh.f32 %v1165_v22 }
 0x25b   : > { %2450 = vtanh.f32 %v1159_v7 }
 0x25c   : > { %2452 = vtanh.f32 %v1170_v16 }
 0x265   : > { %v2447_v0 = vpop.eup %2446 }
 0x266   : > { %v1163_v24 = vadd.f32 1.0, %v2447_v0 }
 0x267   : > { %v2449_v9 = vpop.eup %2448 }
 0x268   : > { %v1164_v18 = vmul.f32 0.5, %v1163_v24  ;;  %v1167_v20 = vadd.f32 1.0, %v2449_v9  ;;  %v2451_v28 = vpop.eup %2450 }
 0x269   : > { %v2453_v19 = vpop.eup %2452 }
 0x26a   : > { %v1168_v44 = vmul.f32 0.5, %v1167_v20  ;;  %v1175_v12 = vmul.f32 %v2451_v28, %v1164_v18  ;;  %v1172_v26 = vadd.f32 1.0, %v2453_v19 }
 0x26c   : > { %v1174_v13 = vmul.f32 %v1168_v44, %v3183_v27  ;;  %v1173_v30 = vmul.f32 0.5, %v1172_v26 }
 0x26e   : > { %v3225_v25 = vadd.f32 %v1175_v12, %v1174_v13 }
 0x270   : > { %2454 = vtanh.f32 %v3225_v25 }
 0x27d   : > { %v2455_v29 = vpop.eup %2454 }
 0x27e   : > { %v1178_v17 = vmul.f32 %v2455_v29, %v1173_v30 }
 0x280   : > { %v1179_v23 = vpack.c.bf16 %v1178_v17, %v1178_v17 }
 0x282   : > { %1220 = vmatmul.mubr.bf16.vlgmr.msra.gmra.mxu0 %v1179_v23  ;;  %1261 = vmatmul.mubr.bf16.vlgmr.msra.gmra.mxu1 %v1179_v23 }
 0x283   : > { %1300 = vmatpush1.bf16.msra.mxu0 %v2953_v36  ;;  %1341 = vmatpush1.bf16.msra.mxu1 %v2955_v37 }
 0x284   : > { %1301 = vmatprep.subr.bf16.mxu0 %v2959_v38  ;;  %1342 = vmatprep.subr.bf16.mxu1 %v2961_v39 }
 0x285   : > { %1331 = vmatprep.mubr.bf16.mxu0 %v3582_v21  ;;  %1372 = vmatprep.mubr.bf16.mxu1 %v3582_v21 }
 0x287   : > { %1302 = vmatpush1.bf16.msra.mxu0 %v2963_v40  ;;  %1343 = vmatpush1.bf16.msra.mxu1 %v2967_v41 }
 0x288   : > { %1303 = vmatprep.subr.bf16.mxu0 %v2971_v42  ;;  %1344 = vmatprep.subr.bf16.mxu1 %v2973_v43 }
 0x28b   : > { %1304 = vmatpush1.bf16.msra.mxu0 %v2978_v45  ;;  %1345 = vmatpush1.bf16.msra.mxu1 %v2980_v46 }
 0x28c   : > { %1305 = vmatprep.subr.bf16.mxu0 %v2984_v47  ;;  %1346 = vmatprep.subr.bf16.mxu1 %v2988_v48 }
 0x28f   : > { %1306 = vmatpush1.bf16.msra.mxu0 %v2990_v49  ;;  %1347 = vmatpush1.bf16.msra.mxu1 %v2992_v50 }
 0x290   : > { %1307 = vmatprep.subr.bf16.mxu0 %v2996_v51  ;;  %1348 = vmatprep.subr.bf16.mxu1 %v3000_v52 }
 0x293   : > { %1308 = vmatpush1.bf16.msra.mxu0 %v3005_v54  ;;  %1349 = vmatpush1.bf16.msra.mxu1 %v3007_v55 }
 0x294   : > { %1309 = vmatprep.subr.bf16.mxu0 %v3009_v56  ;;  %1350 = vmatprep.subr.bf16.mxu1 %v3011_v57 }
 0x297   : > { %1310 = vmatpush1.bf16.msra.mxu0 %v3017_v58  ;;  %1351 = vmatpush1.bf16.msra.mxu1 %v3021_v59 }
 0x298   : > { %1311 = vmatprep.subr.bf16.mxu0 %v3025_v60  ;;  %1352 = vmatprep.subr.bf16.mxu1 %v3027_v61 }
 0x29b   : > { %1312 = vmatpush1.bf16.msra.mxu0 %v3034_v63  ;;  %1353 = vmatpush1.bf16.msra.mxu1 %v3036_v1 }
 0x29c   : > { %1313 = vmatprep.subr.bf16.mxu0 %v3040_v2  ;;  %1354 = vmatprep.subr.bf16.mxu1 %v3042_v3 }
 0x29f   : > { %1314 = vmatpush1.bf16.msra.mxu0 %v3046_v4  ;;  %1355 = vmatpush1.bf16.msra.mxu1 %v3048_v5 }
 0x2a0   : > { %1411 = vmatprep.subr.bf16.mxu0 %v2948_v33  ;;  %1452 = vmatprep.subr.bf16.mxu1 %v2950_v34 }
 0x342   : > { %v1221_v27 = vpop.f32.mrf.mxu0  ;;  %v1262_v53 = vpop.f32.mrf.mxu1 }
 0x343   : > { %v1269_v11 = vadd.f32 %v1221_v27, %v3117_v32  ;;  %v1271_v16 = vadd.f32 %v1262_v53, %v3120_v35 }
 0x344   : > { %v1223_v10 = vpop.f32.mrf.mxu0  ;;  %v1264_v7 = vpop.f32.mrf.mxu1 }
 0x345   : > { %v1273_v22 = vmul.f32 0.5, %v1269_v11  ;;  %v1270_v8 = vadd.f32 %v1223_v10, %v3122_v62  ;;  %v1272_v18 = vadd.f32 %v1264_v7, %v3125_v6  ;;  %v3583_v10 = vld [vmem:[#allocation18_spill] sm:$0xff] }
 0x346   : > { %v1225_v14 = vpop.f32.mrf.mxu0  ;;  %v1266_v15 = vpop.f32.mrf.mxu1 }
 0x347   : > { %2456 = vtanh.f32 %v1273_v22  ;;  %v1277_v0 = vmul.f32 0.5, %v1270_v8  ;;  %v1282_v20 = vmul.f32 0.5, %v1272_v18  ;;  %v3584_v15 = vld [vmem:[#allocation20_spill] sm:$0xff] }
 0x348   : > { %v1226_v24 = vpop.f32.mrf.mxu0  ;;  %v1267_v9 = vpop.f32.mrf.mxu1 }
 0x349   : > { %2458 = vtanh.f32 %v1277_v0  ;;  %v3585_v9 = vld [vmem:[#allocation19_spill] sm:$0xff] }
 0x34a   : > { %2460 = vtanh.f32 %v1271_v16 }
 0x34b   : > { %2462 = vtanh.f32 %v1282_v20 }
 0x354   : > { %v2457_v28 = vpop.eup %2456 }
 0x355   : > { %v1275_v32 = vadd.f32 1.0, %v2457_v28 }
 0x356   : > { %v2459_v44 = vpop.eup %2458 }
 0x357   : > { %v1276_v12 = vmul.f32 0.5, %v1275_v32  ;;  %v1279_v13 = vadd.f32 1.0, %v2459_v44  ;;  %v2461_v62 = vpop.eup %2460 }
 0x358   : > { %v2463_v29 = vpop.eup %2462 }
 0x359   : > { %v1280_v19 = vmul.f32 0.5, %v1279_v13  ;;  %v1287_v26 = vmul.f32 %v2461_v62, %v1276_v12  ;;  %v1284_v17 = vadd.f32 1.0, %v2463_v29 }
 0x35b   : > { %v1286_v30 = vmul.f32 %v1280_v19, %v3225_v25  ;;  %v1285_v23 = vmul.f32 0.5, %v1284_v17 }
 0x35d   : > { %v3267_v35 = vadd.f32 %v1287_v26, %v1286_v30 }
 0x35f   : > { %2464 = vtanh.f32 %v3267_v35 }
 0x36c   : > { %v2465_v6 = vpop.eup %2464 }
 0x36d   : > { %v1290_v27 = vmul.f32 %v2465_v6, %v1285_v23 }
 0x36f   : > { %v1291_v53 = vpack.c.bf16 %v1290_v27, %v1290_v27 }
 0x371   : > { %1332 = vmatmul.mubr.bf16.vlgmr.msra.gmra.mxu0 %v1291_v53  ;;  %1373 = vmatmul.mubr.bf16.vlgmr.msra.gmra.mxu1 %v1291_v53 }
 0x372   : > { %1412 = vmatpush1.bf16.msra.mxu0 %v2953_v36  ;;  %1453 = vmatpush1.bf16.msra.mxu1 %v2955_v37 }
 0x373   : > { %1413 = vmatprep.subr.bf16.mxu0 %v2959_v38  ;;  %1454 = vmatprep.subr.bf16.mxu1 %v2961_v39 }
 0x374   : > { %1443 = vmatprep.mubr.bf16.mxu0 %v3582_v21  ;;  %1484 = vmatprep.mubr.bf16.mxu1 %v3582_v21 }
 0x376   : > { %1414 = vmatpush1.bf16.msra.mxu0 %v2963_v40  ;;  %1455 = vmatpush1.bf16.msra.mxu1 %v2967_v41 }
 0x377   : > { %1415 = vmatprep.subr.bf16.mxu0 %v2971_v42  ;;  %1456 = vmatprep.subr.bf16.mxu1 %v2973_v43 }
 0x37a   : > { %1416 = vmatpush1.bf16.msra.mxu0 %v2978_v45  ;;  %1457 = vmatpush1.bf16.msra.mxu1 %v2980_v46 }
 0x37b   : > { %1417 = vmatprep.subr.bf16.mxu0 %v2984_v47  ;;  %1458 = vmatprep.subr.bf16.mxu1 %v2988_v48 }
 0x37e   : > { %1418 = vmatpush1.bf16.msra.mxu0 %v2990_v49  ;;  %1459 = vmatpush1.bf16.msra.mxu1 %v2992_v50 }
 0x37f   : > { %1419 = vmatprep.subr.bf16.mxu0 %v2996_v51  ;;  %1460 = vmatprep.subr.bf16.mxu1 %v3000_v52 }
 0x382   : > { %1420 = vmatpush1.bf16.msra.mxu0 %v3005_v54  ;;  %1461 = vmatpush1.bf16.msra.mxu1 %v3007_v55 }
 0x383   : > { %1421 = vmatprep.subr.bf16.mxu0 %v3009_v56  ;;  %1462 = vmatprep.subr.bf16.mxu1 %v3011_v57 }
 0x386   : > { %1422 = vmatpush1.bf16.msra.mxu0 %v3017_v58  ;;  %1463 = vmatpush1.bf16.msra.mxu1 %v3021_v59 }
 0x387   : > { %1423 = vmatprep.subr.bf16.mxu0 %v3025_v60  ;;  %1464 = vmatprep.subr.bf16.mxu1 %v3027_v61 }
 0x38a   : > { %1424 = vmatpush1.bf16.msra.mxu0 %v3034_v63  ;;  %1465 = vmatpush1.bf16.msra.mxu1 %v3036_v1 }
 0x38b   : > { %1425 = vmatprep.subr.bf16.mxu0 %v3040_v2  ;;  %1466 = vmatprep.subr.bf16.mxu1 %v3042_v3 }
 0x38e   : > { %1426 = vmatpush1.bf16.msra.mxu0 %v3046_v4  ;;  %1467 = vmatpush1.bf16.msra.mxu1 %v3048_v5 }
 0x38f   : > { %1523 = vmatprep.subr.bf16.mxu0 %v2948_v33  ;;  %1564 = vmatprep.subr.bf16.mxu1 %v2950_v34  ;;  %v3586_v33 = vld [vmem:[#allocation21_spill] sm:$0xff] }
 0x431   : > { %v1333_v25 = vpop.f32.mrf.mxu0  ;;  %v1374_v11 = vpop.f32.mrf.mxu1 }
 0x432   : > { %v1381_v7 = vadd.f32 %v1333_v25, %v3583_v10  ;;  %v1383_v18 = vadd.f32 %v1374_v11, %v3585_v9 }
 0x433   : > { %v1335_v22 = vpop.f32.mrf.mxu0  ;;  %v1376_v8 = vpop.f32.mrf.mxu1 }
 0x434   : > { %v1385_v14 = vmul.f32 0.5, %v1381_v7  ;;  %v1382_v16 = vadd.f32 %v1335_v22, %v3584_v15  ;;  %v1384_v34 = vadd.f32 %v1376_v8, %v3586_v33 }
 0x435   : > { %v1337_v0 = vpop.f32.mrf.mxu0  ;;  %v1378_v24 = vpop.f32.mrf.mxu1 }
 0x436   : > { %2466 = vtanh.f32 %v1385_v14  ;;  %v1389_v20 = vmul.f32 0.5, %v1382_v16  ;;  %v1394_v44 = vmul.f32 0.5, %v1384_v34 }
 0x437   : > { %v1338_v28 = vpop.f32.mrf.mxu0  ;;  %v1379_v32 = vpop.f32.mrf.mxu1 }
 0x438   : > { %2468 = vtanh.f32 %v1389_v20 }
 0x439   : > { %2470 = vtanh.f32 %v1383_v18 }
 0x43a   : > { %2472 = vtanh.f32 %v1394_v44 }
 0x443   : > { %v2467_v12 = vpop.eup %2466 }
 0x444   : > { %v1387_v13 = vadd.f32 1.0, %v2467_v12 }
 0x445   : > { %v2469_v62 = vpop.eup %2468 }
 0x446   : > { %v1388_v19 = vmul.f32 0.5, %v1387_v13  ;;  %v1391_v26 = vadd.f32 1.0, %v2469_v62  ;;  %v2471_v30 = vpop.eup %2470  ;;  %v3358_v13 = vld [vmem:[#allocation10 + $0xe0] ss:$16 sps:$4 sm:$0xff]   ;;  %v3361_v62 = vld [vmem:[#allocation10 + $0xe8] ss:$16 sps:$4 sm:$0xff]  }
 0x447   : > { %v2473_v27 = vpop.eup %2472 }
 0x448   : > { %v1392_v29 = vmul.f32 0.5, %v1391_v26  ;;  %v1399_v17 = vmul.f32 %v2471_v30, %v1388_v19  ;;  %v1396_v53 = vadd.f32 1.0, %v2473_v27  ;;  %v3364_v19 = vld [vmem:[#allocation10 + $0xc4] ss:$16 sps:$4 sm:$0xff]   ;;  %v3367_v26 = vld [vmem:[#allocation10 + $0xcc] ss:$16 sps:$4 sm:$0xff]  }
 0x449   : > { %v3372_v30 = vld [vmem:[#allocation10 + $0xc0] ss:$16 sps:$4 sm:$0xff]   ;;  %v3387_v27 = vld [vmem:[#allocation10 + $0xa8] ss:$16 sps:$4 sm:$0xff]  }
 0x44a   : > { %v1398_v23 = vmul.f32 %v1392_v29, %v3267_v35  ;;  %v1397_v25 = vmul.f32 0.5, %v1396_v53  ;;  %v3375_v29 = vld [vmem:[#allocation10 + $0xc8] ss:$16 sps:$4 sm:$0xff]   ;;  %v3390_v53 = vld [vmem:[#allocation10 + $0x84] ss:$16 sps:$4 sm:$0xff]  }
 0x44c   : > { %v3309_v6 = vadd.f32 %v1399_v17, %v1398_v23  ;;  %v3378_v17 = vld [vmem:[#allocation10 + $0xa4] ss:$16 sps:$4 sm:$0xff]   ;;  %v3381_v23 = vld [vmem:[#allocation10 + $0xac] ss:$16 sps:$4 sm:$0xff]  }
 0x44e   : > { %2474 = vtanh.f32 %v3309_v6 }
 0x45b   : > { %v2475_v11 = vpop.eup %2474 }
 0x45c   : > { %v1402_v10 = vmul.f32 %v2475_v11, %v1397_v25  ;;  %v3393_v25 = vld [vmem:[#allocation10 + $0x8c] ss:$16 sps:$4 sm:$0xff]   ;;  %v3396_v11 = vld [vmem:[#allocation10 + $0x80] ss:$16 sps:$4 sm:$0xff]  }
 0x45e   : > { %v1403_v7 = vpack.c.bf16 %v1402_v10, %v1402_v10  ;;  %v3399_v10 = vld [vmem:[#allocation10 + $0x88] ss:$16 sps:$4 sm:$0xff]  }
 0x460   : > { %1444 = vmatmul.mubr.bf16.vlgmr.msra.gmra.mxu0 %v1403_v7  ;;  %1485 = vmatmul.mubr.bf16.vlgmr.msra.gmra.mxu1 %v1403_v7  ;;  %v3402_v7 = vld [vmem:[#allocation10 + $0x64] ss:$16 sps:$4 sm:$0xff]  }
 0x461   : > { %1524 = vmatpush1.bf16.msra.mxu0 %v2953_v36  ;;  %1565 = vmatpush1.bf16.msra.mxu1 %v2955_v37  ;;  %v3344_v36 = vld [vmem:[#allocation10 + $0xe4] ss:$16 sps:$4 sm:$0xff]   ;;  %v3347_v37 = vld [vmem:[#allocation10 + $0xec] ss:$16 sps:$4 sm:$0xff]  }
 0x462   : > { %1525 = vmatprep.subr.bf16.mxu0 %v2959_v38  ;;  %1566 = vmatprep.subr.bf16.mxu1 %v2961_v39 }
 0x463   : > { %1555 = vmatprep.mubr.bf16.mxu0 %v3582_v21  ;;  %1596 = vmatprep.mubr.bf16.mxu1 %v3582_v21 }
 0x465   : > { %1526 = vmatpush1.bf16.msra.mxu0 %v2963_v40  ;;  %1567 = vmatpush1.bf16.msra.mxu1 %v2967_v41  ;;  %v3587_v40 = vld [vmem:[#allocation22_spill] sm:$0xff] }
 0x466   : > { %1527 = vmatprep.subr.bf16.mxu0 %v2971_v42  ;;  %1568 = vmatprep.subr.bf16.mxu1 %v2973_v43 }
 0x469   : > { %1528 = vmatpush1.bf16.msra.mxu0 %v2978_v45  ;;  %1569 = vmatpush1.bf16.msra.mxu1 %v2980_v46  ;;  %v3588_v46 = vld [vmem:[#allocation24_spill] sm:$0xff] }
 0x46a   : > { %1529 = vmatprep.subr.bf16.mxu0 %v2984_v47  ;;  %1570 = vmatprep.subr.bf16.mxu1 %v2988_v48 }
 0x46d   : > { %1530 = vmatpush1.bf16.msra.mxu0 %v2990_v49  ;;  %1571 = vmatpush1.bf16.msra.mxu1 %v2992_v50  ;;  %v3589_v50 = vld [vmem:[#allocation23_spill] sm:$0xff] }
 0x46e   : > { %1531 = vmatprep.subr.bf16.mxu0 %v2996_v51  ;;  %1572 = vmatprep.subr.bf16.mxu1 %v3000_v52 }
 0x471   : > { %1532 = vmatpush1.bf16.msra.mxu0 %v3005_v54  ;;  %1573 = vmatpush1.bf16.msra.mxu1 %v3007_v55 }
 0x472   : > { %1533 = vmatprep.subr.bf16.mxu0 %v3009_v56  ;;  %1574 = vmatprep.subr.bf16.mxu1 %v3011_v57  ;;  %v3590_v56 = vld [vmem:[#allocation25_spill] sm:$0xff] }
 0x475   : > { %1534 = vmatpush1.bf16.msra.mxu0 %v3017_v58  ;;  %1575 = vmatpush1.bf16.msra.mxu1 %v3021_v59 }
 0x476   : > { %1535 = vmatprep.subr.bf16.mxu0 %v3025_v60  ;;  %1576 = vmatprep.subr.bf16.mxu1 %v3027_v61 }
 0x479   : > { %1536 = vmatpush1.bf16.msra.mxu0 %v3034_v63  ;;  %1577 = vmatpush1.bf16.msra.mxu1 %v3036_v1 }
 0x47a   : > { %1537 = vmatprep.subr.bf16.mxu0 %v3040_v2  ;;  %1578 = vmatprep.subr.bf16.mxu1 %v3042_v3 }
 0x47d   : > { %1538 = vmatpush1.bf16.msra.mxu0 %v3046_v4  ;;  %1579 = vmatpush1.bf16.msra.mxu1 %v3048_v5 }
 0x47e   : > { %1635 = vmatprep.subr.bf16.mxu0 %v3344_v36  ;;  %1676 = vmatprep.subr.bf16.mxu1 %v3347_v37 }
 0x520   : > { %v1445_v38 = vpop.f32.mrf.mxu0  ;;  %v1486_v39 = vpop.f32.mrf.mxu1 }
 0x521   : > { %v1493_v41 = vadd.f32 %v1445_v38, %v3587_v40  ;;  %v1495_v51 = vadd.f32 %v1486_v39, %v3589_v50  ;;  %v3405_v38 = vld [vmem:[#allocation10 + $0x6c] ss:$16 sps:$4 sm:$0xff]   ;;  %v3408_v39 = vld [vmem:[#allocation10 + $0x60] ss:$16 sps:$4 sm:$0xff]   ;;  %v3411_v40 = vld [vmem:[#allocation10 + $0x68] ss:$16 sps:$4 sm:$0xff]  }
 0x522   : > { %v1447_v42 = vpop.f32.mrf.mxu0  ;;  %v1488_v43 = vpop.f32.mrf.mxu1 }
 0x523   : > { %v1497_v45 = vmul.f32 0.5, %v1493_v41  ;;  %v1494_v47 = vadd.f32 %v1447_v42, %v3588_v46  ;;  %v1496_v57 = vadd.f32 %v1488_v43, %v3590_v56  ;;  %v3414_v41 = vld [vmem:[#allocation10 + $0x44] ss:$16 sps:$4 sm:$0xff]   ;;  %v3417_v42 = vld [vmem:[#allocation10 + $0x4c] ss:$16 sps:$4 sm:$0xff]  }
 0x524   : > { %v1449_v48 = vpop.f32.mrf.mxu0  ;;  %v1490_v49 = vpop.f32.mrf.mxu1 }
 0x525   : > { %2476 = vtanh.f32 %v1497_v45  ;;  %v1501_v52 = vmul.f32 0.5, %v1494_v47  ;;  %v1506_v35 = vmul.f32 0.5, %v1496_v57 }
 0x526   : > { %v1450_v54 = vpop.f32.mrf.mxu0  ;;  %v1491_v55 = vpop.f32.mrf.mxu1 }
 0x527   : > { %2478 = vtanh.f32 %v1501_v52 }
 0x528   : > { %2480 = vtanh.f32 %v1495_v51 }
 0x529   : > { %2482 = vtanh.f32 %v1506_v35 }
 0x532   : > { %v2477_v22 = vpop.eup %2476 }
 0x533   : > { %v1499_v8 = vadd.f32 1.0, %v2477_v22 }
 0x534   : > { %v2479_v14 = vpop.eup %2478 }
 0x535   : > { %v1500_v15 = vmul.f32 0.5, %v1499_v8  ;;  %v1503_v16 = vadd.f32 1.0, %v2479_v14  ;;  %v2481_v0 = vpop.eup %2480 }
 0x536   : > { %v2483_v28 = vpop.eup %2482 }
 0x537   : > { %v1504_v24 = vmul.f32 0.5, %v1503_v16  ;;  %v1511_v9 = vmul.f32 %v2481_v0, %v1500_v15  ;;  %v1508_v32 = vadd.f32 1.0, %v2483_v28  ;;  %v2540_v28 = vld [vmem:[#allocation10 + $0x24] ss:$16 sps:$4 sm:$0xff]  }
 0x539   : > { %v1510_v18 = vmul.f32 %v1504_v24, %v3309_v6  ;;  %v1509_v33 = vmul.f32 0.5, %v1508_v32  ;;  %v3384_v6 = vld [vmem:[#allocation10 + $0xa0] ss:$16 sps:$4 sm:$0xff]   ;;  %v2541_v32 = vld [vmem:[#allocation10 + $0x2c] ss:$16 sps:$4 sm:$0xff]  }
 0x53b   : > { %v3355_v20 = vadd.f32 %v1511_v9, %v1510_v18 }
 0x53d   : > { %2484 = vtanh.f32 %v3355_v20 }
 0x54a   : > { %v2485_v34 = vpop.eup %2484 }
 0x54b   : > { %v1514_v44 = vmul.f32 %v2485_v34, %v1509_v33  ;;  %v2542_v33 = vld [vmem:[#allocation10 + $0x20] ss:$16 sps:$4 sm:$0xff]   ;;  %v2543_v34 = vld [vmem:[#allocation10 + $0x28] ss:$16 sps:$4 sm:$0xff]  }
 0x54d   : > { %v1515_v12 = vpack.c.bf16 %v1514_v44, %v1514_v44  ;;  %v2544_v44 = vld [vmem:[#allocation10 + $0x4] ss:$16 sps:$4 sm:$0xff]  }
 0x54f   : > { %1556 = vmatmul.mubr.bf16.vlgmr.msra.gmra.mxu0 %v1515_v12  ;;  %1597 = vmatmul.mubr.bf16.vlgmr.msra.gmra.mxu1 %v1515_v12  ;;  %v2545_v12 = vld [vmem:[#allocation10 + $0xc] ss:$16 sps:$4 sm:$0xff]  }
 0x550   : > { %1636 = vmatpush1.bf16.msra.mxu0 %v3358_v13  ;;  %1677 = vmatpush1.bf16.msra.mxu1 %v3361_v62 }
 0x551   : > { %1637 = vmatprep.subr.bf16.mxu0 %v3364_v19  ;;  %1678 = vmatprep.subr.bf16.mxu1 %v3367_v26 }
 0x552   : > { %1667 = vmatprep.mubr.bf16.mxu0 %v3582_v21  ;;  %1708 = vmatprep.mubr.bf16.mxu1 %v3582_v21 }
 0x554   : > { %1638 = vmatpush1.bf16.msra.mxu0 %v3372_v30  ;;  %1679 = vmatpush1.bf16.msra.mxu1 %v3375_v29 }
 0x555   : > { %1639 = vmatprep.subr.bf16.mxu0 %v3378_v17  ;;  %1680 = vmatprep.subr.bf16.mxu1 %v3381_v23 }
 0x558   : > { %1640 = vmatpush1.bf16.msra.mxu0 %v3384_v6  ;;  %1681 = vmatpush1.bf16.msra.mxu1 %v3387_v27 }
 0x559   : > { %1641 = vmatprep.subr.bf16.mxu0 %v3390_v53  ;;  %1682 = vmatprep.subr.bf16.mxu1 %v3393_v25 }
 0x55c   : > { %1642 = vmatpush1.bf16.msra.mxu0 %v3396_v11  ;;  %1683 = vmatpush1.bf16.msra.mxu1 %v3399_v10 }
 0x55d   : > { %1643 = vmatprep.subr.bf16.mxu0 %v3402_v7  ;;  %1684 = vmatprep.subr.bf16.mxu1 %v3405_v38 }
 0x560   : > { %1644 = vmatpush1.bf16.msra.mxu0 %v3408_v39  ;;  %1685 = vmatpush1.bf16.msra.mxu1 %v3411_v40 }
 0x561   : > { %1645 = vmatprep.subr.bf16.mxu0 %v3414_v41  ;;  %1686 = vmatprep.subr.bf16.mxu1 %v3417_v42 }
 0x564   : > { %1646 = vmatpush1.bf16.msra.mxu0 %v3017_v58  ;;  %1687 = vmatpush1.bf16.msra.mxu1 %v3021_v59 }
 0x565   : > { %1647 = vmatprep.subr.bf16.mxu0 %v3025_v60  ;;  %1688 = vmatprep.subr.bf16.mxu1 %v3027_v61  ;;  %v3591_v60 = vld [vmem:[#allocation26_spill] sm:$0xff] }
 0x568   : > { %1648 = vmatpush1.bf16.msra.mxu0 %v3034_v63  ;;  %1689 = vmatpush1.bf16.msra.mxu1 %v3036_v1  ;;  %v3592_v1 = vld [vmem:[#allocation28_spill] sm:$0xff] }
 0x569   : > { %1649 = vmatprep.subr.bf16.mxu0 %v3040_v2  ;;  %1690 = vmatprep.subr.bf16.mxu1 %v3042_v3  ;;  %v3593_v3 = vld [vmem:[#allocation27_spill] sm:$0xff] }
 0x56c   : > { %1650 = vmatpush1.bf16.msra.mxu0 %v3046_v4  ;;  %1691 = vmatpush1.bf16.msra.mxu1 %v3048_v5 }
 0x56d   : > { %1747 = vmatprep.subr.bf16.mxu0 %v3344_v36  ;;  %1788 = vmatprep.subr.bf16.mxu1 %v3347_v37  ;;  %v3594_v36 = vld [vmem:[#allocation29_spill] sm:$0xff] }
 0x60f   : > { %v1557_v58 = vpop.f32.mrf.mxu0  ;;  %v1598_v59 = vpop.f32.mrf.mxu1 }
 0x610   : > { %v1605_v61 = vadd.f32 %v1557_v58, %v3591_v60  ;;  %v1607_v4 = vadd.f32 %v1598_v59, %v3593_v3 }
 0x611   : > { %v1559_v43 = vpop.f32.mrf.mxu0  ;;  %v1600_v63 = vpop.f32.mrf.mxu1 }
 0x612   : > { %v1609_v45 = vmul.f32 0.5, %v1605_v61  ;;  %v1606_v46 = vadd.f32 %v1559_v43, %v3592_v1  ;;  %v1608_v37 = vadd.f32 %v1600_v63, %v3594_v36 }
 0x613   : > { %v1561_v2 = vpop.f32.mrf.mxu0  ;;  %v1602_v47 = vpop.f32.mrf.mxu1 }
 0x614   : > { %2486 = vtanh.f32 %v1609_v45  ;;  %v1613_v48 = vmul.f32 0.5, %v1606_v46  ;;  %v1618_v50 = vmul.f32 0.5, %v1608_v37  ;;  %v2428_v37 = vld [vmem:[#allocation11 + $0x38] sm:$0xff]  }
 0x615   : > { %v1562_v5 = vpop.f32.mrf.mxu0  ;;  %v1603_v49 = vpop.f32.mrf.mxu1 }
 0x616   : > { %2488 = vtanh.f32 %v1613_v48 }
 0x617   : > { %2490 = vtanh.f32 %v1607_v4 }
 0x618   : > { %2492 = vtanh.f32 %v1618_v50  ;;  %v2753_v50 = vmov 0.0  }
 0x621   : > { %v2487_v51 = vpop.eup %2486 }
 0x622   : > { %v1611_v52 = vadd.f32 1.0, %v2487_v51  ;;  %v2429_v51 = vld [vmem:[#allocation11 + $0x30] sm:$0xff]  }
 0x623   : > { %v2489_v54 = vpop.eup %2488 }
 0x624   : > { %v1612_v55 = vmul.f32 0.5, %v1611_v52  ;;  %v1615_v56 = vadd.f32 1.0, %v2489_v54  ;;  %v2491_v57 = vpop.eup %2490  ;;  %v2430_v52 = vld [vmem:[#allocation11 + $0x28] sm:$0xff]   ;;  %v2431_v54 = vld [vmem:[#allocation11 + $0x20] sm:$0xff]  }
 0x625   : > { %v2493_v15 = vpop.eup %2492 }
 0x626   : > { %v1616_v35 = vmul.f32 0.5, %v1615_v56  ;;  %v1623_v22 = vmul.f32 %v2491_v57, %v1612_v55  ;;  %v1620_v16 = vadd.f32 1.0, %v2493_v15  ;;  %v2432_v55 = vld [vmem:[#allocation11 + $0x18] sm:$0xff]   ;;  %v2433_v56 = vld [vmem:[#allocation11 + $0x10] sm:$0xff]   ;;  %v2434_v57 = vld [vmem:[#allocation11 + $0x8] sm:$0xff]  }
 0x628   : > { %v1622_v8 = vmul.f32 %v1616_v35, %v3355_v20  ;;  %v1621_v0 = vmul.f32 0.5, %v1620_v16  ;;  %v2539_v20 = vld [vmem:[#allocation10 + $0x48] ss:$16 sps:$4 sm:$0xff]   ;;  %v2435_v35 = vld [vmem:[#allocation11] sm:$0xff]  }
 0x62a   : > { %v3437_v14 = vadd.f32 %v1623_v22, %v1622_v8 }
 0x62c   : > { %2494 = vtanh.f32 %v3437_v14 }
 0x639   : > { %v2495_v24 = vpop.eup %2494 }
 0x63a   : > { %v1626_v9 = vmul.f32 %v2495_v24, %v1621_v0 }
 0x63c   : > { %v1627_v18 = vpack.c.bf16 %v1626_v9, %v1626_v9 }
 0x63e   : > { %1668 = vmatmul.mubr.bf16.vlgmr.msra.gmra.mxu0 %v1627_v18  ;;  %1709 = vmatmul.mubr.bf16.vlgmr.msra.gmra.mxu1 %v1627_v18 }
 0x63f   : > { %1748 = vmatpush1.bf16.msra.mxu0 %v3358_v13  ;;  %1789 = vmatpush1.bf16.msra.mxu1 %v3361_v62  ;;  %v2546_v13 = vld [vmem:[#allocation10] ss:$16 sps:$4 sm:$0xff]   ;;  %v2547_v62 = vld [vmem:[#allocation10 + $0x8] ss:$16 sps:$4 sm:$0xff]  }
 0x640   : > { %1749 = vmatprep.subr.bf16.mxu0 %v3364_v19  ;;  %1790 = vmatprep.subr.bf16.mxu1 %v3367_v26 }
 0x641   : > { %1779 = vmatprep.mubr.bf16.mxu0 %v3582_v21  ;;  %1820 = vmatprep.mubr.bf16.mxu1 %v3582_v21  ;;  %v2538_v21 = vld [vmem:[#allocation10 + $0x40] ss:$16 sps:$4 sm:$0xff]  }
 0x643   : > { %1750 = vmatpush1.bf16.msra.mxu0 %v3372_v30  ;;  %1791 = vmatpush1.bf16.msra.mxu1 %v3375_v29  ;;  %v3595_v30 = vld [vmem:[#allocation30_spill] sm:$0xff] }
 0x644   : > { %1751 = vmatprep.subr.bf16.mxu0 %v3378_v17  ;;  %1792 = vmatprep.subr.bf16.mxu1 %v3381_v23 }
 0x647   : > { %1752 = vmatpush1.bf16.msra.mxu0 %v3384_v6  ;;  %1793 = vmatpush1.bf16.msra.mxu1 %v3387_v27  ;;  %v3596_v27 = vld [vmem:[#allocation32_spill] sm:$0xff] }
 0x648   : > { %1753 = vmatprep.subr.bf16.mxu0 %v3390_v53  ;;  %1794 = vmatprep.subr.bf16.mxu1 %v3393_v25 }
 0x64b   : > { %1754 = vmatpush1.bf16.msra.mxu0 %v3396_v11  ;;  %1795 = vmatpush1.bf16.msra.mxu1 %v3399_v10  ;;  %v3597_v10 = vld [vmem:[#allocation31_spill] sm:$0xff] }
 0x64c   : > { %1755 = vmatprep.subr.bf16.mxu0 %v3402_v7  ;;  %1796 = vmatprep.subr.bf16.mxu1 %v3405_v38 }
 0x64f   : > { %1756 = vmatpush1.bf16.msra.mxu0 %v3408_v39  ;;  %1797 = vmatpush1.bf16.msra.mxu1 %v3411_v40 }
 0x650   : > { %1757 = vmatprep.subr.bf16.mxu0 %v3414_v41  ;;  %1798 = vmatprep.subr.bf16.mxu1 %v3417_v42  ;;  %v3598_v41 = vld [vmem:[#allocation33_spill] sm:$0xff] }
 0x653   : > { %1758 = vmatpush1.bf16.msra.mxu0 %v2538_v21  ;;  %1799 = vmatpush1.bf16.msra.mxu1 %v2539_v20  ;;  %v3600_v20 = vld [vmem:[#allocation35_spill] sm:$0xff] }
 0x654   : > { %1759 = vmatprep.subr.bf16.mxu0 %v2540_v28  ;;  %1800 = vmatprep.subr.bf16.mxu1 %v2541_v32 }
 0x657   : > { %1760 = vmatpush1.bf16.msra.mxu0 %v2542_v33  ;;  %1801 = vmatpush1.bf16.msra.mxu1 %v2543_v34 }
 0x658   : > { %1761 = vmatprep.subr.bf16.mxu0 %v2544_v44  ;;  %1802 = vmatprep.subr.bf16.mxu1 %v2545_v12  ;;  %v3601_v44 = vld [vmem:[#allocation36_spill] sm:$0xff] }
 0x65b   : > { %1762 = vmatpush1.bf16.msra.mxu0 %v2546_v13  ;;  %1803 = vmatpush1.bf16.msra.mxu1 %v2547_v62 }
 0x65c   : > { %2208 = vmatprep.subr.bf16.mxu0 %v2753_v50 }
 0x6fe   : > { %v1669_v19 = vpop.f32.mrf.mxu0  ;;  %v1710_v26 = vpop.f32.mrf.mxu1 }
 0x6ff   : > { %v1717_v29 = vadd.f32 %v1669_v19, %v3595_v30  ;;  %v1719_v7 = vadd.f32 %v1710_v26, %v3597_v10 }
 0x700   : > { %v1671_v17 = vpop.f32.mrf.mxu0  ;;  %v1712_v23 = vpop.f32.mrf.mxu1 }
 0x701   : > { %v1721_v6 = vmul.f32 0.5, %v1717_v29  ;;  %v1718_v53 = vadd.f32 %v1671_v17, %v3596_v27  ;;  %v1720_v42 = vadd.f32 %v1712_v23, %v3598_v41 }
 0x702   : > { %v1673_v25 = vpop.f32.mrf.mxu0  ;;  %v1714_v11 = vpop.f32.mrf.mxu1 }
 0x703   : > { %2496 = vtanh.f32 %v1721_v6  ;;  %v1725_v38 = vmul.f32 0.5, %v1718_v53  ;;  %v1730_v58 = vmul.f32 0.5, %v1720_v42 }
 0x704   : > { %v1674_v39 = vpop.f32.mrf.mxu0  ;;  %v1715_v40 = vpop.f32.mrf.mxu1 }
 0x705   : > { %2498 = vtanh.f32 %v1725_v38  ;;  %v2185_v40 = vld [vmem:[%s3536_s5] ss:$0 sm:$0xff] }
 0x706   : > { %2500 = vtanh.f32 %v1719_v7 }
 0x707   : > { %2502 = vtanh.f32 %v1730_v58 }
 0x710   : > { %v2497_v59 = vpop.eup %2496 }
 0x711   : > { %v1723_v60 = vadd.f32 1.0, %v2497_v59 }
 0x712   : > { %v2499_v61 = vpop.eup %2498 }
 0x713   : > { %v1724_v43 = vmul.f32 0.5, %v1723_v60  ;;  %v1727_v63 = vadd.f32 1.0, %v2499_v61  ;;  %v2501_v45 = vpop.eup %2500 }
 0x714   : > { %v2503_v3 = vpop.eup %2502 }
 0x715   : > { %v1728_v1 = vmul.f32 0.5, %v1727_v63  ;;  %v1735_v46 = vmul.f32 %v2501_v45, %v1724_v43  ;;  %v1732_v4 = vadd.f32 1.0, %v2503_v3 }
 0x717   : > { %v1734_v2 = vmul.f32 %v1728_v1, %v3437_v14  ;;  %v1733_v48 = vmul.f32 0.5, %v1732_v4  ;;  %v3599_v14 = vld [vmem:[#allocation34_spill] sm:$0xff] }
 0x719   : > { %v3467_v47 = vadd.f32 %v1735_v46, %v1734_v2 }
 0x71b   : > { %2504 = vtanh.f32 %v3467_v47 }
 0x728   : > { %v2505_v5 = vpop.eup %2504 }
 0x729   : > { %v1738_v49 = vmul.f32 %v2505_v5, %v1733_v48 }
 0x72b   : > { %v1739_v36 = vpack.c.bf16 %v1738_v49, %v1738_v49 }
 0x72d   : > { %1780 = vmatmul.mubr.bf16.vlgmr.msra.gmra.mxu0 %v1739_v36  ;;  %1821 = vmatmul.mubr.bf16.vlgmr.msra.gmra.mxu1 %v1739_v36 }
 0x72e   : > { %2209 = vmatpush3.bf16.msra.mxu0 %v2428_v37  ;;  %2224 = vmatprep.mubr.msk.bf16.mxu0 %vm2754_vm0, %v2753_v50 }
 0x72f   : > { %2210 = vmatprep.subr.bf16.mxu0 %v2753_v50 }
 0x732   : > { %2211 = vmatpush3.bf16.msra.mxu0 %v2429_v51 }
 0x733   : > { %2212 = vmatprep.subr.bf16.mxu0 %v2753_v50 }
 0x736   : > { %2213 = vmatpush3.bf16.msra.mxu0 %v2430_v52 }
 0x737   : > { %2214 = vmatprep.subr.bf16.mxu0 %v2753_v50 }
 0x73a   : > { %2215 = vmatpush3.bf16.msra.mxu0 %v2431_v54 }
 0x73b   : > { %2216 = vmatprep.subr.bf16.mxu0 %v2753_v50 }
 0x73e   : > { %2217 = vmatpush3.bf16.msra.mxu0 %v2432_v55 }
 0x73f   : > { %2218 = vmatprep.subr.bf16.mxu0 %v2753_v50 }
 0x742   : > { %2219 = vmatpush3.bf16.msra.mxu0 %v2433_v56 }
 0x743   : > { %2220 = vmatprep.subr.bf16.mxu0 %v2753_v50 }
 0x746   : > { %2221 = vmatpush3.bf16.msra.mxu0 %v2434_v57 }
 0x747   : > { %2222 = vmatprep.subr.bf16.mxu0 %v2753_v50 }
 0x74a   : > { %2223 = vmatpush3.bf16.msra.mxu0 %v2435_v35 }
 0x7ed   : > { %v1781_v22 = vpop.f32.mrf.mxu0  ;;  %v1822_v8 = vpop.f32.mrf.mxu1 }
 0x7ee   : > { %v1829_v15 = vadd.f32 %v1781_v22, %v3599_v14  ;;  %v1831_v28 = vadd.f32 %v1822_v8, %v3600_v20 }
 0x7ef   : > { %v1783_v16 = vpop.f32.mrf.mxu0  ;;  %v1824_v0 = vpop.f32.mrf.mxu1 }
 0x7f0   : > { %v1833_v24 = vmul.f32 0.5, %v1829_v15  ;;  %v1830_v9 = vadd.f32 %v1783_v16, %v3173_v31  ;;  %v1832_v12 = vadd.f32 %v1824_v0, %v3601_v44 }
 0x7f1   : > { %v1785_v18 = vpop.f32.mrf.mxu0  ;;  %v1826_v21 = vpop.f32.mrf.mxu1 }
 0x7f2   : > { %2506 = vtanh.f32 %v1833_v24  ;;  %v1837_v32 = vmul.f32 0.5, %v1830_v9  ;;  %v1842_v13 = vmul.f32 0.5, %v1832_v12 }
 0x7f3   : > { %v1786_v33 = vpop.f32.mrf.mxu0  ;;  %v1827_v34 = vpop.f32.mrf.mxu1 }
 0x7f4   : > { %2508 = vtanh.f32 %v1837_v32 }
 0x7f5   : > { %2510 = vtanh.f32 %v1831_v28 }
 0x7f6   : > { %2512 = vtanh.f32 %v1842_v13 }
 0x7ff   : > { %v2507_v62 = vpop.eup %2506 }
 0x800   : > { %v1835_v19 = vadd.f32 1.0, %v2507_v62 }
 0x801   : > { %v2509_v26 = vpop.eup %2508 }
 0x802   : > { %v1836_v30 = vmul.f32 0.5, %v1835_v19  ;;  %v1839_v29 = vadd.f32 1.0, %v2509_v26  ;;  %v2511_v31 = vpop.eup %2510 }
 0x803   : > { %v2513_v53 = vpop.eup %2512 }
 0x804   : > { %v1840_v17 = vmul.f32 0.5, %v1839_v29  ;;  %v1847_v23 = vmul.f32 %v2511_v31, %v1836_v30  ;;  %v1844_v25 = vadd.f32 1.0, %v2513_v53 }
 0x806   : > { %v1846_v6 = vmul.f32 %v1840_v17, %v3467_v47  ;;  %v1845_v11 = vmul.f32 0.5, %v1844_v25 }
 0x808   : > { %v1848_v27 = vadd.f32 %v1847_v23, %v1846_v6 }
 0x80a   : > { %2514 = vtanh.f32 %v1848_v27 }
 0x817   : > { %v2515_v10 = vpop.eup %2514 }
 0x818   : > { %v1850_v7 = vmul.f32 %v2515_v10, %v1845_v11 }
 0x81a   : > { %v1851_v38 = vpack.c.bf16 %v1850_v7, %v1850_v7 }
 0x81c   : > { %1852 = vst [vmem:[#allocation3] sm:$0xf] %v1851_v38 }
 0x823   : > { %v1857_v39 = vld [vmem:[#allocation3] sm:$0xf] }
 0x824   : > { %2225 = vmatmul.mubr.bf16.vlgmr.msra.gmra.mxu0 %v1857_v39 }
 0x8e4   : > { %v1963_v41 = vpop.f32.mrf.mxu0 }
 0x8e5   : > { %v1964_v42 = vadd.f32 %v2185_v40, %v1963_v41 }
 0x8e6   : > { %v2226_v58 = vpop.f32.mrf.mxu0 }
 0x8e7   : > { %1969 = vst [vmem:[%s329_s30] sm:$0xff] %v1964_v42 }
 0x8e8   : > { %v1966_v59 = vpop.f32.mrf.mxu0 }
 0x8e9   : > { %2667 = shalt.err (!%p2664_p13)
}
 0x8ea   : > { %s2668_s1 = scalar_lea.hbm %s3483_s16, 128  ;;  %s2672_s7 = scalar_lea.hbm %s3537_s6, 256 }
 0x8eb   : > { %p2669_p1 = scmp.ne.s32.totalorder %s3483_s16, %s2668_s1  ;;  %p2673_p12 = scmp.lt.s32.totalorder %s3483_s16, %s3537_s6 }
 0x8ec   : > { %p2674_p5 = scmp.lt.s32.totalorder %s2672_s7, %s2668_s1 }
 0x8ed   : > { %p2670_p4 = pnand %p2669_p1, %p2894_p0 }
 0x8ee   : > { %p2675_p3 = por %p2674_p5, %p2673_p12 }
 0x8ef   : > { %p2671_p8 = pneg %p2670_p4 }
 0x8f1   : > { %p2676_p10 = pnand %p2675_p3, %p2671_p8 }
 0x8f3   : > { %2679 = shalt.err (!%p2676_p10)
}
 0x8f4   : > { %2242 = dma.vmem_to_hbm [thread:$0]  (%p2894_p0), %s3485_s28, 128, %s3483_s16, %s1971_s11   ;;  %v2227_v60 = vpop.f32.mrf.mxu0 }
 0x8f5 PF: > { %s1996_s14 = sand.u32 1, %s2722_s21   ;;  %p3602_p2 = scmp.ne.s32.totalorder %s3551_s8, 0 }
 0x8f6   : > { %p3603_p11 = scmp.ge.s32.totalorder %s2742_s26, 2  ;;  %s1997_s30 = scalar_lea.sflag [#allocation7], %s1996_s14 }
 0x8f8   : > { %p2259_p7 = pnand %p3603_p11, %p3602_p2 }
 0x8fa   : > { %p2260_p6 = pneg %p2259_p7 }
 0x8fc   : > { %2717 = dma.done.wait (%p2260_p6), %s1997_s30, 128  }
 0x8fd   : > { %2719 = vsyncadd (%p2260_p6), %s1997_s30, 4294967168  ;;  %s24_s26 = sadd.s32 1, %s2742_s26   ;;  %s3604_s21 = smov %s2726_s22 }
 0x8fe   : > { %p21_p9 = scmp.ge.s32.totalorder %s24_s26, 4   ;;  %s3605_s22 = smov %s2730_s23 }
 0x8ff   : > { %s3606_s23 = smov %s2906_s13  ;;  %s3607_s24 = smov %s2738_s25 }
 0x900   : > { %s3608_s25 = smov %s3610_s20  ;;  %23 = sbr.rel (!%p21_p9) target bundleno = 11 (0xb), region = 117 }
 0x905   :  { %2002 = vsyncpa [#allocation6], 1 }
 0x906   :  { %2004 = vsyncpa [#allocation6 + $0x1], 1 }
 0x907   :  { %2005 = vsyncpa [#allocation9], 1 }
 0x908   :  { %2006 = vsyncpa [#allocation12], 1 }
 0x909   :  { %2007 = vsyncpa [#allocation7], 1 }
 0x90a   :  { %2009 = vsyncpa [#allocation7 + $0x1], 1 }

// kernel: tpu_custom_call.1
= control target key start
LH: loop header
LB: loop body
LE: loop exit
PB: predicated region body
PF: predicated region fallthrough
CT: control target
= control target key end

     0   :  { %s3531_s0 = inlined_call_operand.hbm [shape: bf16[2,64,128], index: 0, kind: input, shape index: {}]   ;;  %s3532_s1 = inlined_call_operand.hbm [shape: bf16[128,512], index: 1, kind: input, shape index: {}]   ;;  %s3533_s2 = inlined_call_operand.hbm [shape: bf16[128,512], index: 2, kind: input, shape index: {}]   ;;  %s3534_s3 = inlined_call_operand.vmem [shape: f32[1,512], index: 3, kind: input, shape index: {}]   ;;  %s3535_s4 = inlined_call_operand.hbm [shape: bf16[128,128], index: 4, kind: input, shape index: {}]   ;;  %s3536_s5 = inlined_call_operand.vmem [shape: f32[1,128], index: 5, kind: input, shape index: {}]   ;;  %s3537_s6 = inlined_call_operand.hbm [shape: f32[16,128], index: 6, kind: output, shape index: {}]  }
   0x1   :  { %3546 = sst [smem:[#allocation37_spill]] %s3532_s1 }
   0x2   :  { %3547 = sst [smem:[#allocation38_spill]] %s3533_s2 }
   0x3   :  { %11 = vsyncpa [#allocation6], 0 }
   0x4   :  { %13 = vsyncpa [#allocation6 + $0x1], 0 }
   0x5   :  { %14 = vsyncpa [#allocation9], 0 }
   0x6   :  { %15 = vsyncpa [#allocation12], 0 }
   0x7   :  { %16 = vsyncpa [#allocation7], 0 }
   0x8   :  { %18 = vsyncpa [#allocation7 + $0x1], 0  ;;  %s2791_s21 = smov 0   ;;  %s2793_s22 = smov 0  }
   0x9   :  { %s2795_s23 = smov 0   ;;  %s2797_s24 = smov 0  }
   0xa   :  { %s2799_s25 = smov 0   ;;  %s2801_s26 = smov 0  }
   0xb LB: > { %s2101_s27 = sadd.s32 4294967295, %s2742_s26   ;;  %s2102_s28 = sadd.s32 4294967294, %s2742_s26   ;;  %s2742_s26 = sphi %s2801_s26, %s24_s26   ;;  %s2738_s25 = sphi %s2799_s25, %s3608_s25   ;;  %s2734_s24 = sphi %s2797_s24, %s3607_s24   ;;  %s2730_s23 = sphi %s2795_s23, %s3606_s23   ;;  %s2726_s22 = sphi %s2793_s22, %s3605_s22   ;;  %s2722_s21 = sphi %s2791_s21, %s3604_s21  }
   0xc   : > { %p58_p0 = scmp.ne.s32.totalorder %s2726_s22, %s2722_s21  ;;  %p2825_p1 = scmp.eq.s32.totalorder %s2101_s27, 0 }
   0xd   : > { %p2829_p2 = scmp.eq.s32.totalorder %s2101_s27, 1  ;;  %p193_p3 = scmp.eq.s32.totalorder %s2102_s28, 1 }
   0xe   : > { %s3548_s29 = scalar_select %p2825_p1, 1, 0 }
   0xf   : > { %p2835_p4 = por %p2825_p1, %p58_p0  ;;  %p2103_p5 = scmp.ge.s32.totalorder %s2742_s26, 1 }
  0x10   : > { %p2840_p6 = por %p193_p3, %p58_p0  ;;  %p200_p7 = scmp.lt.s32.totalorder %s2742_s26, 3 }
  0x11   : > { %s3550_s7 = scalar_select %p2835_p4, 1, 0 }
  0x12   : > { %s3551_s8 = scalar_select %p2840_p6, 1, 0 }
  0x13   : > { %p2845_p8 = pnand %p2103_p5, %p200_p7  ;;  %s2744_s10 = smov [#allocation8]  }
  0x14   : > { %s212_s11 = sshll.u32 %s2744_s10, 4  ;;  %s2745_s13 = smov [#allocation10]   ;;  %s213_s11 = int_to_ptr.vmem [resolvable:$true] %s212_s11 }
  0x15   : > { %s3552_s9 = scalar_select %p2845_p8, 1, 0 }
  0x16   : > { %p2244_p9 = pneg %p2845_p8  ;;  %s225_s14 = sshll.u32 %s2745_s13, 4  ;;  %s226_s14 = int_to_ptr.vmem [resolvable:$true] %s225_s14 }
  0x17   : > { %s2746_s15 = smov [#allocation11]   ;;  %s2559_s17 = scalar_lea.vmem %s213_s11, 4096 }
  0x18   : > { %p2854_p11 = pnand %p2244_p9, %p2825_p1  ;;  %s241_s16 = sshll.u32 %s2746_s15, 4  ;;  %s242_s16 = int_to_ptr.vmem [resolvable:$true] %s241_s16 }
  0x19   : > { %p2560_p13 = scmp.ne.s32.totalorder %s213_s11, %s2559_s17  ;;  %p2567_p5 = scmp.lt.s32.totalorder %s213_s11, %s213_s11 }
  0x1a   : > { %p2550_p12 = pneg %p2854_p11  ;;  %p2568_p7 = scmp.lt.s32.totalorder %s2559_s17, %s2559_s17 }
  0x1c   : > { %p2562_p0 = pnand %p2560_p13, %p2550_p12  ;;  %p2569_p9 = por %p2568_p7, %p2567_p5 }
  0x1e   : > { %p2563_p3 = pneg %p2562_p0 }
  0x20   : > { %p2570_p10 = pnand %p2569_p9, %p2563_p3 }
  0x22   : > { %2573 = shalt.err (!%p2570_p10)
}
  0x23   : > { %s2747_s18 = smov 256   ;;  %s2748_s19 = smov 16  }
  0x24   : > { %s3554_s1 = sld [smem:[#allocation37_spill]]  ;;  %s2585_s28 = scalar_lea.vmem %s226_s14, 4096 }
  0x25   : > { %p2586_p6 = scmp.ne.s32.totalorder %s226_s14, %s2585_s28  ;;  %p2593_p1 = scmp.lt.s32.totalorder %s226_s14, %s226_s14 }
  0x26   : > { %p2594_p4 = scmp.lt.s32.totalorder %s2585_s28, %s2585_s28 }
  0x27   : > { %p2588_p13 = pnand %p2586_p6, %p2550_p12 }
  0x28   : > { %p2595_p5 = por %p2594_p4, %p2593_p1 }
  0x29   : > { %p2589_p0 = pneg %p2588_p13 }
  0x2a   : > { %2247 = dma.hbm_to_vmem [thread:$0]  (!%p2854_p11), %s3554_s1, 4096, %s213_s11, [#allocation9], %s2747_s18, %s2747_s18, %s2748_s19  }
  0x2b   : > { %p2596_p3 = pnand %p2595_p5, %p2589_p0 }
  0x2d   : > { %2599 = shalt.err (!%p2596_p3)
}
  0x2e   : > { %s3555_s2 = sld [smem:[#allocation38_spill]]  ;;  %s2611_s11 = scalar_lea.vmem %s242_s16, 1024 }
  0x2f   : > { %p2612_p10 = scmp.ne.s32.totalorder %s242_s16, %s2611_s11  ;;  %p2619_p9 = scmp.lt.s32.totalorder %s242_s16, %s242_s16 }
  0x30   : > { %p2620_p13 = scmp.lt.s32.totalorder %s2611_s11, %s2611_s11 }
  0x31   : > { %p2614_p7 = pnand %p2612_p10, %p2550_p12 }
  0x32   : > { %p2621_p8 = por %p2620_p13, %p2619_p9 }
  0x33   : > { %p2615_p6 = pneg %p2614_p7 }
  0x34   : > { %2250 = dma.hbm_to_vmem [thread:$0]  (!%p2854_p11), %s3555_s2, 4096, %s226_s14, [#allocation9], %s2747_s18, %s2747_s18, %s2748_s19  }
  0x35   : > { %p2622_p1 = pnand %p2621_p8, %p2615_p6 }
  0x37   : > { %2625 = shalt.err (!%p2622_p1)
}
  0x38   : > { %s3542_s15 = smov 64   ;;  %s3543_s14 = smov 4  }
  0x39   : > { %2253 = dma.hbm_to_vmem [thread:$0]  (!%p2854_p11), %s3535_s4, 1024, %s242_s16, [#allocation12], %s3542_s15, %s3542_s15, %s3543_s14  }
  0x3a   : > { %s45_s19 = sadd.s32 1, %s2730_s23  ;;  %s36_s20 = sadd.s32 1, %s2738_s25 }
  0x3b   : > { %p52_p4 = scmp.ne.s32.totalorder %s2730_s23, %s2726_s22  ;;  %p38_p8 = scmp.ge.s32.totalorder %s36_s20, 2 }
  0x3c   : > { %p53_p12 = scmp.eq.s32.totalorder %s2742_s26, 0  ;;  %p2265_p5 = scmp.lt.s32.totalorder %s2742_s26, 2 }
  0x3d   : > { %p2894_p0 = por %p2829_p2, %p52_p4  ;;  %s3610_s20 = smov (%p38_p8, %s36_s20), 0 }
  0x3e   : > { %p54_p3 = por %p53_p12, %p52_p4  ;;  %s258_s12 = sand.u32 1, %s2730_s23  }
  0x3f   : > { %s40_s28 = ssub.s32 %s2738_s25, %s3610_s20  ;;  %s2108_s16 = sshll.u32 %s258_s12, 5 }
  0x40   : > { %p43_p10 = scmp.eq.s32.totalorder %s40_s28, 0  ;;  %s2198_s10 = sshll.u32 %s2738_s25, 9 }
  0x41   : > { %s270_s30 = scalar_lea.hbm %s3531_s0, %s2198_s10  ;;  %s262_s18 = scalar_lea.vmem [#allocation5], %s2108_s16 }
  0x42   : > { %s2906_s13 = scalar_select %p43_p10, %s2730_s23, %s45_s19  }
  0x43   : > { %s271_s15 = sshll.u32 %s262_s18, 4  ;;  %p2913_p2 = pnand %p2265_p5, %p54_p3  ;;  %s272_s15 = int_to_ptr.vmem [resolvable:$true] %s271_s15 }
  0x44   : > { %s259_s1 = scalar_lea.sflag [#allocation6], %s258_s12  ;;  %s2639_s28 = scalar_lea.vmem %s272_s15, 512 }
  0x45   : > { %p2628_p11 = pneg %p2913_p2  ;;  %p2640_p7 = scmp.ne.s32.totalorder %s272_s15, %s2639_s28 }
  0x46   : > { %s2751_s19 = smov [#allocation5]  }
  0x47   : > { %p2642_p6 = pnand %p2640_p7, %p2628_p11  ;;  %s2644_s2 = sshll.u32 %s2751_s19, 4  ;;  %s2645_s2 = int_to_ptr.vmem [resolvable:$false] %s2644_s2 }
  0x48   : > { %s2646_s10 = scalar_lea.vmem %s2645_s2, 1024  ;;  %p2647_p13 = scmp.lt.s32.totalorder %s272_s15, %s2645_s2 }
  0x49   : > { %p2643_p9 = pneg %p2642_p6  ;;  %p2648_p1 = scmp.lt.s32.totalorder %s2646_s10, %s2639_s28 }
  0x4b   : > { %p2649_p4 = por %p2648_p1, %p2647_p13 }
  0x4d   : > { %p2650_p8 = pnand %p2649_p4, %p2643_p9 }
  0x4f   : > { %2653 = shalt.err (!%p2650_p8)
}
  0x50   : > { %s3558_s16 = smov 4   ;;  %s3559_s11 = smov 64  }
  0x51   : > { %2257 = dma.hbm_to_vmem [thread:$0]  (!%p2913_p2), %s270_s30, 512, %s272_s15, %s259_s1, %s3559_s11, %s3559_s11, %s3558_s16  }
  0x52   : > { %p3560_p12 = scmp.ne.s32.totalorder %s3552_s9, 0 }
  0x54   : > { %283 = sbr.rel (%p3560_p12) target bundleno = 2293 (0x8f5), region = 44 }
  0x59   : > { %s2927_s12 = sand.u32 1, %s2726_s22   ;;  %p3561_p5 = scmp.ne.s32.totalorder %s3550_s7, 0 }
  0x5a   : > { %s2112_s2 = sshll.u32 %s2927_s12, 5  ;;  %s286_s17 = scalar_lea.sflag [#allocation6], %s2927_s12 }
  0x5b   : > { %s2931_s18 = scalar_lea.vmem [#allocation5], %s2112_s2 }
  0x5c   : > { %2705 = dma.done.wait (%p3561_p5), %s286_s17, 512  }
  0x5d   : > { %2707 = vsyncadd (%p3561_p5), %s286_s17, 4294966784  ;;  %p3562_p3 = scmp.ne.s32.totalorder %s3548_s29, 0 }
  0x5f   : > { %2709 = dma.done.wait (%p3562_p3), [#allocation9], 8192  }
  0x60   : > { %2711 = vsyncadd (%p3562_p3), [#allocation9], 4294959104 }
  0x61   : > { %2713 = dma.done.wait (%p3562_p3), [#allocation12], 1024  }
  0x62   : > { %2715 = vsyncadd (%p3562_p3), [#allocation12], 4294966272  ;;  %v3544_v0 = vmov 0   ;;  %v2328_v1 = vld [vmem:[#allocation8 + $0xe4] ss:$16 sps:$4 sm:$0xff]   ;;  %v2389_v44 = vld [vmem:[%s2931_s18 + $0x8] sm:$0xff]  }
  0x63   : > { %610 = vmatprep.mubr.bf16.mxu0 %v3544_v0  ;;  %760 = vst [vmem:[#allocation3] sm:$0xf] %v3544_v0  ;;  %683 = vmatprep.mubr.bf16.mxu1 %v3544_v0  ;;  %v2330_v2 = vld [vmem:[#allocation8 + $0xec] ss:$16 sps:$4 sm:$0xff]   ;;  %v2332_v3 = vld [vmem:[#allocation8 + $0xe0] ss:$16 sps:$4 sm:$0xff]  }
  0x64   : > { %578 = vmatprep.subr.bf16.mxu0 %v2328_v1  ;;  %v2333_v4 = vld [vmem:[#allocation8 + $0xe8] ss:$16 sps:$4 sm:$0xff]   ;;  %651 = vmatprep.subr.bf16.mxu1 %v2330_v2  ;;  %v2334_v5 = vld [vmem:[#allocation8 + $0xc4] ss:$16 sps:$4 sm:$0xff]   ;;  %v2336_v6 = vld [vmem:[#allocation8 + $0xcc] ss:$16 sps:$4 sm:$0xff]  }
  0x65   : > { %579 = vmatpush1.bf16.msra.mxu0 %v2332_v3  ;;  %652 = vmatpush1.bf16.msra.mxu1 %v2333_v4  ;;  %v2338_v7 = vld [vmem:[#allocation8 + $0xc0] ss:$16 sps:$4 sm:$0xff]   ;;  %v2339_v8 = vld [vmem:[#allocation8 + $0xc8] ss:$16 sps:$4 sm:$0xff]   ;;  %v2340_v9 = vld [vmem:[#allocation8 + $0xa4] ss:$16 sps:$4 sm:$0xff]  }
  0x66   : > { %580 = vmatprep.subr.bf16.mxu0 %v2334_v5  ;;  %653 = vmatprep.subr.bf16.mxu1 %v2336_v6  ;;  %v2342_v10 = vld [vmem:[#allocation8 + $0xac] ss:$16 sps:$4 sm:$0xff]   ;;  %v2344_v11 = vld [vmem:[#allocation8 + $0xa0] ss:$16 sps:$4 sm:$0xff]   ;;  %v2345_v12 = vld [vmem:[#allocation8 + $0xa8] ss:$16 sps:$4 sm:$0xff]  }
  0x67   : > { %v2346_v13 = vld [vmem:[#allocation8 + $0x84] ss:$16 sps:$4 sm:$0xff]   ;;  %v2348_v14 = vld [vmem:[#allocation8 + $0x8c] ss:$16 sps:$4 sm:$0xff]   ;;  %v2350_v15 = vld [vmem:[#allocation8 + $0x80] ss:$16 sps:$4 sm:$0xff]  }
  0x68   : > { %v2351_v16 = vld [vmem:[#allocation8 + $0x88] ss:$16 sps:$4 sm:$0xff]   ;;  %v2352_v17 = vld [vmem:[#allocation8 + $0x64] ss:$16 sps:$4 sm:$0xff]   ;;  %v2354_v18 = vld [vmem:[#allocation8 + $0x6c] ss:$16 sps:$4 sm:$0xff]  }
  0x69   : > { %581 = vmatpush1.bf16.msra.mxu0 %v2338_v7  ;;  %654 = vmatpush1.bf16.msra.mxu1 %v2339_v8  ;;  %v2356_v19 = vld [vmem:[#allocation8 + $0x60] ss:$16 sps:$4 sm:$0xff]   ;;  %v2357_v20 = vld [vmem:[#allocation8 + $0x68] ss:$16 sps:$4 sm:$0xff]   ;;  %v2358_v21 = vld [vmem:[#allocation8 + $0x44] ss:$16 sps:$4 sm:$0xff]   ;;  %v374_v7 = vlaneseq }
  0x6a   : > { %582 = vmatprep.subr.bf16.mxu0 %v2340_v9  ;;  %655 = vmatprep.subr.bf16.mxu1 %v2342_v10  ;;  %v2360_v22 = vld [vmem:[#allocation8 + $0x4c] ss:$16 sps:$4 sm:$0xff]   ;;  %v2362_v23 = vld [vmem:[#allocation8 + $0x40] ss:$16 sps:$4 sm:$0xff]   ;;  %v2363_v24 = vld [vmem:[#allocation8 + $0x48] ss:$16 sps:$4 sm:$0xff]  }
  0x6b   : > { %v2364_v25 = vld [vmem:[#allocation8 + $0x24] ss:$16 sps:$4 sm:$0xff]   ;;  %v2366_v26 = vld [vmem:[#allocation8 + $0x2c] ss:$16 sps:$4 sm:$0xff]   ;;  %v2368_v27 = vld [vmem:[#allocation8 + $0x20] ss:$16 sps:$4 sm:$0xff]  }
  0x6c   : > { %v2369_v28 = vld [vmem:[#allocation8 + $0x28] ss:$16 sps:$4 sm:$0xff]   ;;  %v2370_v29 = vld [vmem:[#allocation8 + $0x4] ss:$16 sps:$4 sm:$0xff]   ;;  %v2372_v30 = vld [vmem:[#allocation8 + $0xc] ss:$16 sps:$4 sm:$0xff]  }
  0x6d   : > { %583 = vmatpush1.bf16.msra.mxu0 %v2344_v11  ;;  %656 = vmatpush1.bf16.msra.mxu1 %v2345_v12  ;;  %v2374_v31 = vld [vmem:[#allocation8] ss:$16 sps:$4 sm:$0xff]   ;;  %v2375_v32 = vld [vmem:[#allocation8 + $0x8] ss:$16 sps:$4 sm:$0xff]   ;;  %v2948_v33 = vld [vmem:[#allocation10 + $0xe4] ss:$16 sps:$4 sm:$0xff]  }
  0x6e   : > { %584 = vmatprep.subr.bf16.mxu0 %v2346_v13  ;;  %657 = vmatprep.subr.bf16.mxu1 %v2348_v14  ;;  %v2950_v34 = vld [vmem:[#allocation10 + $0xec] ss:$16 sps:$4 sm:$0xff]   ;;  %v2376_v35 = vld [vmem:[%s2931_s18] sm:$0xff]   ;;  %v2955_v37 = vld [vmem:[#allocation10 + $0xe8] ss:$16 sps:$4 sm:$0xff]   ;;  %v375_v8 = vshrl.u32 %v374_v7, 7 }
  0x6f   : > { %v2953_v36 = vld [vmem:[#allocation10 + $0xe0] ss:$16 sps:$4 sm:$0xff]   ;;  %v2959_v38 = vld [vmem:[#allocation10 + $0xc4] ss:$16 sps:$4 sm:$0xff]   ;;  %v2961_v39 = vld [vmem:[#allocation10 + $0xcc] ss:$16 sps:$4 sm:$0xff]  }
  0x70   : > { %v2963_v40 = vld [vmem:[#allocation10 + $0xc0] ss:$16 sps:$4 sm:$0xff]   ;;  %v2967_v41 = vld [vmem:[#allocation10 + $0xc8] ss:$16 sps:$4 sm:$0xff]   ;;  %v2971_v42 = vld [vmem:[#allocation10 + $0xa4] ss:$16 sps:$4 sm:$0xff]  }
  0x71   : > { %585 = vmatpush1.bf16.msra.mxu0 %v2350_v15  ;;  %658 = vmatpush1.bf16.msra.mxu1 %v2351_v16  ;;  %v2973_v43 = vld [vmem:[#allocation10 + $0xac] ss:$16 sps:$4 sm:$0xff]   ;;  %v2978_v45 = vld [vmem:[#allocation10 + $0xa0] ss:$16 sps:$4 sm:$0xff]   ;;  %v2980_v46 = vld [vmem:[#allocation10 + $0xa8] ss:$16 sps:$4 sm:$0xff]  }
  0x72   : > { %586 = vmatprep.subr.bf16.mxu0 %v2352_v17  ;;  %659 = vmatprep.subr.bf16.mxu1 %v2354_v18  ;;  %v2984_v47 = vld [vmem:[#allocation10 + $0x84] ss:$16 sps:$4 sm:$0xff]   ;;  %v2988_v48 = vld [vmem:[#allocation10 + $0x8c] ss:$16 sps:$4 sm:$0xff]   ;;  %v2990_v49 = vld [vmem:[#allocation10 + $0x80] ss:$16 sps:$4 sm:$0xff]  }
  0x73   : > { %v2992_v50 = vld [vmem:[#allocation10 + $0x88] ss:$16 sps:$4 sm:$0xff]   ;;  %v2996_v51 = vld [vmem:[#allocation10 + $0x64] ss:$16 sps:$4 sm:$0xff]   ;;  %v3000_v52 = vld [vmem:[#allocation10 + $0x6c] ss:$16 sps:$4 sm:$0xff]  }
  0x74   : > { %v2402_v53 = vld [vmem:[%s2931_s18 + $0x10] sm:$0xff]   ;;  %v3007_v55 = vld [vmem:[#allocation10 + $0x68] ss:$16 sps:$4 sm:$0xff]   ;;  %v3011_v57 = vld [vmem:[#allocation10 + $0x4c] ss:$16 sps:$4 sm:$0xff]   ;;  %v384_v9 = vsub.s32 2, %v375_v8 }
  0x75   : > { %587 = vmatpush1.bf16.msra.mxu0 %v2356_v19  ;;  %660 = vmatpush1.bf16.msra.mxu1 %v2357_v20  ;;  %v3005_v54 = vld [vmem:[#allocation10 + $0x60] ss:$16 sps:$4 sm:$0xff]   ;;  %v3009_v56 = vld [vmem:[#allocation10 + $0x44] ss:$16 sps:$4 sm:$0xff]   ;;  %v3021_v59 = vld [vmem:[#allocation10 + $0x48] ss:$16 sps:$4 sm:$0xff]  }
  0x76   : > { %588 = vmatprep.subr.bf16.mxu0 %v2358_v21  ;;  %661 = vmatprep.subr.bf16.mxu1 %v2360_v22  ;;  %v3017_v58 = vld [vmem:[#allocation10 + $0x40] ss:$16 sps:$4 sm:$0xff]   ;;  %v3025_v60 = vld [vmem:[#allocation10 + $0x24] ss:$16 sps:$4 sm:$0xff]   ;;  %v3027_v61 = vld [vmem:[#allocation10 + $0x2c] ss:$16 sps:$4 sm:$0xff]  }
  0x77   : > { %v2415_v62 = vld [vmem:[%s2931_s18 + $0x18] sm:$0xff]   ;;  %v3034_v63 = vld [vmem:[#allocation10 + $0x20] ss:$16 sps:$4 sm:$0xff]   ;;  %v3040_v2 = vld [vmem:[#allocation10 + $0x4] ss:$16 sps:$4 sm:$0xff]   ;;  %v376_v10 = vsub.s32 0, %v375_v8 }
  0x78   : > { %v3036_v1 = vld [vmem:[#allocation10 + $0x28] ss:$16 sps:$4 sm:$0xff]   ;;  %v3042_v3 = vld [vmem:[#allocation10 + $0xc] ss:$16 sps:$4 sm:$0xff]   ;;  %v3046_v4 = vld [vmem:[#allocation10] ss:$16 sps:$4 sm:$0xff]  }
  0x79   : > { %589 = vmatpush1.bf16.msra.mxu0 %v2362_v23  ;;  %662 = vmatpush1.bf16.msra.mxu1 %v2363_v24  ;;  %v3048_v5 = vld [vmem:[#allocation10 + $0x8] ss:$16 sps:$4 sm:$0xff]   ;;  %v762_v6 = vld [vmem:[#allocation3] sm:$0xf]  ;;  %v388_v11 = vsub.s32 3, %v375_v8  ;;  %v380_v16 = vsub.s32 1, %v375_v8 }
  0x7a   : > { %590 = vmatprep.subr.bf16.mxu0 %v2364_v25  ;;  %663 = vmatprep.subr.bf16.mxu1 %v2366_v26  ;;  %v372_v12 = vld [vmem:[%s3534_s3] sm:$0xf]  ;;  %vm2754_vm0 = vmmov 0   ;;  %s2116_s7 = sshll.u32 %s2927_s12, 3  ;;  %s2195_s14 = sshll.u32 %s2734_s24, 7 }
  0x7b   : > { %v3099_v15 = vrot.slane %v372_v12, %v384_v9  ;;  %v377_v19 = vrot.slane %v372_v12, %v376_v10  ;;  %v3105_v20 = vrot.slane %v372_v12, %v388_v11  ;;  %v381_v23 = vrot.slane %v372_v12, %v380_v16  ;;  %s329_s30 = scalar_lea.vmem [#allocation13], %s2116_s7  ;;  %s3483_s16 = scalar_lea.hbm %s3537_s6, %s2195_s14 }
  0x7c   : > { %s1984_s28 = sshll.u32 %s329_s30, 4  ;;  %s1971_s11 = scalar_lea.sflag [#allocation7], %s2927_s12  ;;  %s3485_s28 = int_to_ptr.vmem [resolvable:$true] %s1984_s28 }
  0x7d   : > { %591 = vmatpush1.bf16.msra.mxu0 %v2368_v27  ;;  %664 = vmatpush1.bf16.msra.mxu1 %v2369_v28  ;;  %s2654_s2 = scalar_lea.vmem %s3485_s28, 128  ;;  %s2755_s24 = smov [#allocation13]  }
  0x7e   : > { %592 = vmatprep.subr.bf16.mxu0 %v2370_v29  ;;  %665 = vmatprep.subr.bf16.mxu1 %v2372_v30  ;;  %p2655_p10 = scmp.ne.s32.totalorder %s3485_s28, %s2654_s2  ;;  %s2658_s17 = sshll.u32 %s2755_s24, 4  ;;  %s2659_s17 = int_to_ptr.vmem [resolvable:$false] %s2658_s17 }
  0x7f   : > { %s2660_s18 = scalar_lea.vmem %s2659_s17, 256  ;;  %p2661_p7 = scmp.lt.s32.totalorder %s3485_s28, %s2659_s17 }
  0x80   : > { %p2656_p2 = pnand %p2655_p10, %p2894_p0  ;;  %p2662_p6 = scmp.lt.s32.totalorder %s2660_s18, %s2654_s2 }
  0x81   : > { %593 = vmatpush1.bf16.msra.mxu0 %v2374_v31  ;;  %666 = vmatpush1.bf16.msra.mxu1 %v2375_v32 }
  0x82   : > { %963 = vmatprep.subr.bf16.mxu0 %v2948_v33  ;;  %1004 = vmatprep.subr.bf16.mxu1 %v2950_v34  ;;  %p2657_p11 = pneg %p2656_p2  ;;  %p2663_p9 = por %p2662_p6, %p2661_p7 }
  0x84   : > { %611 = vmatmul.mubr.bf16.vlgmr.msra.gmra.mxu0 %v2376_v35  ;;  %684 = vmatmul.mubr.bf16.vlgmr.msra.gmra.mxu1 %v2376_v35  ;;  %p2664_p13 = pnand %p2663_p9, %p2657_p11 }
  0x85   : > { %964 = vmatpush1.bf16.msra.mxu0 %v2953_v36  ;;  %1005 = vmatpush1.bf16.msra.mxu1 %v2955_v37 }
  0x86   : > { %965 = vmatprep.subr.bf16.mxu0 %v2959_v38  ;;  %1006 = vmatprep.subr.bf16.mxu1 %v2961_v39 }
  0x87   : > { %620 = vmatprep.mubr.bf16.mxu0 %v3544_v0  ;;  %693 = vmatprep.mubr.bf16.mxu1 %v3544_v0 }
  0x89   : > { %966 = vmatpush1.bf16.msra.mxu0 %v2963_v40  ;;  %1007 = vmatpush1.bf16.msra.mxu1 %v2967_v41 }
  0x8a   : > { %967 = vmatprep.subr.bf16.mxu0 %v2971_v42  ;;  %1008 = vmatprep.subr.bf16.mxu1 %v2973_v43 }
  0x8c   : > { %621 = vmatmul.mubr.bf16.gmra.mxu0 %v2389_v44  ;;  %694 = vmatmul.mubr.bf16.gmra.mxu1 %v2389_v44 }
  0x8d   : > { %968 = vmatpush1.bf16.msra.mxu0 %v2978_v45  ;;  %1009 = vmatpush1.bf16.msra.mxu1 %v2980_v46 }
  0x8e   : > { %969 = vmatprep.subr.bf16.mxu0 %v2984_v47  ;;  %1010 = vmatprep.subr.bf16.mxu1 %v2988_v48 }
  0x8f   : > { %630 = vmatprep.mubr.bf16.mxu0 %v3544_v0  ;;  %703 = vmatprep.mubr.bf16.mxu1 %v3544_v0 }
  0x91   : > { %970 = vmatpush1.bf16.msra.mxu0 %v2990_v49  ;;  %1011 = vmatpush1.bf16.msra.mxu1 %v2992_v50 }
  0x92   : > { %971 = vmatprep.subr.bf16.mxu0 %v2996_v51  ;;  %1012 = vmatprep.subr.bf16.mxu1 %v3000_v52 }
  0x94   : > { %631 = vmatmul.mubr.bf16.gmra.mxu0 %v2402_v53  ;;  %704 = vmatmul.mubr.bf16.gmra.mxu1 %v2402_v53 }
  0x95   : > { %972 = vmatpush1.bf16.msra.mxu0 %v3005_v54  ;;  %1013 = vmatpush1.bf16.msra.mxu1 %v3007_v55 }
  0x96   : > { %973 = vmatprep.subr.bf16.mxu0 %v3009_v56  ;;  %1014 = vmatprep.subr.bf16.mxu1 %v3011_v57 }
  0x97   : > { %640 = vmatprep.mubr.bf16.mxu0 %v3544_v0  ;;  %713 = vmatprep.mubr.bf16.mxu1 %v3544_v0 }
  0x99   : > { %974 = vmatpush1.bf16.msra.mxu0 %v3017_v58  ;;  %1015 = vmatpush1.bf16.msra.mxu1 %v3021_v59 }
  0x9a   : > { %975 = vmatprep.subr.bf16.mxu0 %v3025_v60  ;;  %1016 = vmatprep.subr.bf16.mxu1 %v3027_v61 }
  0x9c   : > { %641 = vmatmul.mubr.bf16.gmra.mxu0 %v2415_v62  ;;  %714 = vmatmul.mubr.bf16.gmra.mxu1 %v2415_v62 }
  0x9d   : > { %976 = vmatpush1.bf16.msra.mxu0 %v3034_v63  ;;  %1017 = vmatpush1.bf16.msra.mxu1 %v3036_v1 }
  0x9e   : > { %977 = vmatprep.subr.bf16.mxu0 %v3040_v2  ;;  %1018 = vmatprep.subr.bf16.mxu1 %v3042_v3 }
  0x9f   : > { %995 = vmatprep.mubr.bf16.mxu0 %v3544_v0  ;;  %1036 = vmatprep.mubr.bf16.mxu1 %v3544_v0 }
  0xa1   : > { %978 = vmatpush1.bf16.msra.mxu0 %v3046_v4  ;;  %1019 = vmatpush1.bf16.msra.mxu1 %v3048_v5 }
  0xa2   : > { %1075 = vmatprep.subr.bf16.mxu0 %v2948_v33  ;;  %1116 = vmatprep.subr.bf16.mxu1 %v2950_v34 }
  0xa4   : > { %996 = vmatmul.mubr.bf16.vlgmr.msra.gmra.mxu0 %v762_v6  ;;  %1037 = vmatmul.mubr.bf16.vlgmr.msra.gmra.mxu1 %v762_v6 }
  0xa5   : > { %1076 = vmatpush1.bf16.msra.mxu0 %v2953_v36  ;;  %1117 = vmatpush1.bf16.msra.mxu1 %v2955_v37 }
  0xa6   : > { %1077 = vmatprep.subr.bf16.mxu0 %v2959_v38  ;;  %1118 = vmatprep.subr.bf16.mxu1 %v2961_v39 }
  0xa7   : > { %1107 = vmatprep.mubr.bf16.mxu0 %v3544_v0  ;;  %1148 = vmatprep.mubr.bf16.mxu1 %v3544_v0 }
  0xa9   : > { %1078 = vmatpush1.bf16.msra.mxu0 %v2963_v40  ;;  %1119 = vmatpush1.bf16.msra.mxu1 %v2967_v41 }
  0xaa   : > { %1079 = vmatprep.subr.bf16.mxu0 %v2971_v42  ;;  %1120 = vmatprep.subr.bf16.mxu1 %v2973_v43 }
  0xad   : > { %1080 = vmatpush1.bf16.msra.mxu0 %v2978_v45  ;;  %1121 = vmatpush1.bf16.msra.mxu1 %v2980_v46 }
  0xae   : > { %1081 = vmatprep.subr.bf16.mxu0 %v2984_v47  ;;  %1122 = vmatprep.subr.bf16.mxu1 %v2988_v48 }
  0xb1   : > { %1082 = vmatpush1.bf16.msra.mxu0 %v2990_v49  ;;  %1123 = vmatpush1.bf16.msra.mxu1 %v2992_v50 }
  0xb2   : > { %1083 = vmatprep.subr.bf16.mxu0 %v2996_v51  ;;  %1124 = vmatprep.subr.bf16.mxu1 %v3000_v52 }
  0xb5   : > { %1084 = vmatpush1.bf16.msra.mxu0 %v3005_v54  ;;  %1125 = vmatpush1.bf16.msra.mxu1 %v3007_v55 }
  0xb6   : > { %1085 = vmatprep.subr.bf16.mxu0 %v3009_v56  ;;  %1126 = vmatprep.subr.bf16.mxu1 %v3011_v57 }
  0xb9   : > { %1086 = vmatpush1.bf16.msra.mxu0 %v3017_v58  ;;  %1127 = vmatpush1.bf16.msra.mxu1 %v3021_v59 }
  0xba   : > { %1087 = vmatprep.subr.bf16.mxu0 %v3025_v60  ;;  %1128 = vmatprep.subr.bf16.mxu1 %v3027_v61 }
  0xbd   : > { %1088 = vmatpush1.bf16.msra.mxu0 %v3034_v63  ;;  %1129 = vmatpush1.bf16.msra.mxu1 %v3036_v1 }
  0xbe   : > { %1089 = vmatprep.subr.bf16.mxu0 %v3040_v2  ;;  %1130 = vmatprep.subr.bf16.mxu1 %v3042_v3 }
  0xc1   : > { %1090 = vmatpush1.bf16.msra.mxu0 %v3046_v4  ;;  %1131 = vmatpush1.bf16.msra.mxu1 %v3048_v5 }
  0xc2   : > { %1187 = vmatprep.subr.bf16.mxu0 %v2948_v33  ;;  %1228 = vmatprep.subr.bf16.mxu1 %v2950_v34 }
 0x144   : > { %v3095_v13 = vpop.f32.mrf.mxu0  ;;  %v3097_v14 = vpop.f32.mrf.mxu1 }
 0x146   : > { %v3101_v17 = vpop.f32.mrf.mxu0  ;;  %v3103_v18 = vpop.f32.mrf.mxu1 }
 0x148   : > { %v616_v21 = vpop.f32.mrf.mxu0  ;;  %v689_v22 = vpop.f32.mrf.mxu1 }
 0x149   : > { %v3107_v24 = vadd.f32 %v616_v21, %v377_v19  ;;  %v3110_v25 = vadd.f32 %v689_v22, %v3099_v15 }
 0x14a   : > { %v618_v26 = vpop.f32.mrf.mxu0  ;;  %v691_v27 = vpop.f32.mrf.mxu1 }
 0x14b   : > { %v3112_v28 = vadd.f32 %v618_v26, %v381_v23  ;;  %v3115_v29 = vadd.f32 %v691_v27, %v3105_v20 }
 0x14c   : > { %v622_v30 = vpop.f32.mrf.mxu0  ;;  %v695_v31 = vpop.f32.mrf.mxu1 }
 0x14d   : > { %v3117_v32 = vadd.f32 %v622_v30, %v377_v19  ;;  %v3120_v35 = vadd.f32 %v695_v31, %v3099_v15 }
 0x14e   : > { %v624_v44 = vpop.f32.mrf.mxu0  ;;  %v697_v53 = vpop.f32.mrf.mxu1 }
 0x14f   : > { %v3122_v62 = vadd.f32 %v624_v44, %v381_v23  ;;  %v3125_v6 = vadd.f32 %v697_v53, %v3105_v20 }
 0x150   : > { %v626_v7 = vpop.f32.mrf.mxu0  ;;  %v699_v8 = vpop.f32.mrf.mxu1 }
 0x151   : > { %v3127_v9 = vadd.f32 %v626_v7, %v377_v19  ;;  %v3130_v10 = vadd.f32 %v699_v8, %v3099_v15 }
 0x152   : > { %v628_v11 = vpop.f32.mrf.mxu0  ;;  %v701_v12 = vpop.f32.mrf.mxu1 }
 0x153   : > { %3563 = vst [vmem:[#allocation18_spill] sm:$0xff] %v3127_v9  ;;  %3564 = vst [vmem:[#allocation19_spill] sm:$0xff] %v3130_v10  ;;  %v3132_v16 = vadd.f32 %v628_v11, %v381_v23  ;;  %v3135_v21 = vadd.f32 %v701_v12, %v3105_v20  ;;  %v686_v9 = vadd.f32 %v3097_v14, %v3099_v15 }
 0x154   : > { %v632_v22 = vpop.f32.mrf.mxu0  ;;  %v705_v26 = vpop.f32.mrf.mxu1 }
 0x155   : > { %3565 = vst [vmem:[#allocation20_spill] sm:$0xff] %v3132_v16  ;;  %3566 = vst [vmem:[#allocation21_spill] sm:$0xff] %v3135_v21  ;;  %v3137_v27 = vadd.f32 %v632_v22, %v377_v19  ;;  %v3140_v30 = vadd.f32 %v705_v26, %v3099_v15 }
 0x156   : > { %v634_v31 = vpop.f32.mrf.mxu0  ;;  %v707_v44 = vpop.f32.mrf.mxu1 }
 0x157   : > { %3567 = vst [vmem:[#allocation22_spill] sm:$0xff] %v3137_v27  ;;  %3568 = vst [vmem:[#allocation23_spill] sm:$0xff] %v3140_v30  ;;  %v3142_v53 = vadd.f32 %v634_v31, %v381_v23  ;;  %v3145_v7 = vadd.f32 %v707_v44, %v3105_v20 }
 0x158   : > { %v636_v8 = vpop.f32.mrf.mxu0  ;;  %v709_v11 = vpop.f32.mrf.mxu1 }
 0x159   : > { %3569 = vst [vmem:[#allocation24_spill] sm:$0xff] %v3142_v53  ;;  %3570 = vst [vmem:[#allocation25_spill] sm:$0xff] %v3145_v7  ;;  %v3147_v0 = vadd.f32 %v636_v8, %v377_v19  ;;  %v3150_v12 = vadd.f32 %v709_v11, %v3099_v15 }
 0x15a   : > { %v638_v21 = vpop.f32.mrf.mxu0  ;;  %v711_v22 = vpop.f32.mrf.mxu1 }
 0x15b   : > { %3571 = vst [vmem:[#allocation26_spill] sm:$0xff] %v3147_v0  ;;  %3572 = vst [vmem:[#allocation27_spill] sm:$0xff] %v3150_v12  ;;  %v3152_v27 = vadd.f32 %v638_v21, %v381_v23  ;;  %v3155_v26 = vadd.f32 %v711_v22, %v3105_v20 }
 0x15c   : > { %v642_v30 = vpop.f32.mrf.mxu0  ;;  %v715_v31 = vpop.f32.mrf.mxu1 }
 0x15d   : > { %3573 = vst [vmem:[#allocation28_spill] sm:$0xff] %v3152_v27  ;;  %3574 = vst [vmem:[#allocation29_spill] sm:$0xff] %v3155_v26  ;;  %v3157_v53 = vadd.f32 %v642_v30, %v377_v19  ;;  %v3160_v44 = vadd.f32 %v715_v31, %v3099_v15 }
 0x15e   : > { %v644_v7 = vpop.f32.mrf.mxu0  ;;  %v717_v8 = vpop.f32.mrf.mxu1 }
 0x15f   : > { %3575 = vst [vmem:[#allocation30_spill] sm:$0xff] %v3157_v53  ;;  %3576 = vst [vmem:[#allocation31_spill] sm:$0xff] %v3160_v44  ;;  %v3162_v0 = vadd.f32 %v644_v7, %v381_v23  ;;  %v3165_v11 = vadd.f32 %v717_v8, %v3105_v20  ;;  %v613_v53 = vadd.f32 %v3095_v13, %v377_v19 }
 0x160   : > { %v646_v12 = vpop.f32.mrf.mxu0  ;;  %v719_v21 = vpop.f32.mrf.mxu1  ;;  %v615_v8 = vadd.f32 %v3101_v17, %v381_v23 }
 0x161   : > { %3577 = vst [vmem:[#allocation32_spill] sm:$0xff] %v3162_v0  ;;  %3578 = vst [vmem:[#allocation33_spill] sm:$0xff] %v3165_v11  ;;  %v3167_v27 = vadd.f32 %v646_v12, %v377_v19  ;;  %v3170_v22 = vadd.f32 %v719_v21, %v3099_v15 }
 0x162   : > { %v648_v26 = vpop.f32.mrf.mxu0  ;;  %v721_v30 = vpop.f32.mrf.mxu1 }
 0x163   : > { %3579 = vst [vmem:[#allocation34_spill] sm:$0xff] %v3167_v27  ;;  %3580 = vst [vmem:[#allocation35_spill] sm:$0xff] %v3170_v22  ;;  %v3173_v31 = vadd.f32 %v648_v26, %v381_v23  ;;  %v3176_v44 = vadd.f32 %v721_v30, %v3105_v20 }
 0x164   : > { %v997_v7 = vpop.f32.mrf.mxu0  ;;  %v1038_v0 = vpop.f32.mrf.mxu1 }
 0x165   : > { %3581 = vst [vmem:[#allocation36_spill] sm:$0xff] %v3176_v44  ;;  %v1045_v11 = vadd.f32 %v997_v7, %v613_v53  ;;  %v1047_v30 = vadd.f32 %v1038_v0, %v686_v9  ;;  %v688_v44 = vadd.f32 %v3103_v18, %v3105_v20 }
 0x166   : > { %v999_v10 = vpop.f32.mrf.mxu0  ;;  %v1040_v12 = vpop.f32.mrf.mxu1 }
 0x167   : > { %v1049_v27 = vmul.f32 0.5, %v1045_v11  ;;  %v1046_v16 = vadd.f32 %v999_v10, %v615_v8  ;;  %v1048_v17 = vadd.f32 %v1040_v12, %v688_v44 }
 0x168   : > { %v1001_v21 = vpop.f32.mrf.mxu0  ;;  %v1042_v22 = vpop.f32.mrf.mxu1 }
 0x169   : > { %2436 = vtanh.f32 %v1049_v27  ;;  %v1053_v13 = vmul.f32 0.5, %v1046_v16  ;;  %v1058_v23 = vmul.f32 0.5, %v1048_v17  ;;  %v3582_v21 = vmov 0  }
 0x16a   : > { %v1002_v19 = vpop.f32.mrf.mxu0  ;;  %v1043_v26 = vpop.f32.mrf.mxu1 }
 0x16b   : > { %2438 = vtanh.f32 %v1053_v13 }
 0x16c   : > { %2440 = vtanh.f32 %v1047_v30 }
 0x16d   : > { %2442 = vtanh.f32 %v1058_v23 }
 0x176   : > { %v2437_v53 = vpop.eup %2436 }
 0x177   : > { %v1051_v11 = vadd.f32 1.0, %v2437_v53 }
 0x178   : > { %v2439_v10 = vpop.eup %2438 }
 0x179   : > { %v1052_v7 = vmul.f32 0.5, %v1051_v11  ;;  %v1055_v22 = vadd.f32 1.0, %v2439_v10  ;;  %v2441_v14 = vpop.eup %2440 }
 0x17a   : > { %v2443_v0 = vpop.eup %2442 }
 0x17b   : > { %v1056_v8 = vmul.f32 0.5, %v1055_v22  ;;  %v1063_v16 = vmul.f32 %v2441_v14, %v1052_v7  ;;  %v1060_v9 = vadd.f32 1.0, %v2443_v0 }
 0x17d   : > { %v1062_v15 = vmul.f32 0.0, %v1056_v8  ;;  %v1061_v18 = vmul.f32 0.5, %v1060_v9 }
 0x17f   : > { %v3183_v27 = vadd.f32 %v1063_v16, %v1062_v15 }
 0x181   : > { %2444 = vtanh.f32 %v3183_v27 }
 0x18e   : > { %v2445_v20 = vpop.eup %2444 }
 0x18f   : > { %v1066_v44 = vmul.f32 %v2445_v20, %v1061_v18 }
 0x191   : > { %v1067_v12 = vpack.c.bf16 %v1066_v44, %v1066_v44 }
 0x193   : > { %1108 = vmatmul.mubr.bf16.vlgmr.msra.gmra.mxu0 %v1067_v12  ;;  %1149 = vmatmul.mubr.bf16.vlgmr.msra.gmra.mxu1 %v1067_v12 }
 0x194   : > { %1188 = vmatpush1.bf16.msra.mxu0 %v2953_v36  ;;  %1229 = vmatpush1.bf16.msra.mxu1 %v2955_v37 }
 0x195   : > { %1189 = vmatprep.subr.bf16.mxu0 %v2959_v38  ;;  %1230 = vmatprep.subr.bf16.mxu1 %v2961_v39 }
 0x196   : > { %1219 = vmatprep.mubr.bf16.mxu0 %v3582_v21  ;;  %1260 = vmatprep.mubr.bf16.mxu1 %v3582_v21 }
 0x198   : > { %1190 = vmatpush1.bf16.msra.mxu0 %v2963_v40  ;;  %1231 = vmatpush1.bf16.msra.mxu1 %v2967_v41 }
 0x199   : > { %1191 = vmatprep.subr.bf16.mxu0 %v2971_v42  ;;  %1232 = vmatprep.subr.bf16.mxu1 %v2973_v43 }
 0x19c   : > { %1192 = vmatpush1.bf16.msra.mxu0 %v2978_v45  ;;  %1233 = vmatpush1.bf16.msra.mxu1 %v2980_v46 }
 0x19d   : > { %1193 = vmatprep.subr.bf16.mxu0 %v2984_v47  ;;  %1234 = vmatprep.subr.bf16.mxu1 %v2988_v48 }
 0x1a0   : > { %1194 = vmatpush1.bf16.msra.mxu0 %v2990_v49  ;;  %1235 = vmatpush1.bf16.msra.mxu1 %v2992_v50 }
 0x1a1   : > { %1195 = vmatprep.subr.bf16.mxu0 %v2996_v51  ;;  %1236 = vmatprep.subr.bf16.mxu1 %v3000_v52 }
 0x1a4   : > { %1196 = vmatpush1.bf16.msra.mxu0 %v3005_v54  ;;  %1237 = vmatpush1.bf16.msra.mxu1 %v3007_v55 }
 0x1a5   : > { %1197 = vmatprep.subr.bf16.mxu0 %v3009_v56  ;;  %1238 = vmatprep.subr.bf16.mxu1 %v3011_v57 }
 0x1a8   : > { %1198 = vmatpush1.bf16.msra.mxu0 %v3017_v58  ;;  %1239 = vmatpush1.bf16.msra.mxu1 %v3021_v59 }
 0x1a9   : > { %1199 = vmatprep.subr.bf16.mxu0 %v3025_v60  ;;  %1240 = vmatprep.subr.bf16.mxu1 %v3027_v61 }
 0x1ac   : > { %1200 = vmatpush1.bf16.msra.mxu0 %v3034_v63  ;;  %1241 = vmatpush1.bf16.msra.mxu1 %v3036_v1 }
 0x1ad   : > { %1201 = vmatprep.subr.bf16.mxu0 %v3040_v2  ;;  %1242 = vmatprep.subr.bf16.mxu1 %v3042_v3 }
 0x1b0   : > { %1202 = vmatpush1.bf16.msra.mxu0 %v3046_v4  ;;  %1243 = vmatpush1.bf16.msra.mxu1 %v3048_v5 }
 0x1b1   : > { %1299 = vmatprep.subr.bf16.mxu0 %v2948_v33  ;;  %1340 = vmatprep.subr.bf16.mxu1 %v2950_v34 }
 0x253   : > { %v1109_v13 = vpop.f32.mrf.mxu0  ;;  %v1150_v19 = vpop.f32.mrf.mxu1 }
 0x254   : > { %v1157_v26 = vadd.f32 %v1109_v13, %v3107_v24  ;;  %v1159_v7 = vadd.f32 %v1150_v19, %v3110_v25 }
 0x255   : > { %v1111_v30 = vpop.f32.mrf.mxu0  ;;  %v1152_v17 = vpop.f32.mrf.mxu1 }
 0x256   : > { %v1161_v23 = vmul.f32 0.5, %v1157_v26  ;;  %v1158_v53 = vadd.f32 %v1111_v30, %v3112_v28  ;;  %v1160_v15 = vadd.f32 %v1152_v17, %v3115_v29 }
 0x257   : > { %v1113_v11 = vpop.f32.mrf.mxu0  ;;  %v1154_v10 = vpop.f32.mrf.mxu1 }
 0x258   : > { %2446 = vtanh.f32 %v1161_v23  ;;  %v1165_v22 = vmul.f32 0.5, %v1158_v53  ;;  %v1170_v16 = vmul.f32 0.5, %v1160_v15 }
 0x259   : > { %v1114_v8 = vpop.f32.mrf.mxu0  ;;  %v1155_v14 = vpop.f32.mrf.mxu1 }
 0x25a   : > { %2448 = vtanh.f32 %v1165_v22 }
 0x25b   : > { %2450 = vtanh.f32 %v1159_v7 }
 0x25c   : > { %2452 = vtanh.f32 %v1170_v16 }
 0x265   : > { %v2447_v0 = vpop.eup %2446 }
 0x266   : > { %v1163_v24 = vadd.f32 1.0, %v2447_v0 }
 0x267   : > { %v2449_v9 = vpop.eup %2448 }
 0x268   : > { %v1164_v18 = vmul.f32 0.5, %v1163_v24  ;;  %v1167_v20 = vadd.f32 1.0, %v2449_v9  ;;  %v2451_v28 = vpop.eup %2450 }
 0x269   : > { %v2453_v19 = vpop.eup %2452 }
 0x26a   : > { %v1168_v44 = vmul.f32 0.5, %v1167_v20  ;;  %v1175_v12 = vmul.f32 %v2451_v28, %v1164_v18  ;;  %v1172_v26 = vadd.f32 1.0, %v2453_v19 }
 0x26c   : > { %v1174_v13 = vmul.f32 %v1168_v44, %v3183_v27  ;;  %v1173_v30 = vmul.f32 0.5, %v1172_v26 }
 0x26e   : > { %v3225_v25 = vadd.f32 %v1175_v12, %v1174_v13 }
 0x270   : > { %2454 = vtanh.f32 %v3225_v25 }
 0x27d   : > { %v2455_v29 = vpop.eup %2454 }
 0x27e   : > { %v1178_v17 = vmul.f32 %v2455_v29, %v1173_v30 }
 0x280   : > { %v1179_v23 = vpack.c.bf16 %v1178_v17, %v1178_v17 }
 0x282   : > { %1220 = vmatmul.mubr.bf16.vlgmr.msra.gmra.mxu0 %v1179_v23  ;;  %1261 = vmatmul.mubr.bf16.vlgmr.msra.gmra.mxu1 %v1179_v23 }
 0x283   : > { %1300 = vmatpush1.bf16.msra.mxu0 %v2953_v36  ;;  %1341 = vmatpush1.bf16.msra.mxu1 %v2955_v37 }
 0x284   : > { %1301 = vmatprep.subr.bf16.mxu0 %v2959_v38  ;;  %1342 = vmatprep.subr.bf16.mxu1 %v2961_v39 }
 0x285   : > { %1331 = vmatprep.mubr.bf16.mxu0 %v3582_v21  ;;  %1372 = vmatprep.mubr.bf16.mxu1 %v3582_v21 }
 0x287   : > { %1302 = vmatpush1.bf16.msra.mxu0 %v2963_v40  ;;  %1343 = vmatpush1.bf16.msra.mxu1 %v2967_v41 }
 0x288   : > { %1303 = vmatprep.subr.bf16.mxu0 %v2971_v42  ;;  %1344 = vmatprep.subr.bf16.mxu1 %v2973_v43 }
 0x28b   : > { %1304 = vmatpush1.bf16.msra.mxu0 %v2978_v45  ;;  %1345 = vmatpush1.bf16.msra.mxu1 %v2980_v46 }
 0x28c   : > { %1305 = vmatprep.subr.bf16.mxu0 %v2984_v47  ;;  %1346 = vmatprep.subr.bf16.mxu1 %v2988_v48 }
 0x28f   : > { %1306 = vmatpush1.bf16.msra.mxu0 %v2990_v49  ;;  %1347 = vmatpush1.bf16.msra.mxu1 %v2992_v50 }
 0x290   : > { %1307 = vmatprep.subr.bf16.mxu0 %v2996_v51  ;;  %1348 = vmatprep.subr.bf16.mxu1 %v3000_v52 }
 0x293   : > { %1308 = vmatpush1.bf16.msra.mxu0 %v3005_v54  ;;  %1349 = vmatpush1.bf16.msra.mxu1 %v3007_v55 }
 0x294   : > { %1309 = vmatprep.subr.bf16.mxu0 %v3009_v56  ;;  %1350 = vmatprep.subr.bf16.mxu1 %v3011_v57 }
 0x297   : > { %1310 = vmatpush1.bf16.msra.mxu0 %v3017_v58  ;;  %1351 = vmatpush1.bf16.msra.mxu1 %v3021_v59 }
 0x298   : > { %1311 = vmatprep.subr.bf16.mxu0 %v3025_v60  ;;  %1352 = vmatprep.subr.bf16.mxu1 %v3027_v61 }
 0x29b   : > { %1312 = vmatpush1.bf16.msra.mxu0 %v3034_v63  ;;  %1353 = vmatpush1.bf16.msra.mxu1 %v3036_v1 }
 0x29c   : > { %1313 = vmatprep.subr.bf16.mxu0 %v3040_v2  ;;  %1354 = vmatprep.subr.bf16.mxu1 %v3042_v3 }
 0x29f   : > { %1314 = vmatpush1.bf16.msra.mxu0 %v3046_v4  ;;  %1355 = vmatpush1.bf16.msra.mxu1 %v3048_v5 }
 0x2a0   : > { %1411 = vmatprep.subr.bf16.mxu0 %v2948_v33  ;;  %1452 = vmatprep.subr.bf16.mxu1 %v2950_v34 }
 0x342   : > { %v1221_v27 = vpop.f32.mrf.mxu0  ;;  %v1262_v53 = vpop.f32.mrf.mxu1 }
 0x343   : > { %v1269_v11 = vadd.f32 %v1221_v27, %v3117_v32  ;;  %v1271_v16 = vadd.f32 %v1262_v53, %v3120_v35 }
 0x344   : > { %v1223_v10 = vpop.f32.mrf.mxu0  ;;  %v1264_v7 = vpop.f32.mrf.mxu1 }
 0x345   : > { %v1273_v22 = vmul.f32 0.5, %v1269_v11  ;;  %v1270_v8 = vadd.f32 %v1223_v10, %v3122_v62  ;;  %v1272_v18 = vadd.f32 %v1264_v7, %v3125_v6  ;;  %v3583_v10 = vld [vmem:[#allocation18_spill] sm:$0xff] }
 0x346   : > { %v1225_v14 = vpop.f32.mrf.mxu0  ;;  %v1266_v15 = vpop.f32.mrf.mxu1 }
 0x347   : > { %2456 = vtanh.f32 %v1273_v22  ;;  %v1277_v0 = vmul.f32 0.5, %v1270_v8  ;;  %v1282_v20 = vmul.f32 0.5, %v1272_v18  ;;  %v3584_v15 = vld [vmem:[#allocation20_spill] sm:$0xff] }
 0x348   : > { %v1226_v24 = vpop.f32.mrf.mxu0  ;;  %v1267_v9 = vpop.f32.mrf.mxu1 }
 0x349   : > { %2458 = vtanh.f32 %v1277_v0  ;;  %v3585_v9 = vld [vmem:[#allocation19_spill] sm:$0xff] }
 0x34a   : > { %2460 = vtanh.f32 %v1271_v16 }
 0x34b   : > { %2462 = vtanh.f32 %v1282_v20 }
 0x354   : > { %v2457_v28 = vpop.eup %2456 }
 0x355   : > { %v1275_v32 = vadd.f32 1.0, %v2457_v28 }
 0x356   : > { %v2459_v44 = vpop.eup %2458 }
 0x357   : > { %v1276_v12 = vmul.f32 0.5, %v1275_v32  ;;  %v1279_v13 = vadd.f32 1.0, %v2459_v44  ;;  %v2461_v62 = vpop.eup %2460 }
 0x358   : > { %v2463_v29 = vpop.eup %2462 }
 0x359   : > { %v1280_v19 = vmul.f32 0.5, %v1279_v13  ;;  %v1287_v26 = vmul.f32 %v2461_v62, %v1276_v12  ;;  %v1284_v17 = vadd.f32 1.0, %v2463_v29 }
 0x35b   : > { %v1286_v30 = vmul.f32 %v1280_v19, %v3225_v25  ;;  %v1285_v23 = vmul.f32 0.5, %v1284_v17 }
 0x35d   : > { %v3267_v35 = vadd.f32 %v1287_v26, %v1286_v30 }
 0x35f   : > { %2464 = vtanh.f32 %v3267_v35 }
 0x36c   : > { %v2465_v6 = vpop.eup %2464 }
 0x36d   : > { %v1290_v27 = vmul.f32 %v2465_v6, %v1285_v23 }
 0x36f   : > { %v1291_v53 = vpack.c.bf16 %v1290_v27, %v1290_v27 }
 0x371   : > { %1332 = vmatmul.mubr.bf16.vlgmr.msra.gmra.mxu0 %v1291_v53  ;;  %1373 = vmatmul.mubr.bf16.vlgmr.msra.gmra.mxu1 %v1291_v53 }
 0x372   : > { %1412 = vmatpush1.bf16.msra.mxu0 %v2953_v36  ;;  %1453 = vmatpush1.bf16.msra.mxu1 %v2955_v37 }
 0x373   : > { %1413 = vmatprep.subr.bf16.mxu0 %v2959_v38  ;;  %1454 = vmatprep.subr.bf16.mxu1 %v2961_v39 }
 0x374   : > { %1443 = vmatprep.mubr.bf16.mxu0 %v3582_v21  ;;  %1484 = vmatprep.mubr.bf16.mxu1 %v3582_v21 }
 0x376   : > { %1414 = vmatpush1.bf16.msra.mxu0 %v2963_v40  ;;  %1455 = vmatpush1.bf16.msra.mxu1 %v2967_v41 }
 0x377   : > { %1415 = vmatprep.subr.bf16.mxu0 %v2971_v42  ;;  %1456 = vmatprep.subr.bf16.mxu1 %v2973_v43 }
 0x37a   : > { %1416 = vmatpush1.bf16.msra.mxu0 %v2978_v45  ;;  %1457 = vmatpush1.bf16.msra.mxu1 %v2980_v46 }
 0x37b   : > { %1417 = vmatprep.subr.bf16.mxu0 %v2984_v47  ;;  %1458 = vmatprep.subr.bf16.mxu1 %v2988_v48 }
 0x37e   : > { %1418 = vmatpush1.bf16.msra.mxu0 %v2990_v49  ;;  %1459 = vmatpush1.bf16.msra.mxu1 %v2992_v50 }
 0x37f   : > { %1419 = vmatprep.subr.bf16.mxu0 %v2996_v51  ;;  %1460 = vmatprep.subr.bf16.mxu1 %v3000_v52 }
 0x382   : > { %1420 = vmatpush1.bf16.msra.mxu0 %v3005_v54  ;;  %1461 = vmatpush1.bf16.msra.mxu1 %v3007_v55 }
 0x383   : > { %1421 = vmatprep.subr.bf16.mxu0 %v3009_v56  ;;  %1462 = vmatprep.subr.bf16.mxu1 %v3011_v57 }
 0x386   : > { %1422 = vmatpush1.bf16.msra.mxu0 %v3017_v58  ;;  %1463 = vmatpush1.bf16.msra.mxu1 %v3021_v59 }
 0x387   : > { %1423 = vmatprep.subr.bf16.mxu0 %v3025_v60  ;;  %1464 = vmatprep.subr.bf16.mxu1 %v3027_v61 }
 0x38a   : > { %1424 = vmatpush1.bf16.msra.mxu0 %v3034_v63  ;;  %1465 = vmatpush1.bf16.msra.mxu1 %v3036_v1 }
 0x38b   : > { %1425 = vmatprep.subr.bf16.mxu0 %v3040_v2  ;;  %1466 = vmatprep.subr.bf16.mxu1 %v3042_v3 }
 0x38e   : > { %1426 = vmatpush1.bf16.msra.mxu0 %v3046_v4  ;;  %1467 = vmatpush1.bf16.msra.mxu1 %v3048_v5 }
 0x38f   : > { %1523 = vmatprep.subr.bf16.mxu0 %v2948_v33  ;;  %1564 = vmatprep.subr.bf16.mxu1 %v2950_v34  ;;  %v3586_v33 = vld [vmem:[#allocation21_spill] sm:$0xff] }
 0x431   : > { %v1333_v25 = vpop.f32.mrf.mxu0  ;;  %v1374_v11 = vpop.f32.mrf.mxu1 }
 0x432   : > { %v1381_v7 = vadd.f32 %v1333_v25, %v3583_v10  ;;  %v1383_v18 = vadd.f32 %v1374_v11, %v3585_v9 }
 0x433   : > { %v1335_v22 = vpop.f32.mrf.mxu0  ;;  %v1376_v8 = vpop.f32.mrf.mxu1 }
 0x434   : > { %v1385_v14 = vmul.f32 0.5, %v1381_v7  ;;  %v1382_v16 = vadd.f32 %v1335_v22, %v3584_v15  ;;  %v1384_v34 = vadd.f32 %v1376_v8, %v3586_v33 }
 0x435   : > { %v1337_v0 = vpop.f32.mrf.mxu0  ;;  %v1378_v24 = vpop.f32.mrf.mxu1 }
 0x436   : > { %2466 = vtanh.f32 %v1385_v14  ;;  %v1389_v20 = vmul.f32 0.5, %v1382_v16  ;;  %v1394_v44 = vmul.f32 0.5, %v1384_v34 }
 0x437   : > { %v1338_v28 = vpop.f32.mrf.mxu0  ;;  %v1379_v32 = vpop.f32.mrf.mxu1 }
 0x438   : > { %2468 = vtanh.f32 %v1389_v20 }
 0x439   : > { %2470 = vtanh.f32 %v1383_v18 }
 0x43a   : > { %2472 = vtanh.f32 %v1394_v44 }
 0x443   : > { %v2467_v12 = vpop.eup %2466 }
 0x444   : > { %v1387_v13 = vadd.f32 1.0, %v2467_v12 }
 0x445   : > { %v2469_v62 = vpop.eup %2468 }
 0x446   : > { %v1388_v19 = vmul.f32 0.5, %v1387_v13  ;;  %v1391_v26 = vadd.f32 1.0, %v2469_v62  ;;  %v2471_v30 = vpop.eup %2470  ;;  %v3358_v13 = vld [vmem:[#allocation10 + $0xe0] ss:$16 sps:$4 sm:$0xff]   ;;  %v3361_v62 = vld [vmem:[#allocation10 + $0xe8] ss:$16 sps:$4 sm:$0xff]  }
 0x447   : > { %v2473_v27 = vpop.eup %2472 }
 0x448   : > { %v1392_v29 = vmul.f32 0.5, %v1391_v26  ;;  %v1399_v17 = vmul.f32 %v2471_v30, %v1388_v19  ;;  %v1396_v53 = vadd.f32 1.0, %v2473_v27  ;;  %v3364_v19 = vld [vmem:[#allocation10 + $0xc4] ss:$16 sps:$4 sm:$0xff]   ;;  %v3367_v26 = vld [vmem:[#allocation10 + $0xcc] ss:$16 sps:$4 sm:$0xff]  }
 0x449   : > { %v3372_v30 = vld [vmem:[#allocation10 + $0xc0] ss:$16 sps:$4 sm:$0xff]   ;;  %v3387_v27 = vld [vmem:[#allocation10 + $0xa8] ss:$16 sps:$4 sm:$0xff]  }
 0x44a   : > { %v1398_v23 = vmul.f32 %v1392_v29, %v3267_v35  ;;  %v1397_v25 = vmul.f32 0.5, %v1396_v53  ;;  %v3375_v29 = vld [vmem:[#allocation10 + $0xc8] ss:$16 sps:$4 sm:$0xff]   ;;  %v3390_v53 = vld [vmem:[#allocation10 + $0x84] ss:$16 sps:$4 sm:$0xff]  }
 0x44c   : > { %v3309_v6 = vadd.f32 %v1399_v17, %v1398_v23  ;;  %v3378_v17 = vld [vmem:[#allocation10 + $0xa4] ss:$16 sps:$4 sm:$0xff]   ;;  %v3381_v23 = vld [vmem:[#allocation10 + $0xac] ss:$16 sps:$4 sm:$0xff]  }
 0x44e   : > { %2474 = vtanh.f32 %v3309_v6 }
 0x45b   : > { %v2475_v11 = vpop.eup %2474 }
 0x45c   : > { %v1402_v10 = vmul.f32 %v2475_v11, %v1397_v25  ;;  %v3393_v25 = vld [vmem:[#allocation10 + $0x8c] ss:$16 sps:$4 sm:$0xff]   ;;  %v3396_v11 = vld [vmem:[#allocation10 + $0x80] ss:$16 sps:$4 sm:$0xff]  }
 0x45e   : > { %v1403_v7 = vpack.c.bf16 %v1402_v10, %v1402_v10  ;;  %v3399_v10 = vld [vmem:[#allocation10 + $0x88] ss:$16 sps:$4 sm:$0xff]  }
 0x460   : > { %1444 = vmatmul.mubr.bf16.vlgmr.msra.gmra.mxu0 %v1403_v7  ;;  %1485 = vmatmul.mubr.bf16.vlgmr.msra.gmra.mxu1 %v1403_v7  ;;  %v3402_v7 = vld [vmem:[#allocation10 + $0x64] ss:$16 sps:$4 sm:$0xff]  }
 0x461   : > { %1524 = vmatpush1.bf16.msra.mxu0 %v2953_v36  ;;  %1565 = vmatpush1.bf16.msra.mxu1 %v2955_v37  ;;  %v3344_v36 = vld [vmem:[#allocation10 + $0xe4] ss:$16 sps:$4 sm:$0xff]   ;;  %v3347_v37 = vld [vmem:[#allocation10 + $0xec] ss:$16 sps:$4 sm:$0xff]  }
 0x462   : > { %1525 = vmatprep.subr.bf16.mxu0 %v2959_v38  ;;  %1566 = vmatprep.subr.bf16.mxu1 %v2961_v39 }
 0x463   : > { %1555 = vmatprep.mubr.bf16.mxu0 %v3582_v21  ;;  %1596 = vmatprep.mubr.bf16.mxu1 %v3582_v21 }
 0x465   : > { %1526 = vmatpush1.bf16.msra.mxu0 %v2963_v40  ;;  %1567 = vmatpush1.bf16.msra.mxu1 %v2967_v41  ;;  %v3587_v40 = vld [vmem:[#allocation22_spill] sm:$0xff] }
 0x466   : > { %1527 = vmatprep.subr.bf16.mxu0 %v2971_v42  ;;  %1568 = vmatprep.subr.bf16.mxu1 %v2973_v43 }
 0x469   : > { %1528 = vmatpush1.bf16.msra.mxu0 %v2978_v45  ;;  %1569 = vmatpush1.bf16.msra.mxu1 %v2980_v46  ;;  %v3588_v46 = vld [vmem:[#allocation24_spill] sm:$0xff] }
 0x46a   : > { %1529 = vmatprep.subr.bf16.mxu0 %v2984_v47  ;;  %1570 = vmatprep.subr.bf16.mxu1 %v2988_v48 }
 0x46d   : > { %1530 = vmatpush1.bf16.msra.mxu0 %v2990_v49  ;;  %1571 = vmatpush1.bf16.msra.mxu1 %v2992_v50  ;;  %v3589_v50 = vld [vmem:[#allocation23_spill] sm:$0xff] }
 0x46e   : > { %1531 = vmatprep.subr.bf16.mxu0 %v2996_v51  ;;  %1572 = vmatprep.subr.bf16.mxu1 %v3000_v52 }
 0x471   : > { %1532 = vmatpush1.bf16.msra.mxu0 %v3005_v54  ;;  %1573 = vmatpush1.bf16.msra.mxu1 %v3007_v55 }
 0x472   : > { %1533 = vmatprep.subr.bf16.mxu0 %v3009_v56  ;;  %1574 = vmatprep.subr.bf16.mxu1 %v3011_v57  ;;  %v3590_v56 = vld [vmem:[#allocation25_spill] sm:$0xff] }
 0x475   : > { %1534 = vmatpush1.bf16.msra.mxu0 %v3017_v58  ;;  %1575 = vmatpush1.bf16.msra.mxu1 %v3021_v59 }
 0x476   : > { %1535 = vmatprep.subr.bf16.mxu0 %v3025_v60  ;;  %1576 = vmatprep.subr.bf16.mxu1 %v3027_v61 }
 0x479   : > { %1536 = vmatpush1.bf16.msra.mxu0 %v3034_v63  ;;  %1577 = vmatpush1.bf16.msra.mxu1 %v3036_v1 }
 0x47a   : > { %1537 = vmatprep.subr.bf16.mxu0 %v3040_v2  ;;  %1578 = vmatprep.subr.bf16.mxu1 %v3042_v3 }
 0x47d   : > { %1538 = vmatpush1.bf16.msra.mxu0 %v3046_v4  ;;  %1579 = vmatpush1.bf16.msra.mxu1 %v3048_v5 }
 0x47e   : > { %1635 = vmatprep.subr.bf16.mxu0 %v3344_v36  ;;  %1676 = vmatprep.subr.bf16.mxu1 %v3347_v37 }
 0x520   : > { %v1445_v38 = vpop.f32.mrf.mxu0  ;;  %v1486_v39 = vpop.f32.mrf.mxu1 }
 0x521   : > { %v1493_v41 = vadd.f32 %v1445_v38, %v3587_v40  ;;  %v1495_v51 = vadd.f32 %v1486_v39, %v3589_v50  ;;  %v3405_v38 = vld [vmem:[#allocation10 + $0x6c] ss:$16 sps:$4 sm:$0xff]   ;;  %v3408_v39 = vld [vmem:[#allocation10 + $0x60] ss:$16 sps:$4 sm:$0xff]   ;;  %v3411_v40 = vld [vmem:[#allocation10 + $0x68] ss:$16 sps:$4 sm:$0xff]  }
 0x522   : > { %v1447_v42 = vpop.f32.mrf.mxu0  ;;  %v1488_v43 = vpop.f32.mrf.mxu1 }
 0x523   : > { %v1497_v45 = vmul.f32 0.5, %v1493_v41  ;;  %v1494_v47 = vadd.f32 %v1447_v42, %v3588_v46  ;;  %v1496_v57 = vadd.f32 %v1488_v43, %v3590_v56  ;;  %v3414_v41 = vld [vmem:[#allocation10 + $0x44] ss:$16 sps:$4 sm:$0xff]   ;;  %v3417_v42 = vld [vmem:[#allocation10 + $0x4c] ss:$16 sps:$4 sm:$0xff]  }
 0x524   : > { %v1449_v48 = vpop.f32.mrf.mxu0  ;;  %v1490_v49 = vpop.f32.mrf.mxu1 }
 0x525   : > { %2476 = vtanh.f32 %v1497_v45  ;;  %v1501_v52 = vmul.f32 0.5, %v1494_v47  ;;  %v1506_v35 = vmul.f32 0.5, %v1496_v57 }
 0x526   : > { %v1450_v54 = vpop.f32.mrf.mxu0  ;;  %v1491_v55 = vpop.f32.mrf.mxu1 }
 0x527   : > { %2478 = vtanh.f32 %v1501_v52 }
 0x528   : > { %2480 = vtanh.f32 %v1495_v51 }
 0x529   : > { %2482 = vtanh.f32 %v1506_v35 }
 0x532   : > { %v2477_v22 = vpop.eup %2476 }
 0x533   : > { %v1499_v8 = vadd.f32 1.0, %v2477_v22 }
 0x534   : > { %v2479_v14 = vpop.eup %2478 }
 0x535   : > { %v1500_v15 = vmul.f32 0.5, %v1499_v8  ;;  %v1503_v16 = vadd.f32 1.0, %v2479_v14  ;;  %v2481_v0 = vpop.eup %2480 }
 0x536   : > { %v2483_v28 = vpop.eup %2482 }
 0x537   : > { %v1504_v24 = vmul.f32 0.5, %v1503_v16  ;;  %v1511_v9 = vmul.f32 %v2481_v0, %v1500_v15  ;;  %v1508_v32 = vadd.f32 1.0, %v2483_v28  ;;  %v2540_v28 = vld [vmem:[#allocation10 + $0x24] ss:$16 sps:$4 sm:$0xff]  }
 0x539   : > { %v1510_v18 = vmul.f32 %v1504_v24, %v3309_v6  ;;  %v1509_v33 = vmul.f32 0.5, %v1508_v32  ;;  %v3384_v6 = vld [vmem:[#allocation10 + $0xa0] ss:$16 sps:$4 sm:$0xff]   ;;  %v2541_v32 = vld [vmem:[#allocation10 + $0x2c] ss:$16 sps:$4 sm:$0xff]  }
 0x53b   : > { %v3355_v20 = vadd.f32 %v1511_v9, %v1510_v18 }
 0x53d   : > { %2484 = vtanh.f32 %v3355_v20 }
 0x54a   : > { %v2485_v34 = vpop.eup %2484 }
 0x54b   : > { %v1514_v44 = vmul.f32 %v2485_v34, %v1509_v33  ;;  %v2542_v33 = vld [vmem:[#allocation10 + $0x20] ss:$16 sps:$4 sm:$0xff]   ;;  %v2543_v34 = vld [vmem:[#allocation10 + $0x28] ss:$16 sps:$4 sm:$0xff]  }
 0x54d   : > { %v1515_v12 = vpack.c.bf16 %v1514_v44, %v1514_v44  ;;  %v2544_v44 = vld [vmem:[#allocation10 + $0x4] ss:$16 sps:$4 sm:$0xff]  }
 0x54f   : > { %1556 = vmatmul.mubr.bf16.vlgmr.msra.gmra.mxu0 %v1515_v12  ;;  %1597 = vmatmul.mubr.bf16.vlgmr.msra.gmra.mxu1 %v1515_v12  ;;  %v2545_v12 = vld [vmem:[#allocation10 + $0xc] ss:$16 sps:$4 sm:$0xff]  }
 0x550   : > { %1636 = vmatpush1.bf16.msra.mxu0 %v3358_v13  ;;  %1677 = vmatpush1.bf16.msra.mxu1 %v3361_v62 }
 0x551   : > { %1637 = vmatprep.subr.bf16.mxu0 %v3364_v19  ;;  %1678 = vmatprep.subr.bf16.mxu1 %v3367_v26 }
 0x552   : > { %1667 = vmatprep.mubr.bf16.mxu0 %v3582_v21  ;;  %1708 = vmatprep.mubr.bf16.mxu1 %v3582_v21 }
 0x554   : > { %1638 = vmatpush1.bf16.msra.mxu0 %v3372_v30  ;;  %1679 = vmatpush1.bf16.msra.mxu1 %v3375_v29 }
 0x555   : > { %1639 = vmatprep.subr.bf16.mxu0 %v3378_v17  ;;  %1680 = vmatprep.subr.bf16.mxu1 %v3381_v23 }
 0x558   : > { %1640 = vmatpush1.bf16.msra.mxu0 %v3384_v6  ;;  %1681 = vmatpush1.bf16.msra.mxu1 %v3387_v27 }
 0x559   : > { %1641 = vmatprep.subr.bf16.mxu0 %v3390_v53  ;;  %1682 = vmatprep.subr.bf16.mxu1 %v3393_v25 }
 0x55c   : > { %1642 = vmatpush1.bf16.msra.mxu0 %v3396_v11  ;;  %1683 = vmatpush1.bf16.msra.mxu1 %v3399_v10 }
 0x55d   : > { %1643 = vmatprep.subr.bf16.mxu0 %v3402_v7  ;;  %1684 = vmatprep.subr.bf16.mxu1 %v3405_v38 }
 0x560   : > { %1644 = vmatpush1.bf16.msra.mxu0 %v3408_v39  ;;  %1685 = vmatpush1.bf16.msra.mxu1 %v3411_v40 }
 0x561   : > { %1645 = vmatprep.subr.bf16.mxu0 %v3414_v41  ;;  %1686 = vmatprep.subr.bf16.mxu1 %v3417_v42 }
 0x564   : > { %1646 = vmatpush1.bf16.msra.mxu0 %v3017_v58  ;;  %1687 = vmatpush1.bf16.msra.mxu1 %v3021_v59 }
 0x565   : > { %1647 = vmatprep.subr.bf16.mxu0 %v3025_v60  ;;  %1688 = vmatprep.subr.bf16.mxu1 %v3027_v61  ;;  %v3591_v60 = vld [vmem:[#allocation26_spill] sm:$0xff] }
 0x568   : > { %1648 = vmatpush1.bf16.msra.mxu0 %v3034_v63  ;;  %1689 = vmatpush1.bf16.msra.mxu1 %v3036_v1  ;;  %v3592_v1 = vld [vmem:[#allocation28_spill] sm:$0xff] }
 0x569   : > { %1649 = vmatprep.subr.bf16.mxu0 %v3040_v2  ;;  %1690 = vmatprep.subr.bf16.mxu1 %v3042_v3  ;;  %v3593_v3 = vld [vmem:[#allocation27_spill] sm:$0xff] }
 0x56c   : > { %1650 = vmatpush1.bf16.msra.mxu0 %v3046_v4  ;;  %1691 = vmatpush1.bf16.msra.mxu1 %v3048_v5 }
 0x56d   : > { %1747 = vmatprep.subr.bf16.mxu0 %v3344_v36  ;;  %1788 = vmatprep.subr.bf16.mxu1 %v3347_v37  ;;  %v3594_v36 = vld [vmem:[#allocation29_spill] sm:$0xff] }
 0x60f   : > { %v1557_v58 = vpop.f32.mrf.mxu0  ;;  %v1598_v59 = vpop.f32.mrf.mxu1 }
 0x610   : > { %v1605_v61 = vadd.f32 %v1557_v58, %v3591_v60  ;;  %v1607_v4 = vadd.f32 %v1598_v59, %v3593_v3 }
 0x611   : > { %v1559_v43 = vpop.f32.mrf.mxu0  ;;  %v1600_v63 = vpop.f32.mrf.mxu1 }
 0x612   : > { %v1609_v45 = vmul.f32 0.5, %v1605_v61  ;;  %v1606_v46 = vadd.f32 %v1559_v43, %v3592_v1  ;;  %v1608_v37 = vadd.f32 %v1600_v63, %v3594_v36 }
 0x613   : > { %v1561_v2 = vpop.f32.mrf.mxu0  ;;  %v1602_v47 = vpop.f32.mrf.mxu1 }
 0x614   : > { %2486 = vtanh.f32 %v1609_v45  ;;  %v1613_v48 = vmul.f32 0.5, %v1606_v46  ;;  %v1618_v50 = vmul.f32 0.5, %v1608_v37  ;;  %v2428_v37 = vld [vmem:[#allocation11 + $0x38] sm:$0xff]  }
 0x615   : > { %v1562_v5 = vpop.f32.mrf.mxu0  ;;  %v1603_v49 = vpop.f32.mrf.mxu1 }
 0x616   : > { %2488 = vtanh.f32 %v1613_v48 }
 0x617   : > { %2490 = vtanh.f32 %v1607_v4 }
 0x618   : > { %2492 = vtanh.f32 %v1618_v50  ;;  %v2753_v50 = vmov 0.0  }
 0x621   : > { %v2487_v51 = vpop.eup %2486 }
 0x622   : > { %v1611_v52 = vadd.f32 1.0, %v2487_v51  ;;  %v2429_v51 = vld [vmem:[#allocation11 + $0x30] sm:$0xff]  }
 0x623   : > { %v2489_v54 = vpop.eup %2488 }
 0x624   : > { %v1612_v55 = vmul.f32 0.5, %v1611_v52  ;;  %v1615_v56 = vadd.f32 1.0, %v2489_v54  ;;  %v2491_v57 = vpop.eup %2490  ;;  %v2430_v52 = vld [vmem:[#allocation11 + $0x28] sm:$0xff]   ;;  %v2431_v54 = vld [vmem:[#allocation11 + $0x20] sm:$0xff]  }
 0x625   : > { %v2493_v15 = vpop.eup %2492 }
 0x626   : > { %v1616_v35 = vmul.f32 0.5, %v1615_v56  ;;  %v1623_v22 = vmul.f32 %v2491_v57, %v1612_v55  ;;  %v1620_v16 = vadd.f32 1.0, %v2493_v15  ;;  %v2432_v55 = vld [vmem:[#allocation11 + $0x18] sm:$0xff]   ;;  %v2433_v56 = vld [vmem:[#allocation11 + $0x10] sm:$0xff]   ;;  %v2434_v57 = vld [vmem:[#allocation11 + $0x8] sm:$0xff]  }
 0x628   : > { %v1622_v8 = vmul.f32 %v1616_v35, %v3355_v20  ;;  %v1621_v0 = vmul.f32 0.5, %v1620_v16  ;;  %v2539_v20 = vld [vmem:[#allocation10 + $0x48] ss:$16 sps:$4 sm:$0xff]   ;;  %v2435_v35 = vld [vmem:[#allocation11] sm:$0xff]  }
 0x62a   : > { %v3437_v14 = vadd.f32 %v1623_v22, %v1622_v8 }
 0x62c   : > { %2494 = vtanh.f32 %v3437_v14 }
 0x639   : > { %v2495_v24 = vpop.eup %2494 }
 0x63a   : > { %v1626_v9 = vmul.f32 %v2495_v24, %v1621_v0 }
 0x63c   : > { %v1627_v18 = vpack.c.bf16 %v1626_v9, %v1626_v9 }
 0x63e   : > { %1668 = vmatmul.mubr.bf16.vlgmr.msra.gmra.mxu0 %v1627_v18  ;;  %1709 = vmatmul.mubr.bf16.vlgmr.msra.gmra.mxu1 %v1627_v18 }
 0x63f   : > { %1748 = vmatpush1.bf16.msra.mxu0 %v3358_v13  ;;  %1789 = vmatpush1.bf16.msra.mxu1 %v3361_v62  ;;  %v2546_v13 = vld [vmem:[#allocation10] ss:$16 sps:$4 sm:$0xff]   ;;  %v2547_v62 = vld [vmem:[#allocation10 + $0x8] ss:$16 sps:$4 sm:$0xff]  }
 0x640   : > { %1749 = vmatprep.subr.bf16.mxu0 %v3364_v19  ;;  %1790 = vmatprep.subr.bf16.mxu1 %v3367_v26 }
 0x641   : > { %1779 = vmatprep.mubr.bf16.mxu0 %v3582_v21  ;;  %1820 = vmatprep.mubr.bf16.mxu1 %v3582_v21  ;;  %v2538_v21 = vld [vmem:[#allocation10 + $0x40] ss:$16 sps:$4 sm:$0xff]  }
 0x643   : > { %1750 = vmatpush1.bf16.msra.mxu0 %v3372_v30  ;;  %1791 = vmatpush1.bf16.msra.mxu1 %v3375_v29  ;;  %v3595_v30 = vld [vmem:[#allocation30_spill] sm:$0xff] }
 0x644   : > { %1751 = vmatprep.subr.bf16.mxu0 %v3378_v17  ;;  %1792 = vmatprep.subr.bf16.mxu1 %v3381_v23 }
 0x647   : > { %1752 = vmatpush1.bf16.msra.mxu0 %v3384_v6  ;;  %1793 = vmatpush1.bf16.msra.mxu1 %v3387_v27  ;;  %v3596_v27 = vld [vmem:[#allocation32_spill] sm:$0xff] }
 0x648   : > { %1753 = vmatprep.subr.bf16.mxu0 %v3390_v53  ;;  %1794 = vmatprep.subr.bf16.mxu1 %v3393_v25 }
 0x64b   : > { %1754 = vmatpush1.bf16.msra.mxu0 %v3396_v11  ;;  %1795 = vmatpush1.bf16.msra.mxu1 %v3399_v10  ;;  %v3597_v10 = vld [vmem:[#allocation31_spill] sm:$0xff] }
 0x64c   : > { %1755 = vmatprep.subr.bf16.mxu0 %v3402_v7  ;;  %1796 = vmatprep.subr.bf16.mxu1 %v3405_v38 }
 0x64f   : > { %1756 = vmatpush1.bf16.msra.mxu0 %v3408_v39  ;;  %1797 = vmatpush1.bf16.msra.mxu1 %v3411_v40 }
 0x650   : > { %1757 = vmatprep.subr.bf16.mxu0 %v3414_v41  ;;  %1798 = vmatprep.subr.bf16.mxu1 %v3417_v42  ;;  %v3598_v41 = vld [vmem:[#allocation33_spill] sm:$0xff] }
 0x653   : > { %1758 = vmatpush1.bf16.msra.mxu0 %v2538_v21  ;;  %1799 = vmatpush1.bf16.msra.mxu1 %v2539_v20  ;;  %v3600_v20 = vld [vmem:[#allocation35_spill] sm:$0xff] }
 0x654   : > { %1759 = vmatprep.subr.bf16.mxu0 %v2540_v28  ;;  %1800 = vmatprep.subr.bf16.mxu1 %v2541_v32 }
 0x657   : > { %1760 = vmatpush1.bf16.msra.mxu0 %v2542_v33  ;;  %1801 = vmatpush1.bf16.msra.mxu1 %v2543_v34 }
 0x658   : > { %1761 = vmatprep.subr.bf16.mxu0 %v2544_v44  ;;  %1802 = vmatprep.subr.bf16.mxu1 %v2545_v12  ;;  %v3601_v44 = vld [vmem:[#allocation36_spill] sm:$0xff] }
 0x65b   : > { %1762 = vmatpush1.bf16.msra.mxu0 %v2546_v13  ;;  %1803 = vmatpush1.bf16.msra.mxu1 %v2547_v62 }
 0x65c   : > { %2208 = vmatprep.subr.bf16.mxu0 %v2753_v50 }
 0x6fe   : > { %v1669_v19 = vpop.f32.mrf.mxu0  ;;  %v1710_v26 = vpop.f32.mrf.mxu1 }
 0x6ff   : > { %v1717_v29 = vadd.f32 %v1669_v19, %v3595_v30  ;;  %v1719_v7 = vadd.f32 %v1710_v26, %v3597_v10 }
 0x700   : > { %v1671_v17 = vpop.f32.mrf.mxu0  ;;  %v1712_v23 = vpop.f32.mrf.mxu1 }
 0x701   : > { %v1721_v6 = vmul.f32 0.5, %v1717_v29  ;;  %v1718_v53 = vadd.f32 %v1671_v17, %v3596_v27  ;;  %v1720_v42 = vadd.f32 %v1712_v23, %v3598_v41 }
 0x702   : > { %v1673_v25 = vpop.f32.mrf.mxu0  ;;  %v1714_v11 = vpop.f32.mrf.mxu1 }
 0x703   : > { %2496 = vtanh.f32 %v1721_v6  ;;  %v1725_v38 = vmul.f32 0.5, %v1718_v53  ;;  %v1730_v58 = vmul.f32 0.5, %v1720_v42 }
 0x704   : > { %v1674_v39 = vpop.f32.mrf.mxu0  ;;  %v1715_v40 = vpop.f32.mrf.mxu1 }
 0x705   : > { %2498 = vtanh.f32 %v1725_v38  ;;  %v2185_v40 = vld [vmem:[%s3536_s5] ss:$0 sm:$0xff] }
 0x706   : > { %2500 = vtanh.f32 %v1719_v7 }
 0x707   : > { %2502 = vtanh.f32 %v1730_v58 }
 0x710   : > { %v2497_v59 = vpop.eup %2496 }
 0x711   : > { %v1723_v60 = vadd.f32 1.0, %v2497_v59 }
 0x712   : > { %v2499_v61 = vpop.eup %2498 }
 0x713   : > { %v1724_v43 = vmul.f32 0.5, %v1723_v60  ;;  %v1727_v63 = vadd.f32 1.0, %v2499_v61  ;;  %v2501_v45 = vpop.eup %2500 }
 0x714   : > { %v2503_v3 = vpop.eup %2502 }
 0x715   : > { %v1728_v1 = vmul.f32 0.5, %v1727_v63  ;;  %v1735_v46 = vmul.f32 %v2501_v45, %v1724_v43  ;;  %v1732_v4 = vadd.f32 1.0, %v2503_v3 }
 0x717   : > { %v1734_v2 = vmul.f32 %v1728_v1, %v3437_v14  ;;  %v1733_v48 = vmul.f32 0.5, %v1732_v4  ;;  %v3599_v14 = vld [vmem:[#allocation34_spill] sm:$0xff] }
 0x719   : > { %v3467_v47 = vadd.f32 %v1735_v46, %v1734_v2 }
 0x71b   : > { %2504 = vtanh.f32 %v3467_v47 }
 0x728   : > { %v2505_v5 = vpop.eup %2504 }
 0x729   : > { %v1738_v49 = vmul.f32 %v2505_v5, %v1733_v48 }
 0x72b   : > { %v1739_v36 = vpack.c.bf16 %v1738_v49, %v1738_v49 }
 0x72d   : > { %1780 = vmatmul.mubr.bf16.vlgmr.msra.gmra.mxu0 %v1739_v36  ;;  %1821 = vmatmul.mubr.bf16.vlgmr.msra.gmra.mxu1 %v1739_v36 }
 0x72e   : > { %2209 = vmatpush3.bf16.msra.mxu0 %v2428_v37  ;;  %2224 = vmatprep.mubr.msk.bf16.mxu0 %vm2754_vm0, %v2753_v50 }
 0x72f   : > { %2210 = vmatprep.subr.bf16.mxu0 %v2753_v50 }
 0x732   : > { %2211 = vmatpush3.bf16.msra.mxu0 %v2429_v51 }
 0x733   : > { %2212 = vmatprep.subr.bf16.mxu0 %v2753_v50 }
 0x736   : > { %2213 = vmatpush3.bf16.msra.mxu0 %v2430_v52 }
 0x737   : > { %2214 = vmatprep.subr.bf16.mxu0 %v2753_v50 }
 0x73a   : > { %2215 = vmatpush3.bf16.msra.mxu0 %v2431_v54 }
 0x73b   : > { %2216 = vmatprep.subr.bf16.mxu0 %v2753_v50 }
 0x73e   : > { %2217 = vmatpush3.bf16.msra.mxu0 %v2432_v55 }
 0x73f   : > { %2218 = vmatprep.subr.bf16.mxu0 %v2753_v50 }
 0x742   : > { %2219 = vmatpush3.bf16.msra.mxu0 %v2433_v56 }
 0x743   : > { %2220 = vmatprep.subr.bf16.mxu0 %v2753_v50 }
 0x746   : > { %2221 = vmatpush3.bf16.msra.mxu0 %v2434_v57 }
 0x747   : > { %2222 = vmatprep.subr.bf16.mxu0 %v2753_v50 }
 0x74a   : > { %2223 = vmatpush3.bf16.msra.mxu0 %v2435_v35 }
 0x7ed   : > { %v1781_v22 = vpop.f32.mrf.mxu0  ;;  %v1822_v8 = vpop.f32.mrf.mxu1 }
 0x7ee   : > { %v1829_v15 = vadd.f32 %v1781_v22, %v3599_v14  ;;  %v1831_v28 = vadd.f32 %v1822_v8, %v3600_v20 }
 0x7ef   : > { %v1783_v16 = vpop.f32.mrf.mxu0  ;;  %v1824_v0 = vpop.f32.mrf.mxu1 }
 0x7f0   : > { %v1833_v24 = vmul.f32 0.5, %v1829_v15  ;;  %v1830_v9 = vadd.f32 %v1783_v16, %v3173_v31  ;;  %v1832_v12 = vadd.f32 %v1824_v0, %v3601_v44 }
 0x7f1   : > { %v1785_v18 = vpop.f32.mrf.mxu0  ;;  %v1826_v21 = vpop.f32.mrf.mxu1 }
 0x7f2   : > { %2506 = vtanh.f32 %v1833_v24  ;;  %v1837_v32 = vmul.f32 0.5, %v1830_v9  ;;  %v1842_v13 = vmul.f32 0.5, %v1832_v12 }
 0x7f3   : > { %v1786_v33 = vpop.f32.mrf.mxu0  ;;  %v1827_v34 = vpop.f32.mrf.mxu1 }
 0x7f4   : > { %2508 = vtanh.f32 %v1837_v32 }
 0x7f5   : > { %2510 = vtanh.f32 %v1831_v28 }
 0x7f6   : > { %2512 = vtanh.f32 %v1842_v13 }
 0x7ff   : > { %v2507_v62 = vpop.eup %2506 }
 0x800   : > { %v1835_v19 = vadd.f32 1.0, %v2507_v62 }
 0x801   : > { %v2509_v26 = vpop.eup %2508 }
 0x802   : > { %v1836_v30 = vmul.f32 0.5, %v1835_v19  ;;  %v1839_v29 = vadd.f32 1.0, %v2509_v26  ;;  %v2511_v31 = vpop.eup %2510 }
 0x803   : > { %v2513_v53 = vpop.eup %2512 }
 0x804   : > { %v1840_v17 = vmul.f32 0.5, %v1839_v29  ;;  %v1847_v23 = vmul.f32 %v2511_v31, %v1836_v30  ;;  %v1844_v25 = vadd.f32 1.0, %v2513_v53 }
 0x806   : > { %v1846_v6 = vmul.f32 %v1840_v17, %v3467_v47  ;;  %v1845_v11 = vmul.f32 0.5, %v1844_v25 }
 0x808   : > { %v1848_v27 = vadd.f32 %v1847_v23, %v1846_v6 }
 0x80a   : > { %2514 = vtanh.f32 %v1848_v27 }
 0x817   : > { %v2515_v10 = vpop.eup %2514 }
 0x818   : > { %v1850_v7 = vmul.f32 %v2515_v10, %v1845_v11 }
 0x81a   : > { %v1851_v38 = vpack.c.bf16 %v1850_v7, %v1850_v7 }
 0x81c   : > { %1852 = vst [vmem:[#allocation3] sm:$0xf] %v1851_v38 }
 0x823   : > { %v1857_v39 = vld [vmem:[#allocation3] sm:$0xf] }
 0x824   : > { %2225 = vmatmul.mubr.bf16.vlgmr.msra.gmra.mxu0 %v1857_v39 }
 0x8e4   : > { %v1963_v41 = vpop.f32.mrf.mxu0 }
 0x8e5   : > { %v1964_v42 = vadd.f32 %v2185_v40, %v1963_v41 }
 0x8e6   : > { %v2226_v58 = vpop.f32.mrf.mxu0 }
 0x8e7   : > { %1969 = vst [vmem:[%s329_s30] sm:$0xff] %v1964_v42 }
 0x8e8   : > { %v1966_v59 = vpop.f32.mrf.mxu0 }
 0x8e9   : > { %2667 = shalt.err (!%p2664_p13)
}
 0x8ea   : > { %s2668_s1 = scalar_lea.hbm %s3483_s16, 128  ;;  %s2672_s7 = scalar_lea.hbm %s3537_s6, 256 }
 0x8eb   : > { %p2669_p1 = scmp.ne.s32.totalorder %s3483_s16, %s2668_s1  ;;  %p2673_p12 = scmp.lt.s32.totalorder %s3483_s16, %s3537_s6 }
 0x8ec   : > { %p2674_p5 = scmp.lt.s32.totalorder %s2672_s7, %s2668_s1 }
 0x8ed   : > { %p2670_p4 = pnand %p2669_p1, %p2894_p0 }
 0x8ee   : > { %p2675_p3 = por %p2674_p5, %p2673_p12 }
 0x8ef   : > { %p2671_p8 = pneg %p2670_p4 }
 0x8f1   : > { %p2676_p10 = pnand %p2675_p3, %p2671_p8 }
 0x8f3   : > { %2679 = shalt.err (!%p2676_p10)
}
 0x8f4   : > { %2242 = dma.vmem_to_hbm [thread:$0]  (%p2894_p0), %s3485_s28, 128, %s3483_s16, %s1971_s11   ;;  %v2227_v60 = vpop.f32.mrf.mxu0 }
 0x8f5 PF: > { %s1996_s14 = sand.u32 1, %s2722_s21   ;;  %p3602_p2 = scmp.ne.s32.totalorder %s3551_s8, 0 }
 0x8f6   : > { %p3603_p11 = scmp.ge.s32.totalorder %s2742_s26, 2  ;;  %s1997_s30 = scalar_lea.sflag [#allocation7], %s1996_s14 }
 0x8f8   : > { %p2259_p7 = pnand %p3603_p11, %p3602_p2 }
 0x8fa   : > { %p2260_p6 = pneg %p2259_p7 }
 0x8fc   : > { %2717 = dma.done.wait (%p2260_p6), %s1997_s30, 128  }
 0x8fd   : > { %2719 = vsyncadd (%p2260_p6), %s1997_s30, 4294967168  ;;  %s24_s26 = sadd.s32 1, %s2742_s26   ;;  %s3604_s21 = smov %s2726_s22 }
 0x8fe   : > { %p21_p9 = scmp.ge.s32.totalorder %s24_s26, 4   ;;  %s3605_s22 = smov %s2730_s23 }
 0x8ff   : > { %s3606_s23 = smov %s2906_s13  ;;  %s3607_s24 = smov %s2738_s25 }
 0x900   : > { %s3608_s25 = smov %s3610_s20  ;;  %23 = sbr.rel (!%p21_p9) target bundleno = 11 (0xb), region = 117 }
 0x905   :  { %2002 = vsyncpa [#allocation6], 1 }
 0x906   :  { %2004 = vsyncpa [#allocation6 + $0x1], 1 }
 0x907   :  { %2005 = vsyncpa [#allocation9], 1 }
 0x908   :  { %2006 = vsyncpa [#allocation12], 1 }
 0x909   :  { %2007 = vsyncpa [#allocation7], 1 }
 0x90a   :  { %2009 = vsyncpa [#allocation7 + $0x1], 1 }

</bundles_post_ra>
